<compile_context>
chip_gen: v6e
topology: v6e:2x2x1
jax: 0.10.0
libtpu: 0.0.40
codegen_flags: <defaults>
</compile_context>

<pallas_src>
import functools

import jax
import jax.numpy as jnp
from jax.experimental import pallas as pl
from jax.experimental.pallas import tpu as pltpu


def _round_up(x, m):
    return (x + m - 1) // m * m


def _cdiv(a, b):
    return (a + b - 1) // b


def _choose_tm(T, tm_max):
    """Token tile: as big as allowed, but keep >= 4 tiles (2 per v7x core)."""
    tm = min(tm_max, _round_up(max(T, 8), 8))
    while tm > 64 and _cdiv(T, tm) < 4:
        tm //= 2
    return max(tm, 8)


def _post_attention_kernel(
    x_ref, a_ref,
    wc_ref, bc_ref,        # c_proj              : (D, D) bf16, (1, D) f32
    wgu_ref, bgu_ref,      # fused gate|up chunk : (1, D, 2*th) bf16, (1, 1, 2*th) f32
    wd_ref, bd_ref,        # down-proj chunk     : (th, D) bf16, (1, D) f32
    o_ref,
    h_sc, ln_sc, acc_sc,   # VMEM scratch, persistent across the hidden (j) axis
    *, eps, th,
):
    j = pl.program_id(1)
    mm_dtype = wc_ref.dtype            # bf16 MXU inputs, f32 accumulation

    @pl.when(j == 0)
    def _():
        # h = x + c_proj(a): residual add and LayerNorm stats stay in f32.
        h = (x_ref[...].astype(jnp.float32)
             + jnp.dot(a_ref[...].astype(mm_dtype), wc_ref[...],
                       preferred_element_type=jnp.float32)
             + bc_ref[...])
        mean = jnp.mean(h, axis=-1, keepdims=True)
        cent = h - mean
        var = jnp.mean(cent * cent, axis=-1, keepdims=True)
        h_sc[...] = h
        ln_sc[...] = (cent * jax.lax.rsqrt(var + eps)).astype(ln_sc.dtype)
        acc_sc[...] = jnp.zeros_like(acc_sc)

    # One fused (tm, D) x (D, 2*th) MXU pass for this hidden chunk, then split
    # (th is a multiple of 128, so the split is lane-tile aligned).
    ln = ln_sc[...]
    gu = (jnp.dot(ln, wgu_ref[0], preferred_element_type=jnp.float32)
          + bgu_ref[0])
    g = gu[:, :th]
    u = gu[:, th:]
    act = g * jax.nn.sigmoid(g) * u          # SiLU(g) * u   (sigmoid -> EUP)

    acc_sc[...] += jnp.dot(act.astype(mm_dtype), wd_ref[...],
                           preferred_element_type=jnp.float32)

    @pl.when(j == pl.num_programs(1) - 1)
    def _():
        o_ref[...] = (h_sc[...] + acc_sc[...] + bd_ref[...]).astype(o_ref.dtype)


def dismantled_post_attention(x, a, params, *, eps=1e-6, tm=None):
    """x, a: (B, S, D) activations (bf16 preferred). params: see make_params."""
    B, S, D = x.shape
    nch, D2, two_th = params["wgu"].shape
    assert D2 == D
    th = two_th // 2
    H = nch * th
    assert th % 128 == 0 and H % 128 == 0, "hidden size must be a multiple of 128"
    assert params["wd"].shape == (H, D)

    T = B * S
    x2 = x.reshape(T, D)
    a2 = a.reshape(T, D)

    # Per-generation VMEM budget (v7x: 64 MiB physical; v5e/v6e: 128 MiB).
    try:
        vmem_cap = pltpu.get_tpu_info().vmem_capacity_bytes
    except Exception:
        vmem_cap = 64 << 20
    vmem_limit = min(int(vmem_cap) * 3 // 4, 96 << 20)
    tm_max = 512 if vmem_cap >= (128 << 20) else 256

    if tm is None:
        tm = _choose_tm(T, tm_max)

    # No wrapper-side padding: partial last token tile is masked by Pallas and
    # every row's math is independent, so pad/garbage rows never contaminate.
    grid = (_cdiv(T, tm), nch)

    tok_spec = pl.BlockSpec((tm, D), lambda i, j: (i, 0))

    def wspec(shape, index_map, single_buffer):
        # Blocks whose index never changes across the grid only need one VMEM
        # buffer; halving their footprint matters once D/H are realistic.
        if single_buffer:
            return pl.BlockSpec(shape, index_map, pipeline_mode=pl.Buffered(1))
        return pl.BlockSpec(shape, index_map)

    # Advisory cost estimate so XLA schedules surrounding HLO around this call.
    flops = 2 * T * (D * D + D * (2 * H) + H * D)
    bytes_w = sum(int(v.size) * v.dtype.itemsize for v in params.values())
    bytes_act = (x2.size * x2.dtype.itemsize + a2.size * a2.dtype.itemsize
                 + T * D * x.dtype.itemsize)
    cost = pl.CostEstimate(flops=flops, transcendentals=T * H,
                           bytes_accessed=bytes_w + bytes_act)

    def build(single_buffer):
        grid_const = single_buffer                 # constant across whole grid
        chunk_const = single_buffer and nch == 1   # constant only if one H chunk
        in_specs = [
            tok_spec, tok_spec,
            wspec((D, D), lambda i, j: (0, 0), grid_const),
            wspec((1, D), lambda i, j: (0, 0), grid_const),
            wspec((1, D, two_th), lambda i, j: (j, 0, 0), chunk_const),
            wspec((1, 1, two_th), lambda i, j: (j, 0, 0), chunk_const),
            wspec((th, D), lambda i, j: (j, 0), chunk_const),
            wspec((1, D), lambda i, j: (0, 0), grid_const),
        ]
        return pl.pallas_call(
            functools.partial(_post_attention_kernel, eps=eps, th=th),
            out_shape=jax.ShapeDtypeStruct((T, D), x.dtype),
            grid_spec=pltpu.PrefetchScalarGridSpec(
                num_scalar_prefetch=0,
                grid=grid,
                in_specs=in_specs,
                out_specs=pl.BlockSpec((tm, D), lambda i, j: (i, 0)),
                scratch_shapes=[
                    pltpu.VMEM((tm, D), jnp.float32),          # h (residual)
                    pltpu.VMEM((tm, D), params["wc"].dtype),   # ln (MXU input)
                    pltpu.VMEM((tm, D), jnp.float32),          # down-proj acc
                ],
            ),
            compiler_params=pltpu.CompilerParams(
                dimension_semantics=("parallel", "arbitrary"),
                vmem_limit_bytes=vmem_limit,
            ),
            cost_estimate=cost,
        )

    args = (x2, a2,
            params["wc"], params["bc"],
            params["wgu"], params["bgu"],
            params["wd"], params["bd"])

    try:
        out = build(True)(*args)
    except Exception as e:  # logged fallback: default double-buffered weights
        print("WARNING: single-buffered weight specs rejected "
              f"({type(e).__name__}: {e}); retrying with double-buffered weights.",
              flush=True)
        out = build(False)(*args)

    return out.reshape(B, S, D)


def _reference(x, a, params, eps=1e-6):
    """Pure-JAX f32 reference (weights upcast from their stored bf16 values)."""
    nch, D, two_th = params["wgu"].shape
    th = two_th // 2
    H = nch * th
    wc = params["wc"].astype(jnp.float32)
    wgu = params["wgu"].astype(jnp.float32)                       # (nch, D, 2*th)
    wg = jnp.transpose(wgu[:, :, :th], (1, 0, 2)).reshape(D, H)
    wu = jnp.transpose(wgu[:, :, th:], (1, 0, 2)).reshape(D, H)
    bg = jnp.transpose(params["bgu"][:, :, :th], (1, 0, 2)).reshape(1, H)
    bu = jnp.transpose(params["bgu"][:, :, th:], (1, 0, 2)).reshape(1, H)
    wd = params["wd"].astype(jnp.float32)

    xf = x.astype(jnp.float32)
    af = a.astype(jnp.float32)
    h = xf + jnp.einsum("bsd,de->bse", af, wc) + params["bc"][0]
    mean = jnp.mean(h, axis=-1, keepdims=True)
    var = jnp.mean((h - mean) ** 2, axis=-1, keepdims=True)
    ln = (h - mean) / jnp.sqrt(var + eps)
    g = jnp.einsum("bsd,dh->bsh", ln, wg) + bg[0]
    u = jnp.einsum("bsd,dh->bsh", ln, wu) + bu[0]
    act = g * jax.nn.sigmoid(g) * u
    mlp = jnp.einsum("bsh,hd->bsd", act, wd) + params["bd"][0]
    return h + mlp


def make_params(key, embed_dim, *, weight_dtype=jnp.bfloat16, th_max=2048):
    """Deterministic synthetic params; PyTorch weights pre-transposed to (in, out).

    gate/up weights and biases are packed per hidden chunk as (nch, D, 2*th) /
    (nch, 1, 2*th) so each grid step over the hidden axis does a single fused
    (D, 2*th) projection.
    """
    D, H = embed_dim, 4 * embed_dim
    assert H % 128 == 0
    th = min(H, th_max)
    while H % th:
        th -= 128
    nch = H // th

    ks = jax.random.split(key, 8)
    scale = 0.05
    wc = scale * jax.random.normal(ks[0], (D, D), jnp.float32)
    bc = scale * jax.random.normal(ks[1], (1, D), jnp.float32)
    wg = scale * jax.random.normal(ks[2], (D, H), jnp.float32)
    bg = scale * jax.random.normal(ks[3], (1, H), jnp.float32)
    wu = scale * jax.random.normal(ks[4], (D, H), jnp.float32)
    bu = scale * jax.random.normal(ks[5], (1, H), jnp.float32)
    wd = scale * jax.random.normal(ks[6], (H, D), jnp.float32)
    bd = scale * jax.random.normal(ks[7], (1, D), jnp.float32)

    wgu = jnp.concatenate([wg.reshape(D, nch, th), wu.reshape(D, nch, th)],
                          axis=-1).transpose(1, 0, 2)   # (nch, D, 2*th)
    bgu = jnp.concatenate([bg.reshape(1, nch, th), bu.reshape(1, nch, th)],
                          axis=-1).transpose(1, 0, 2)   # (nch, 1, 2*th)

    return {
        "wc": wc.astype(weight_dtype), "bc": bc,
        "wgu": wgu.astype(weight_dtype), "bgu": bgu,
        "wd": wd.astype(weight_dtype), "bd": bd,
    }


if __name__ == "__main__":
    # embed_dim = 128 (lane-dense output), MLP hidden = 512, tokens = 2*256 = 512.
    # Activations are bf16 at the kernel boundary (halves activation HBM traffic).
    B, S, D = 2, 256, 128
    key = jax.random.PRNGKey(0)
    kx, ka, kp = jax.random.split(key, 3)
    x = jax.random.normal(kx, (B, S, D), jnp.float32).astype(jnp.bfloat16)
    a = jax.random.normal(ka, (B, S, D), jnp.float32).astype(jnp.bfloat16)  # attention output a_x
    params = make_params(kp, D)

    out = dismantled_post_attention(x, a, params)
    out = jax.block_until_ready(out)

    ref = _reference(x, a, params)
    out_f32 = out.astype(jnp.float32)
    max_err = float(jnp.max(jnp.abs(out_f32 - ref)))
    # Tolerance covers bf16 MXU inputs (f32 accumulation) + bf16 output storage
    # vs. the f32 reference computed from the same bf16 inputs/weights.
    assert jnp.allclose(out_f32, ref, atol=6e-2, rtol=6e-2), \
        f"mismatch vs reference (max abs err {max_err})"
    print("KERNEL_OK")
</pallas_src>

<mosaic_0001>
module attributes {stable_mosaic.version = 11 : i64} {
  func.func @_post_attention_kernel(%arg0: i32, %arg1: i32, %arg2: memref<128x128xbf16, #tpu.memory_space<vmem>>, %arg3: memref<128x128xbf16, #tpu.memory_space<vmem>>, %arg4: memref<128x128xbf16, #tpu.memory_space<vmem>>, %arg5: memref<1x128xf32, #tpu.memory_space<vmem>>, %arg6: memref<1x128x1024xbf16, #tpu.memory_space<vmem>>, %arg7: memref<1x1x1024xf32, #tpu.memory_space<vmem>>, %arg8: memref<512x128xbf16, #tpu.memory_space<vmem>>, %arg9: memref<1x128xf32, #tpu.memory_space<vmem>>, %arg10: memref<128x128xbf16, #tpu.memory_space<vmem>>, %arg11: memref<128x128xf32, #tpu.memory_space<vmem>>, %arg12: memref<128x128xbf16, #tpu.memory_space<vmem>>, %arg13: memref<128x128xf32, #tpu.memory_space<vmem>>) attributes {dimension_semantics = [#tpu.dimension_semantics<parallel>, #tpu.dimension_semantics<arbitrary>], iteration_bounds = array<i64: 4, 1>, scalar_prefetch = 0 : i64, scratch_operands = 3 : i64, tpu.core_type = #tpu.core_type<tc>, window_params = [{transform_indices = @transform_0, window_bounds = array<i64: 128, 128>}, {transform_indices = @transform_1, window_bounds = array<i64: 128, 128>}, {pipeline_mode = #tpu.pipeline_mode<synchronous>, transform_indices = @transform_2, window_bounds = array<i64: 128, 128>}, {pipeline_mode = #tpu.pipeline_mode<synchronous>, transform_indices = @transform_3, window_bounds = array<i64: 1, 128>}, {pipeline_mode = #tpu.pipeline_mode<synchronous>, transform_indices = @transform_4, window_bounds = array<i64: 1, 128, 1024>}, {pipeline_mode = #tpu.pipeline_mode<synchronous>, transform_indices = @transform_5, window_bounds = array<i64: 1, 1, 1024>}, {pipeline_mode = #tpu.pipeline_mode<synchronous>, transform_indices = @transform_6, window_bounds = array<i64: 512, 128>}, {pipeline_mode = #tpu.pipeline_mode<synchronous>, transform_indices = @transform_7, window_bounds = array<i64: 1, 128>}, {transform_indices = @transform_8, window_bounds = array<i64: 128, 128>}]} {
    %c0_i32 = arith.constant 0 : i32
    %0 = arith.cmpi eq, %arg1, %c0_i32 : i32
    %1 = arith.extui %0 : i1 to i32
    %c0_i32_0 = arith.constant 0 : i32
    %2 = arith.cmpi ne, %1, %c0_i32_0 : i32
    scf.if %2 {
      %c0_18 = arith.constant 0 : index
      %c0_19 = arith.constant 0 : index
      %29 = vector.load %arg2[%c0_18, %c0_19] : memref<128x128xbf16, #tpu.memory_space<vmem>>, vector<128x128xbf16>
      %30 = arith.extf %29 : vector<128x128xbf16> to vector<128x128xf32>
      %c0_20 = arith.constant 0 : index
      %c0_21 = arith.constant 0 : index
      %31 = vector.load %arg3[%c0_20, %c0_21] : memref<128x128xbf16, #tpu.memory_space<vmem>>, vector<128x128xbf16>
      %c0_22 = arith.constant 0 : index
      %c0_23 = arith.constant 0 : index
      %32 = vector.load %arg4[%c0_22, %c0_23] : memref<128x128xbf16, #tpu.memory_space<vmem>>, vector<128x128xbf16>
      %cst_24 = arith.constant dense<0.000000e+00> : vector<128x128xf32>
      %33 = tpu.matmul %31, %32, %cst_24 {dimension_numbers = #tpu.dot_dimension_numbers<[1], [0], [0], [1], [0, 0, 1, 1], [], []>} : vector<128x128xbf16>, vector<128x128xbf16>, vector<128x128xf32> -> vector<128x128xf32>
      %34 = arith.addf %30, %33 : vector<128x128xf32>
      %c0_25 = arith.constant 0 : index
      %c0_26 = arith.constant 0 : index
      %35 = vector.load %arg5[%c0_25, %c0_26] : memref<1x128xf32, #tpu.memory_space<vmem>>, vector<1x128xf32>
      %36 = vector.broadcast %35 : vector<1x128xf32> to vector<128x128xf32>
      %37 = arith.addf %34, %36 : vector<128x128xf32>
      %cst_27 = arith.constant dense<0.000000e+00> : vector<128xf32>
      %38 = vector.multi_reduction <add>, %37, %cst_27 [1] : vector<128x128xf32> to vector<128xf32>
      %39 = vector.shape_cast %38 : vector<128xf32> to vector<128x1xf32>
      %cst_28 = arith.constant 1.280000e+02 : f32
      %40 = vector.broadcast %cst_28 : f32 to vector<128x1xf32>
      %41 = arith.divf %39, %40 : vector<128x1xf32>
      %42 = vector.broadcast %41 : vector<128x1xf32> to vector<128x128xf32>
      %43 = arith.subf %37, %42 : vector<128x128xf32>
      %44 = arith.mulf %43, %43 : vector<128x128xf32>
      %cst_29 = arith.constant dense<0.000000e+00> : vector<128xf32>
      %45 = vector.multi_reduction <add>, %44, %cst_29 [1] : vector<128x128xf32> to vector<128xf32>
      %46 = vector.shape_cast %45 : vector<128xf32> to vector<128x1xf32>
      %cst_30 = arith.constant 1.280000e+02 : f32
      %47 = vector.broadcast %cst_30 : f32 to vector<128x1xf32>
      %48 = arith.divf %46, %47 : vector<128x1xf32>
      %c0_31 = arith.constant 0 : index
      %c0_32 = arith.constant 0 : index
      %49 = vector.load %arg11[%c0_31, %c0_32] : memref<128x128xf32, #tpu.memory_space<vmem>>, vector<128x128xf32>
      tpu.vector_store %arg11[%c0_31, %c0_32], %37 {strides = array<i32>} : memref<128x128xf32, #tpu.memory_space<vmem>>, vector<128x128xf32>,
      %cst_33 = arith.constant 9.99999997E-7 : f32
      %50 = vector.broadcast %cst_33 : f32 to vector<128x1xf32>
      %51 = arith.addf %48, %50 : vector<128x1xf32>
      %52 = math.rsqrt %51 : vector<128x1xf32>
      %53 = vector.broadcast %52 : vector<128x1xf32> to vector<128x128xf32>
      %54 = arith.mulf %43, %53 : vector<128x128xf32>
      %55 = arith.truncf %54 : vector<128x128xf32> to vector<128x128xbf16>
      %c0_34 = arith.constant 0 : index
      %c0_35 = arith.constant 0 : index
      %56 = vector.load %arg12[%c0_34, %c0_35] : memref<128x128xbf16, #tpu.memory_space<vmem>>, vector<128x128xbf16>
      tpu.vector_store %arg12[%c0_34, %c0_35], %55 {strides = array<i32>} : memref<128x128xbf16, #tpu.memory_space<vmem>>, vector<128x128xbf16>,
      %cst_36 = arith.constant 0.000000e+00 : f32
      %57 = vector.broadcast %cst_36 : f32 to vector<128x128xf32>
      %c0_37 = arith.constant 0 : index
      %c0_38 = arith.constant 0 : index
      %58 = vector.load %arg13[%c0_37, %c0_38] : memref<128x128xf32, #tpu.memory_space<vmem>>, vector<128x128xf32>
      tpu.vector_store %arg13[%c0_37, %c0_38], %57 {strides = array<i32>} : memref<128x128xf32, #tpu.memory_space<vmem>>, vector<128x128xf32>,
    } else {
    }
    %c0 = arith.constant 0 : index
    %c0_1 = arith.constant 0 : index
    %3 = vector.load %arg12[%c0, %c0_1] : memref<128x128xbf16, #tpu.memory_space<vmem>>, vector<128x128xbf16>
    %c0_2 = arith.constant 0 : index
    %c0_3 = arith.constant 0 : index
    %c0_4 = arith.constant 0 : index
    %4 = vector.load %arg6[%c0_2, %c0_3, %c0_4] : memref<1x128x1024xbf16, #tpu.memory_space<vmem>>, vector<1x128x1024xbf16>
    %5 = vector.shape_cast %4 : vector<1x128x1024xbf16> to vector<128x1024xbf16>
    %cst = arith.constant dense<0.000000e+00> : vector<128x1024xf32>
    %6 = tpu.matmul %3, %5, %cst {dimension_numbers = #tpu.dot_dimension_numbers<[1], [0], [0], [1], [0, 0, 1, 1], [], []>} : vector<128x128xbf16>, vector<128x1024xbf16>, vector<128x1024xf32> -> vector<128x1024xf32>
    %c0_5 = arith.constant 0 : index
    %c0_6 = arith.constant 0 : index
    %c0_7 = arith.constant 0 : index
    %7 = vector.load %arg7[%c0_5, %c0_6, %c0_7] : memref<1x1x1024xf32, #tpu.memory_space<vmem>>, vector<1x1x1024xf32>
    %8 = vector.shape_cast %7 : vector<1x1x1024xf32> to vector<1x1024xf32>
    %9 = vector.broadcast %8 : vector<1x1024xf32> to vector<128x1024xf32>
    %10 = arith.addf %6, %9 : vector<128x1024xf32>
    %11 = vector.extract_strided_slice %10 {offsets = [0, 0], sizes = [128, 512], strides = [1, 1]} : vector<128x1024xf32> to vector<128x512xf32>
    %12 = vector.extract_strided_slice %10 {offsets = [0, 512], sizes = [128, 512], strides = [1, 1]} : vector<128x1024xf32> to vector<128x512xf32>
    %13 = arith.negf %11 : vector<128x512xf32>
    %14 = math.exp %13 : vector<128x512xf32>
    %cst_8 = arith.constant 1.000000e+00 : f32
    %15 = vector.broadcast %cst_8 : f32 to vector<128x512xf32>
    %16 = arith.addf %15, %14 : vector<128x512xf32>
    %17 = arith.divf %15, %16 : vector<128x512xf32>
    %18 = arith.mulf %11, %17 : vector<128x512xf32>
    %19 = arith.mulf %18, %12 : vector<128x512xf32>
    %c0_9 = arith.constant 0 : index
    %c0_10 = arith.constant 0 : index
    %20 = vector.load %arg13[%c0_9, %c0_10] : memref<128x128xf32, #tpu.memory_space<vmem>>, vector<128x128xf32>
    %21 = arith.truncf %19 : vector<128x512xf32> to vector<128x512xbf16>
    %c0_11 = arith.constant 0 : index
    %c0_12 = arith.constant 0 : index
    %22 = vector.load %arg8[%c0_11, %c0_12] : memref<512x128xbf16, #tpu.memory_space<vmem>>, vector<512x128xbf16>
    %cst_13 = arith.constant dense<0.000000e+00> : vector<128x128xf32>
    %23 = tpu.matmul %21, %22, %cst_13 {dimension_numbers = #tpu.dot_dimension_numbers<[1], [0], [0], [1], [0, 0, 1, 1], [], []>} : vector<128x512xbf16>, vector<512x128xbf16>, vector<128x128xf32> -> vector<128x128xf32>
    %24 = arith.addf %20, %23 : vector<128x128xf32>
    %c0_14 = arith.constant 0 : index
    %c0_15 = arith.constant 0 : index
    %25 = vector.load %arg13[%c0_14, %c0_15] : memref<128x128xf32, #tpu.memory_space<vmem>>, vector<128x128xf32>
    tpu.vector_store %arg13[%c0_14, %c0_15], %24 {strides = array<i32>} : memref<128x128xf32, #tpu.memory_space<vmem>>, vector<128x128xf32>,
    %c0_i32_16 = arith.constant 0 : i32
    %26 = arith.cmpi eq, %arg1, %c0_i32_16 : i32
    %27 = arith.extui %26 : i1 to i32
    %c0_i32_17 = arith.constant 0 : i32
    %28 = arith.cmpi ne, %27, %c0_i32_17 : i32
    scf.if %28 {
      %c0_18 = arith.constant 0 : index
      %c0_19 = arith.constant 0 : index
      %29 = vector.load %arg11[%c0_18, %c0_19] : memref<128x128xf32, #tpu.memory_space<vmem>>, vector<128x128xf32>
      %c0_20 = arith.constant 0 : index
      %c0_21 = arith.constant 0 : index
      %30 = vector.load %arg13[%c0_20, %c0_21] : memref<128x128xf32, #tpu.memory_space<vmem>>, vector<128x128xf32>
      %31 = arith.addf %29, %30 : vector<128x128xf32>
      %c0_22 = arith.constant 0 : index
      %c0_23 = arith.constant 0 : index
      %32 = vector.load %arg9[%c0_22, %c0_23] : memref<1x128xf32, #tpu.memory_space<vmem>>, vector<1x128xf32>
      %33 = vector.broadcast %32 : vector<1x128xf32> to vector<128x128xf32>
      %34 = arith.addf %31, %33 : vector<128x128xf32>
      %35 = arith.truncf %34 : vector<128x128xf32> to vector<128x128xbf16>
      %c0_24 = arith.constant 0 : index
      %c0_25 = arith.constant 0 : index
      %36 = vector.load %arg10[%c0_24, %c0_25] : memref<128x128xbf16, #tpu.memory_space<vmem>>, vector<128x128xbf16>
      tpu.vector_store %arg10[%c0_24, %c0_25], %35 {strides = array<i32>} : memref<128x128xbf16, #tpu.memory_space<vmem>>, vector<128x128xbf16>,
    } else {
    }
    return
  }
  func.func @transform_0(%arg0: i32, %arg1: i32) -> (i32, i32) {
    %c0_i32 = arith.constant 0 : i32
    %c0_i32_0 = arith.constant 0 : i32
    return %arg0, %c0_i32 : i32, i32
  }
  func.func @transform_1(%arg0: i32, %arg1: i32) -> (i32, i32) {
    %c0_i32 = arith.constant 0 : i32
    %c0_i32_0 = arith.constant 0 : i32
    return %arg0, %c0_i32 : i32, i32
  }
  func.func @transform_2(%arg0: i32, %arg1: i32) -> (i32, i32) {
    %c0_i32 = arith.constant 0 : i32
    %c0_i32_0 = arith.constant 0 : i32
    %c0_i32_1 = arith.constant 0 : i32
    return %c0_i32, %c0_i32_0 : i32, i32
  }
  func.func @transform_3(%arg0: i32, %arg1: i32) -> (i32, i32) {
    %c0_i32 = arith.constant 0 : i32
    %c0_i32_0 = arith.constant 0 : i32
    %c0_i32_1 = arith.constant 0 : i32
    return %c0_i32, %c0_i32_0 : i32, i32
  }
  func.func @transform_4(%arg0: i32, %arg1: i32) -> (i32, i32, i32) {
    %c0_i32 = arith.constant 0 : i32
    %c0_i32_0 = arith.constant 0 : i32
    %c0_i32_1 = arith.constant 0 : i32
    return %arg1, %c0_i32, %c0_i32_0 : i32, i32, i32
  }
  func.func @transform_5(%arg0: i32, %arg1: i32) -> (i32, i32, i32) {
    %c0_i32 = arith.constant 0 : i32
    %c0_i32_0 = arith.constant 0 : i32
    %c0_i32_1 = arith.constant 0 : i32
    return %arg1, %c0_i32, %c0_i32_0 : i32, i32, i32
  }
  func.func @transform_6(%arg0: i32, %arg1: i32) -> (i32, i32) {
    %c0_i32 = arith.constant 0 : i32
    %c0_i32_0 = arith.constant 0 : i32
    return %arg1, %c0_i32 : i32, i32
  }
  func.func @transform_7(%arg0: i32, %arg1: i32) -> (i32, i32) {
    %c0_i32 = arith.constant 0 : i32
    %c0_i32_0 = arith.constant 0 : i32
    %c0_i32_1 = arith.constant 0 : i32
    return %c0_i32, %c0_i32_0 : i32, i32
  }
  func.func @transform_8(%arg0: i32, %arg1: i32) -> (i32, i32) {
    %c0_i32 = arith.constant 0 : i32
    %c0_i32_0 = arith.constant 0 : i32
    return %arg0, %c0_i32 : i32, i32
  }
}

module attributes {stable_mosaic.version = 11 : i64} {
  func.func @_post_attention_kernel(%arg0: i32, %arg1: i32, %arg2: memref<128x128xbf16, #tpu.memory_space<vmem>>, %arg3: memref<128x128xbf16, #tpu.memory_space<vmem>>, %arg4: memref<128x128xbf16, #tpu.memory_space<vmem>>, %arg5: memref<1x128xf32, #tpu.memory_space<vmem>>, %arg6: memref<1x128x1024xbf16, #tpu.memory_space<vmem>>, %arg7: memref<1x1x1024xf32, #tpu.memory_space<vmem>>, %arg8: memref<512x128xbf16, #tpu.memory_space<vmem>>, %arg9: memref<1x128xf32, #tpu.memory_space<vmem>>, %arg10: memref<128x128xbf16, #tpu.memory_space<vmem>>, %arg11: memref<128x128xf32, #tpu.memory_space<vmem>>, %arg12: memref<128x128xbf16, #tpu.memory_space<vmem>>, %arg13: memref<128x128xf32, #tpu.memory_space<vmem>>) attributes {dimension_semantics = [#tpu.dimension_semantics<parallel>, #tpu.dimension_semantics<arbitrary>], iteration_bounds = array<i64: 4, 1>, scalar_prefetch = 0 : i64, scratch_operands = 3 : i64, tpu.core_type = #tpu.core_type<tc>, window_params = [{transform_indices = @transform_0, window_bounds = array<i64: 128, 128>}, {transform_indices = @transform_1, window_bounds = array<i64: 128, 128>}, {pipeline_mode = #tpu.pipeline_mode<synchronous>, transform_indices = @transform_2, window_bounds = array<i64: 128, 128>}, {pipeline_mode = #tpu.pipeline_mode<synchronous>, transform_indices = @transform_3, window_bounds = array<i64: 1, 128>}, {transform_indices = @transform_4, window_bounds = array<i64: 1, 128, 1024>}, {transform_indices = @transform_5, window_bounds = array<i64: 1, 1, 1024>}, {transform_indices = @transform_6, window_bounds = array<i64: 512, 128>}, {pipeline_mode = #tpu.pipeline_mode<synchronous>, transform_indices = @transform_7, window_bounds = array<i64: 1, 128>}, {transform_indices = @transform_8, window_bounds = array<i64: 128, 128>}]} {
    %c0_i32 = arith.constant 0 : i32
    %0 = arith.cmpi eq, %arg1, %c0_i32 : i32
    %1 = arith.extui %0 : i1 to i32
    %c0_i32_0 = arith.constant 0 : i32
    %2 = arith.cmpi ne, %1, %c0_i32_0 : i32
    scf.if %2 {
      %c0_18 = arith.constant 0 : index
      %c0_19 = arith.constant 0 : index
      %29 = vector.load %arg2[%c0_18, %c0_19] : memref<128x128xbf16, #tpu.memory_space<vmem>>, vector<128x128xbf16>
      %30 = arith.extf %29 : vector<128x128xbf16> to vector<128x128xf32>
      %c0_20 = arith.constant 0 : index
      %c0_21 = arith.constant 0 : index
      %31 = vector.load %arg3[%c0_20, %c0_21] : memref<128x128xbf16, #tpu.memory_space<vmem>>, vector<128x128xbf16>
      %c0_22 = arith.constant 0 : index
      %c0_23 = arith.constant 0 : index
      %32 = vector.load %arg4[%c0_22, %c0_23] : memref<128x128xbf16, #tpu.memory_space<vmem>>, vector<128x128xbf16>
      %cst_24 = arith.constant dense<0.000000e+00> : vector<128x128xf32>
      %33 = tpu.matmul %31, %32, %cst_24 {dimension_numbers = #tpu.dot_dimension_numbers<[1], [0], [0], [1], [0, 0, 1, 1], [], []>} : vector<128x128xbf16>, vector<128x128xbf16>, vector<128x128xf32> -> vector<128x128xf32>
      %34 = arith.addf %30, %33 : vector<128x128xf32>
      %c0_25 = arith.constant 0 : index
      %c0_26 = arith.constant 0 : index
      %35 = vector.load %arg5[%c0_25, %c0_26] : memref<1x128xf32, #tpu.memory_space<vmem>>, vector<1x128xf32>
      %36 = vector.broadcast %35 : vector<1x128xf32> to vector<128x128xf32>
      %37 = arith.addf %34, %36 : vector<128x128xf32>
      %cst_27 = arith.constant dense<0.000000e+00> : vector<128xf32>
      %38 = vector.multi_reduction <add>, %37, %cst_27 [1] : vector<128x128xf32> to vector<128xf32>
      %39 = vector.shape_cast %38 : vector<128xf32> to vector<128x1xf32>
      %cst_28 = arith.constant 1.280000e+02 : f32
      %40 = vector.broadcast %cst_28 : f32 to vector<128x1xf32>
      %41 = arith.divf %39, %40 : vector<128x1xf32>
      %42 = vector.broadcast %41 : vector<128x1xf32> to vector<128x128xf32>
      %43 = arith.subf %37, %42 : vector<128x128xf32>
      %44 = arith.mulf %43, %43 : vector<128x128xf32>
      %cst_29 = arith.constant dense<0.000000e+00> : vector<128xf32>
      %45 = vector.multi_reduction <add>, %44, %cst_29 [1] : vector<128x128xf32> to vector<128xf32>
      %46 = vector.shape_cast %45 : vector<128xf32> to vector<128x1xf32>
      %cst_30 = arith.constant 1.280000e+02 : f32
      %47 = vector.broadcast %cst_30 : f32 to vector<128x1xf32>
      %48 = arith.divf %46, %47 : vector<128x1xf32>
      %c0_31 = arith.constant 0 : index
      %c0_32 = arith.constant 0 : index
      %49 = vector.load %arg11[%c0_31, %c0_32] : memref<128x128xf32, #tpu.memory_space<vmem>>, vector<128x128xf32>
      tpu.vector_store %arg11[%c0_31, %c0_32], %37 {strides = array<i32>} : memref<128x128xf32, #tpu.memory_space<vmem>>, vector<128x128xf32>,
      %cst_33 = arith.constant 9.99999997E-7 : f32
      %50 = vector.broadcast %cst_33 : f32 to vector<128x1xf32>
      %51 = arith.addf %48, %50 : vector<128x1xf32>
      %52 = math.rsqrt %51 : vector<128x1xf32>
      %53 = vector.broadcast %52 : vector<128x1xf32> to vector<128x128xf32>
      %54 = arith.mulf %43, %53 : vector<128x128xf32>
      %55 = arith.truncf %54 : vector<128x128xf32> to vector<128x128xbf16>
      %c0_34 = arith.constant 0 : index
      %c0_35 = arith.constant 0 : index
      %56 = vector.load %arg12[%c0_34, %c0_35] : memref<128x128xbf16, #tpu.memory_space<vmem>>, vector<128x128xbf16>
      tpu.vector_store %arg12[%c0_34, %c0_35], %55 {strides = array<i32>} : memref<128x128xbf16, #tpu.memory_space<vmem>>, vector<128x128xbf16>,
      %cst_36 = arith.constant 0.000000e+00 : f32
      %57 = vector.broadcast %cst_36 : f32 to vector<128x128xf32>
      %c0_37 = arith.constant 0 : index
      %c0_38 = arith.constant 0 : index
      %58 = vector.load %arg13[%c0_37, %c0_38] : memref<128x128xf32, #tpu.memory_space<vmem>>, vector<128x128xf32>
      tpu.vector_store %arg13[%c0_37, %c0_38], %57 {strides = array<i32>} : memref<128x128xf32, #tpu.memory_space<vmem>>, vector<128x128xf32>,
    } else {
    }
    %c0 = arith.constant 0 : index
    %c0_1 = arith.constant 0 : index
    %3 = vector.load %arg12[%c0, %c0_1] : memref<128x128xbf16, #tpu.memory_space<vmem>>, vector<128x128xbf16>
    %c0_2 = arith.constant 0 : index
    %c0_3 = arith.constant 0 : index
    %c0_4 = arith.constant 0 : index
    %4 = vector.load %arg6[%c0_2, %c0_3, %c0_4] : memref<1x128x1024xbf16, #tpu.memory_space<vmem>>, vector<1x128x1024xbf16>
    %5 = vector.shape_cast %4 : vector<1x128x1024xbf16> to vector<128x1024xbf16>
    %cst = arith.constant dense<0.000000e+00> : vector<128x1024xf32>
    %6 = tpu.matmul %3, %5, %cst {dimension_numbers = #tpu.dot_dimension_numbers<[1], [0], [0], [1], [0, 0, 1, 1], [], []>} : vector<128x128xbf16>, vector<128x1024xbf16>, vector<128x1024xf32> -> vector<128x1024xf32>
    %c0_5 = arith.constant 0 : index
    %c0_6 = arith.constant 0 : index
    %c0_7 = arith.constant 0 : index
    %7 = vector.load %arg7[%c0_5, %c0_6, %c0_7] : memref<1x1x1024xf32, #tpu.memory_space<vmem>>, vector<1x1x1024xf32>
    %8 = vector.shape_cast %7 : vector<1x1x1024xf32> to vector<1x1024xf32>
    %9 = vector.broadcast %8 : vector<1x1024xf32> to vector<128x1024xf32>
    %10 = arith.addf %6, %9 : vector<128x1024xf32>
    %11 = vector.extract_strided_slice %10 {offsets = [0, 0], sizes = [128, 512], strides = [1, 1]} : vector<128x1024xf32> to vector<128x512xf32>
    %12 = vector.extract_strided_slice %10 {offsets = [0, 512], sizes = [128, 512], strides = [1, 1]} : vector<128x1024xf32> to vector<128x512xf32>
    %13 = arith.negf %11 : vector<128x512xf32>
    %14 = math.exp %13 : vector<128x512xf32>
    %cst_8 = arith.constant 1.000000e+00 : f32
    %15 = vector.broadcast %cst_8 : f32 to vector<128x512xf32>
    %16 = arith.addf %15, %14 : vector<128x512xf32>
    %17 = arith.divf %15, %16 : vector<128x512xf32>
    %18 = arith.mulf %11, %17 : vector<128x512xf32>
    %19 = arith.mulf %18, %12 : vector<128x512xf32>
    %c0_9 = arith.constant 0 : index
    %c0_10 = arith.constant 0 : index
    %20 = vector.load %arg13[%c0_9, %c0_10] : memref<128x128xf32, #tpu.memory_space<vmem>>, vector<128x128xf32>
    %21 = arith.truncf %19 : vector<128x512xf32> to vector<128x512xbf16>
    %c0_11 = arith.constant 0 : index
    %c0_12 = arith.constant 0 : index
    %22 = vector.load %arg8[%c0_11, %c0_12] : memref<512x128xbf16, #tpu.memory_space<vmem>>, vector<512x128xbf16>
    %cst_13 = arith.constant dense<0.000000e+00> : vector<128x128xf32>
    %23 = tpu.matmul %21, %22, %cst_13 {dimension_numbers = #tpu.dot_dimension_numbers<[1], [0], [0], [1], [0, 0, 1, 1], [], []>} : vector<128x512xbf16>, vector<512x128xbf16>, vector<128x128xf32> -> vector<128x128xf32>
    %24 = arith.addf %20, %23 : vector<128x128xf32>
    %c0_14 = arith.constant 0 : index
    %c0_15 = arith.constant 0 : index
    %25 = vector.load %arg13[%c0_14, %c0_15] : memref<128x128xf32, #tpu.memory_space<vmem>>, vector<128x128xf32>
    tpu.vector_store %arg13[%c0_14, %c0_15], %24 {strides = array<i32>} : memref<128x128xf32, #tpu.memory_space<vmem>>, vector<128x128xf32>,
    %c0_i32_16 = arith.constant 0 : i32
    %26 = arith.cmpi eq, %arg1, %c0_i32_16 : i32
    %27 = arith.extui %26 : i1 to i32
    %c0_i32_17 = arith.constant 0 : i32
    %28 = arith.cmpi ne, %27, %c0_i32_17 : i32
    scf.if %28 {
      %c0_18 = arith.constant 0 : index
      %c0_19 = arith.constant 0 : index
      %29 = vector.load %arg11[%c0_18, %c0_19] : memref<128x128xf32, #tpu.memory_space<vmem>>, vector<128x128xf32>
      %c0_20 = arith.constant 0 : index
      %c0_21 = arith.constant 0 : index
      %30 = vector.load %arg13[%c0_20, %c0_21] : memref<128x128xf32, #tpu.memory_space<vmem>>, vector<128x128xf32>
      %31 = arith.addf %29, %30 : vector<128x128xf32>
      %c0_22 = arith.constant 0 : index
      %c0_23 = arith.constant 0 : index
      %32 = vector.load %arg9[%c0_22, %c0_23] : memref<1x128xf32, #tpu.memory_space<vmem>>, vector<1x128xf32>
      %33 = vector.broadcast %32 : vector<1x128xf32> to vector<128x128xf32>
      %34 = arith.addf %31, %33 : vector<128x128xf32>
      %35 = arith.truncf %34 : vector<128x128xf32> to vector<128x128xbf16>
      %c0_24 = arith.constant 0 : index
      %c0_25 = arith.constant 0 : index
      %36 = vector.load %arg10[%c0_24, %c0_25] : memref<128x128xbf16, #tpu.memory_space<vmem>>, vector<128x128xbf16>
      tpu.vector_store %arg10[%c0_24, %c0_25], %35 {strides = array<i32>} : memref<128x128xbf16, #tpu.memory_space<vmem>>, vector<128x128xbf16>,
    } else {
    }
    return
  }
  func.func @transform_0(%arg0: i32, %arg1: i32) -> (i32, i32) {
    %c0_i32 = arith.constant 0 : i32
    %c0_i32_0 = arith.constant 0 : i32
    return %arg0, %c0_i32 : i32, i32
  }
  func.func @transform_1(%arg0: i32, %arg1: i32) -> (i32, i32) {
    %c0_i32 = arith.constant 0 : i32
    %c0_i32_0 = arith.constant 0 : i32
    return %arg0, %c0_i32 : i32, i32
  }
  func.func @transform_2(%arg0: i32, %arg1: i32) -> (i32, i32) {
    %c0_i32 = arith.constant 0 : i32
    %c0_i32_0 = arith.constant 0 : i32
    %c0_i32_1 = arith.constant 0 : i32
    return %c0_i32, %c0_i32_0 : i32, i32
  }
  func.func @transform_3(%arg0: i32, %arg1: i32) -> (i32, i32) {
    %c0_i32 = arith.constant 0 : i32
    %c0_i32_0 = arith.constant 0 : i32
    %c0_i32_1 = arith.constant 0 : i32
    return %c0_i32, %c0_i32_0 : i32, i32
  }
  func.func @transform_4(%arg0: i32, %arg1: i32) -> (i32, i32, i32) {
    %c0_i32 = arith.constant 0 : i32
    %c0_i32_0 = arith.constant 0 : i32
    %c0_i32_1 = arith.constant 0 : i32
    return %arg1, %c0_i32, %c0_i32_0 : i32, i32, i32
  }
  func.func @transform_5(%arg0: i32, %arg1: i32) -> (i32, i32, i32) {
    %c0_i32 = arith.constant 0 : i32
    %c0_i32_0 = arith.constant 0 : i32
    %c0_i32_1 = arith.constant 0 : i32
    return %arg1, %c0_i32, %c0_i32_0 : i32, i32, i32
  }
  func.func @transform_6(%arg0: i32, %arg1: i32) -> (i32, i32) {
    %c0_i32 = arith.constant 0 : i32
    %c0_i32_0 = arith.constant 0 : i32
    return %arg1, %c0_i32 : i32, i32
  }
  func.func @transform_7(%arg0: i32, %arg1: i32) -> (i32, i32) {
    %c0_i32 = arith.constant 0 : i32
    %c0_i32_0 = arith.constant 0 : i32
    %c0_i32_1 = arith.constant 0 : i32
    return %c0_i32, %c0_i32_0 : i32, i32
  }
  func.func @transform_8(%arg0: i32, %arg1: i32) -> (i32, i32) {
    %c0_i32 = arith.constant 0 : i32
    %c0_i32_0 = arith.constant 0 : i32
    return %arg0, %c0_i32 : i32, i32
  }
}

</mosaic_0001>

<bundles_post_ra>
// kernel: tpu_custom_call.1
= control target key start
LH: loop header
LB: loop body
LE: loop exit
PB: predicated region body
PF: predicated region fallthrough
CT: control target
= control target key end

     0   :  { %s6035_s0 = inlined_call_operand.hbm [shape: bf16[512,128], index: 0, kind: input, shape index: {}]   ;;  %s6036_s1 = inlined_call_operand.hbm [shape: bf16[512,128], index: 1, kind: input, shape index: {}]   ;;  %s6037_s2 = inlined_call_operand.hbm [shape: bf16[128,128], index: 2, kind: input, shape index: {}]   ;;  %s6038_s3 = inlined_call_operand.vmem [shape: f32[1,128], index: 3, kind: input, shape index: {}]   ;;  %s6039_s4 = inlined_call_operand.hbm [shape: bf16[1,128,1024], index: 4, kind: input, shape index: {}]   ;;  %s6040_s5 = inlined_call_operand.vmem [shape: f32[1,1,1024], index: 5, kind: input, shape index: {}]   ;;  %s6041_s6 = inlined_call_operand.hbm [shape: bf16[512,128], index: 6, kind: input, shape index: {}]   ;;  %s6042_s7 = inlined_call_operand.vmem [shape: f32[1,128], index: 7, kind: input, shape index: {}]   ;;  %s6043_s8 = inlined_call_operand.hbm [shape: bf16[512,128], index: 8, kind: output, shape index: {}]  }
   0x1   :  { %6111 = sst [smem:[#allocation96_spill]] %s6037_s2 }
   0x2   :  { %6112 = sst [smem:[#allocation97_spill]] %s6039_s4 }
   0x3   :  { %6113 = sst [smem:[#allocation98_spill]] %s6041_s6 }
   0x4   :  { %13 = vsyncpa [#allocation6], 0 }
   0x5   :  { %15 = vsyncpa [#allocation6 + $0x1], 0 }
   0x6   :  { %16 = vsyncpa [#allocation9], 0 }
   0x7   :  { %18 = vsyncpa [#allocation9 + $0x1], 0 }
   0x8   :  { %19 = vsyncpa [#allocation12], 0 }
   0x9   :  { %20 = vsyncpa [#allocation7], 0 }
   0xa   :  { %22 = vsyncpa [#allocation7 + $0x1], 0  ;;  %s4703_s27 = smov 0   ;;  %s4705_s28 = smov 0  }
   0xb   :  { %s4707_s29 = smov 0   ;;  %s4709_s30 = smov 0  }
   0xc   :  { %s4711_s9 = smov 0   ;;  %s4713_s10 = smov 0  }
   0xd LB: > { %6114 = sst [smem:[#allocation20_spill]] %s4639_s9  ;;  %s4734_s11 = sadd.s32 4294967295, %s4643_s10   ;;  %s4643_s10 = sphi %s4713_s10, %s28_s10   ;;  %s4639_s9 = sphi %s4711_s9, %s6281_s9   ;;  %s4635_s30 = sphi %s4709_s30, %s6280_s30   ;;  %s4631_s29 = sphi %s4707_s29, %s6284_s29   ;;  %s4627_s28 = sphi %s4705_s28, %s6283_s28   ;;  %s4623_s27 = sphi %s4703_s27, %s6282_s27  }
   0xe   : > { %s3350_s12 = sadd.s32 4294967294, %s4643_s10   ;;  %p60_p0 = scmp.ne.s32.totalorder %s4627_s28, %s4623_s27 }
   0xf   : > { %p6051_p1 = scmp.eq.s32.totalorder %s4734_s11, 0  ;;  %p251_p2 = scmp.eq.s32.totalorder %s4734_s11, 3 }
  0x10   : > { %p257_p3 = scmp.eq.s32.totalorder %s3350_s12, 3  ;;  %p3351_p5 = scmp.ge.s32.totalorder %s4643_s10, 1 }
  0x11   : > { %p4743_p4 = por %p6051_p1, %p60_p0  ;;  %p264_p7 = scmp.lt.s32.totalorder %s4643_s10, 5 }
  0x12   : > { %p4748_p6 = por %p257_p3, %p60_p0  ;;  %s4645_s16 = smov [#allocation10]  }
  0x13   : > { %p4753_p8 = pnand %p3351_p5, %p264_p7  ;;  %s276_s17 = sshll.u32 %s4645_s16, 4  ;;  %s277_s17 = int_to_ptr.vmem [resolvable:$true] %s276_s17 }
  0x14   : > { %s6116_s14 = scalar_select %p4748_p6, 1, 0 }
  0x15   : > { %p3971_p9 = pneg %p4753_p8  ;;  %s4646_s19 = smov [#allocation11]  }
  0x16   : > { %6117 = sst [smem:[#allocation21_spill]] %s6116_s14  ;;  %s295_s20 = sshll.u32 %s4646_s19, 4  ;;  %s296_s20 = int_to_ptr.vmem [resolvable:$true] %s295_s20 }
  0x17   : > { %p4761_p10 = pnand %p3971_p9, %p6051_p1  ;;  %s4428_s21 = scalar_lea.vmem %s277_s17, 1024 }
  0x18   : > { %p4429_p12 = scmp.ne.s32.totalorder %s277_s17, %s4428_s21  ;;  %p4436_p3 = scmp.lt.s32.totalorder %s277_s17, %s277_s17 }
  0x19   : > { %p4419_p11 = pneg %p4761_p10  ;;  %p4437_p5 = scmp.lt.s32.totalorder %s4428_s21, %s4428_s21 }
  0x1b   : > { %p4431_p13 = pnand %p4429_p12, %p4419_p11  ;;  %p4438_p7 = por %p4437_p5, %p4436_p3 }
  0x1d   : > { %p4432_p0 = pneg %p4431_p13 }
  0x1f   : > { %p4439_p9 = pnand %p4438_p7, %p4432_p0 }
  0x21   : > { %4442 = shalt.err (!%p4439_p9)
}
  0x22   : > { %s6044_s22 = smov 64   ;;  %s6046_s23 = smov 4  }
  0x23   : > { %s6120_s2 = sld [smem:[#allocation96_spill]]  ;;  %s4454_s26 = scalar_lea.vmem %s296_s20, 8192 }
  0x24   : > { %p4455_p12 = scmp.ne.s32.totalorder %s296_s20, %s4454_s26  ;;  %p4462_p0 = scmp.lt.s32.totalorder %s296_s20, %s296_s20 }
  0x25   : > { %p4463_p5 = scmp.lt.s32.totalorder %s4454_s26, %s4454_s26 }
  0x26   : > { %p4457_p13 = pnand %p4455_p12, %p4419_p11 }
  0x27   : > { %p4464_p7 = por %p4463_p5, %p4462_p0 }
  0x28   : > { %p4458_p3 = pneg %p4457_p13 }
  0x29   : > { %3974 = dma.hbm_to_vmem [thread:$0]  (!%p4761_p10), %s6120_s2, 1024, %s277_s17, [#allocation9], %s6044_s22, %s6044_s22, %s6046_s23  }
  0x2a   : > { %p4465_p9 = pnand %p4464_p7, %p4458_p3 }
  0x2c   : > { %4468 = shalt.err (!%p4465_p9)
}
  0x2d   : > { %s4649_s12 = smov 512   ;;  %s4650_s16 = smov 32  }
  0x2e   : > { %s6121_s4 = sld [smem:[#allocation97_spill]]  ;;  %s4651_s17 = smov [#allocation13]  }
  0x2f   : > { %s318_s24 = sshll.u32 %s4651_s17, 4  ;;  %s319_s24 = int_to_ptr.vmem [resolvable:$true] %s318_s24 }
  0x30   : > { %s4480_s25 = scalar_lea.vmem %s319_s24, 4096  ;;  %p4488_p3 = scmp.lt.s32.totalorder %s319_s24, %s319_s24 }
  0x31   : > { %p4481_p12 = scmp.ne.s32.totalorder %s319_s24, %s4480_s25  ;;  %p4489_p5 = scmp.lt.s32.totalorder %s4480_s25, %s4480_s25 }
  0x33   : > { %p4483_p13 = pnand %p4481_p12, %p4419_p11  ;;  %p4490_p7 = por %p4489_p5, %p4488_p3 }
  0x34   : > { %3977 = dma.hbm_to_vmem [thread:$0]  (!%p4761_p10), %s6121_s4, 8192, %s296_s20, [#allocation12], %s4649_s12, %s4649_s12, %s4650_s16  }
  0x35   : > { %p4484_p0 = pneg %p4483_p13 }
  0x37   : > { %p4491_p9 = pnand %p4490_p7, %p4484_p0 }
  0x39   : > { %4494 = shalt.err (!%p4491_p9)
}
  0x3a   : > { %s6122_s6 = sld [smem:[#allocation98_spill]]  ;;  %s40_s12 = sadd.s32 1, %s4639_s9 }
  0x3b   : > { %p42_p11 = scmp.ge.s32.totalorder %s40_s12, 4  ;;  %s47_s18 = sadd.s32 1, %s4631_s29 }
  0x3c   : > { %p54_p12 = scmp.ne.s32.totalorder %s4631_s29, %s4627_s28  ;;  %p55_p13 = scmp.eq.s32.totalorder %s4643_s10, 0 }
  0x3d   : > { %s6286_s12 = smov (%p42_p11, %s40_s12), 0  ;;  %s335_s17 = sand.u32 1, %s4631_s29  }
  0x3e   : > { %6123 = sst [smem:[#allocation22_spill]] %s6286_s12  ;;  %p4804_p0 = por %p55_p13, %p54_p12 }
  0x3f   : > { %p4810_p3 = por %p251_p2, %p54_p12  ;;  %s44_s21 = ssub.s32 %s4639_s9, %s6286_s12 }
  0x40   : > { %3980 = dma.hbm_to_vmem [thread:$0]  (!%p4761_p10), %s6122_s6, 4096, %s319_s24, [#allocation12], %s6044_s22, %s6044_s22, %s6046_s23  }
  0x41   : > { %p3995_p10 = scmp.lt.s32.totalorder %s4643_s10, 4  ;;  %p45_p5 = scmp.eq.s32.totalorder %s44_s21, 0 }
  0x42   : > { %s3357_s24 = sshll.u32 %s335_s17, 6  ;;  %s3593_s20 = sshll.u32 %s4639_s9, 10 }
  0x43   : > { %s4819_s25 = scalar_select %p45_p5, %s4631_s29, %s47_s18  }
  0x44   : > { %s345_s23 = scalar_lea.hbm %s6035_s0, %s3593_s20  ;;  %s339_s2 = scalar_lea.vmem [#allocation5], %s3357_s24 }
  0x45   : > { %6126 = sst [smem:[#allocation23_spill]] %s4819_s25  ;;  %s346_s4 = sshll.u32 %s339_s2, 4  ;;  %s347_s4 = int_to_ptr.vmem [resolvable:$true] %s346_s4 }
  0x46   : > { %p4827_p2 = pnand %p3995_p10, %p4804_p0  ;;  %s4834_s18 = scalar_lea.hbm %s6036_s1, %s3593_s20 }
  0x47   : > { %s360_s21 = scalar_lea.vmem [#allocation8], %s3357_s24  ;;  %s336_s25 = scalar_lea.sflag [#allocation6], %s335_s17 }
  0x48   : > { %s367_s9 = sshll.u32 %s360_s21, 4  ;;  %p4497_p7 = pneg %p4827_p2  ;;  %s368_s9 = int_to_ptr.vmem [resolvable:$true] %s367_s9 }
  0x49   : > { %s4508_s22 = scalar_lea.vmem %s347_s4, 1024  ;;  %s4652_s2 = smov [#allocation5]  }
  0x4a   : > { %p4509_p9 = scmp.ne.s32.totalorder %s347_s4, %s4508_s22  ;;  %s4513_s16 = sshll.u32 %s4652_s2, 4  ;;  %s4514_s16 = int_to_ptr.vmem [resolvable:$false] %s4513_s16 }
  0x4b   : > { %s4515_s26 = scalar_lea.vmem %s4514_s16, 2048  ;;  %p4516_p13 = scmp.lt.s32.totalorder %s347_s4, %s4514_s16 }
  0x4c   : > { %p4511_p11 = pnand %p4509_p9, %p4497_p7  ;;  %p4517_p0 = scmp.lt.s32.totalorder %s4515_s26, %s4508_s22 }
  0x4e   : > { %p4512_p12 = pneg %p4511_p11  ;;  %p4518_p10 = por %p4517_p0, %p4516_p13 }
  0x50   : > { %p4519_p5 = pnand %p4518_p10, %p4512_p12 }
  0x52   : > { %4522 = shalt.err (!%p4519_p5)
}
  0x53   : > { %s6128_s14 = smov 4   ;;  %s6129_s12 = smov 64  }
  0x54   : > { %3984 = dma.hbm_to_vmem [thread:$0]  (!%p4827_p2), %s345_s23, 1024, %s347_s4, %s336_s25, %s6129_s12, %s6129_s12, %s6128_s14  }
  0x55   : > { %s356_s17 = sand.u32 1, %s4643_s10   ;;  %s4536_s20 = scalar_lea.vmem %s368_s9, 1024 }
  0x56   : > { %s357_s24 = scalar_lea.sflag [#allocation9], %s356_s17  ;;  %p4537_p9 = scmp.ne.s32.totalorder %s368_s9, %s4536_s20 }
  0x57   : > { %s4653_s21 = smov [#allocation8]  }
  0x58   : > { %p4539_p11 = pnand %p4537_p9, %p4497_p7  ;;  %s4541_s22 = sshll.u32 %s4653_s21, 4  ;;  %s4542_s22 = int_to_ptr.vmem [resolvable:$false] %s4541_s22 }
  0x59   : > { %s4543_s2 = scalar_lea.vmem %s4542_s22, 2048  ;;  %p4544_p12 = scmp.lt.s32.totalorder %s368_s9, %s4542_s22 }
  0x5a   : > { %p4540_p1 = pneg %p4539_p11  ;;  %p4545_p13 = scmp.lt.s32.totalorder %s4543_s2, %s4536_s20 }
  0x5c   : > { %p4546_p0 = por %p4545_p13, %p4544_p12 }
  0x5e   : > { %p4547_p10 = pnand %p4546_p0, %p4540_p1 }
  0x60   : > { %4550 = shalt.err (!%p4547_p10)
}
  0x61   : > { %3987 = dma.hbm_to_vmem [thread:$0]  (!%p4827_p2), %s4834_s18, 1024, %s368_s9, %s357_s24, %s6129_s12, %s6129_s12, %s6128_s14  }
  0x62   : > { %379 = sbr.rel (%p4753_p8) target bundleno = 1247 (0x4df), region = 52 }
  0x67   : > { %s4859_s4 = sand.u32 1, %s4627_s28  }
  0x68   : > { %s4862_s23 = sshll.u32 %s4859_s4, 6  ;;  %s382_s25 = scalar_lea.sflag [#allocation6], %s4859_s4 }
  0x69   : > { %s4866_s16 = scalar_lea.vmem [#allocation5], %s4862_s23 }
  0x6a   : > { %4602 = dma.done.wait (%p4743_p4), %s382_s25, 1024  }
  0x6b   : > { %4604 = vsyncadd (%p4743_p4), %s382_s25, 4294966272  ;;  %s390_s6 = sand.u32 1, %s4734_s11   ;;  %s4874_s15 = scalar_lea.vmem [#allocation8], %s4862_s23 }
  0x6c   : > { %s391_s9 = scalar_lea.sflag [#allocation9], %s390_s6 }
  0x6d   : > { %4606 = dma.done.wait (%p4743_p4), %s391_s9, 1024  }
  0x6e   : > { %4608 = vsyncadd (%p4743_p4), %s391_s9, 4294966272  ;;  %p6130_p1 = scmp.eq.s32.totalorder %s4734_s11, 0 }
  0x70   : > { %4610 = dma.done.wait (%p6130_p1), [#allocation9], 1024   ;;  %p6131_p8 = pmov %p6130_p1 }
  0x71   : > { %p6132_p2 = pmov %p6130_p1 }
  0x72   : > { %4612 = vsyncadd (%p6131_p8), [#allocation9], 4294966272 }
  0x73   : > { %4614 = dma.done.wait (%p6132_p2), [#allocation12], 12288   ;;  %p6133_p7 = pmov %p6130_p1 }
  0x74   : > { %v4058_v0 = vld [vmem:[#allocation10 + $0x38] sm:$0xff]   ;;  %v4059_v1 = vld [vmem:[#allocation10 + $0x30] sm:$0xff]   ;;  %v4060_v2 = vld [vmem:[#allocation10 + $0x28] sm:$0xff]   ;;  %s5943_s17 = scalar_lea.vmem [#allocation14], %s4862_s23  ;;  %s3627_s24 = sshll.u32 %s4635_s30, 10 }
  0x75   : > { %4616 = vsyncadd (%p6133_p7), [#allocation12], 4294955008  ;;  %3905 = vmatprep.subr.bf16.mxu0 %v4058_v0  ;;  %v4061_v3 = vld [vmem:[#allocation10 + $0x20] sm:$0xff]   ;;  %v4062_v5 = vld [vmem:[#allocation10 + $0x18] sm:$0xff]   ;;  %s3198_s20 = sshll.u32 %s5943_s17, 4  ;;  %s5985_s2 = scalar_lea.hbm %s6043_s8, %s3627_s24  ;;  %s5987_s20 = int_to_ptr.vmem [resolvable:$true] %s3198_s20 }
  0x76   : > { %3906 = vmatpush3.bf16.msra.mxu0 %v4058_v0  ;;  %v4066_v4 = vld [vmem:[%s4874_s15] sm:$0xff]   ;;  %v4063_v6 = vld [vmem:[#allocation10 + $0x10] sm:$0xff]   ;;  %v4064_v7 = vld [vmem:[#allocation10 + $0x8] sm:$0xff]   ;;  %s3185_s23 = scalar_lea.sflag [#allocation7], %s4859_s4  ;;  %s4551_s25 = scalar_lea.vmem %s5987_s20, 1024 }
  0x77   : > { %3907 = vmatprep.subr.bf16.mxu0 %v4059_v1  ;;  %3921 = vmatprep.mubr.bf16.mxu0 %v4066_v4  ;;  %v4065_v8 = vld [vmem:[#allocation10] sm:$0xff]   ;;  %v4067_v9 = vld [vmem:[%s4874_s15 + $0x8] sm:$0xff]   ;;  %v4068_v10 = vld [vmem:[%s4874_s15 + $0x10] sm:$0xff]   ;;  %p4552_p4 = scmp.ne.s32.totalorder %s5987_s20, %s4551_s25  ;;  %s4655_s30 = smov [#allocation14]  }
  0x78   : > { %v4069_v11 = vld [vmem:[%s4874_s15 + $0x18] sm:$0xff]   ;;  %v4070_v12 = vld [vmem:[%s4874_s15 + $0x20] sm:$0xff]   ;;  %v4071_v13 = vld [vmem:[%s4874_s15 + $0x28] sm:$0xff]  }
  0x79   : > { %v4072_v14 = vld [vmem:[%s4874_s15 + $0x30] sm:$0xff]   ;;  %v4073_v15 = vld [vmem:[%s4874_s15 + $0x38] sm:$0xff]   ;;  %v3740_v16 = vld [vmem:[%s4866_s16 + $0x8] sm:$0xff]   ;;  %p4553_p5 = pnand %p4552_p4, %p4810_p3 }
  0x7a   : > { %3908 = vmatpush3.bf16.msra.mxu0 %v4059_v1  ;;  %v3629_v17 = vld [vmem:[%s4866_s16] sm:$0xff]   ;;  %v3634_v18 = vunpack.c.l.bf16 %v3740_v16  ;;  %v3635_v23 = vunpack.c.h.bf16 %v3740_v16  ;;  %v3742_v29 = vld [vmem:[%s4866_s16 + $0x18] sm:$0xff]   ;;  %v3741_v30 = vld [vmem:[%s4866_s16 + $0x10] sm:$0xff]  }
  0x7b   : > { %3909 = vmatprep.subr.bf16.mxu0 %v4060_v2  ;;  %v3630_v19 = vunpack.c.l.bf16 %v3629_v17  ;;  %v4901_v21 = vld [vmem:[%s6038_s3] ss:$0 sm:$0xff]  ;;  %v3631_v27 = vunpack.c.h.bf16 %v3629_v17  ;;  %v3642_v36 = vunpack.c.l.bf16 %v3742_v29  ;;  %v3638_v37 = vunpack.c.l.bf16 %v3741_v30  ;;  %v3744_v45 = vld [vmem:[%s4866_s16 + $0x28] sm:$0xff]   ;;  %v3745_v62 = vld [vmem:[%s4866_s16 + $0x30] sm:$0xff]   ;;  %p4554_p9 = pneg %p4553_p5 }
  0x7c   : > { %v3639_v43 = vunpack.c.h.bf16 %v3741_v30  ;;  %v3743_v46 = vld [vmem:[%s4866_s16 + $0x20] sm:$0xff]   ;;  %v3643_v48 = vunpack.c.h.bf16 %v3742_v29  ;;  %v3650_v52 = vunpack.c.l.bf16 %v3744_v45  ;;  %v3651_v60 = vunpack.c.h.bf16 %v3744_v45  ;;  %v3746_v0 = vld [vmem:[%s4866_s16 + $0x38] sm:$0xff]   ;;  %s4555_s16 = sshll.u32 %s4655_s30, 4  ;;  %s4556_s16 = int_to_ptr.vmem [resolvable:$false] %s4555_s16 }
  0x7d   : > { %v3646_v53 = vunpack.c.l.bf16 %v3743_v46  ;;  %v3647_v61 = vunpack.c.h.bf16 %v3743_v46  ;;  %v3654_v4 = vunpack.c.l.bf16 %v3745_v62  ;;  %v3655_v16 = vunpack.c.h.bf16 %v3745_v62  ;;  %s4557_s6 = scalar_lea.vmem %s4556_s16, 2048  ;;  %p4558_p11 = scmp.lt.s32.totalorder %s5987_s20, %s4556_s16 }
  0x7e   : > { %3910 = vmatpush3.bf16.msra.mxu0 %v4060_v2  ;;  %p4559_p12 = scmp.lt.s32.totalorder %s4557_s6, %s4551_s25 }
  0x7f   : > { %3911 = vmatprep.subr.bf16.mxu0 %v4061_v3 }
  0x80   : > { %p4560_p13 = por %p4559_p12, %p4558_p11 }
  0x82   : > { %3912 = vmatpush3.bf16.msra.mxu0 %v4061_v3  ;;  %p4561_p0 = pnand %p4560_p13, %p4554_p9 }
  0x83   : > { %3913 = vmatprep.subr.bf16.mxu0 %v4062_v5 }
  0x86   : > { %3914 = vmatpush3.bf16.msra.mxu0 %v4062_v5 }
  0x87   : > { %3915 = vmatprep.subr.bf16.mxu0 %v4063_v6 }
  0x8a   : > { %3916 = vmatpush3.bf16.msra.mxu0 %v4063_v6 }
  0x8b   : > { %3917 = vmatprep.subr.bf16.mxu0 %v4064_v7 }
  0x8e   : > { %3918 = vmatpush3.bf16.msra.mxu0 %v4064_v7 }
  0x8f   : > { %3919 = vmatprep.subr.bf16.mxu0 %v4065_v8 }
  0x92   : > { %3920 = vmatpush3.bf16.msra.mxu0 %v4065_v8  ;;  %v3658_v8 = vunpack.c.l.bf16 %v3746_v0 }
  0x95   : > { %3922 = vmatmul.mubr.bf16.vlgmr.msra.gmra.mxu0 %v4067_v9 }
  0x96   : > { %3925 = vmatprep.mubr.bf16.mxu0 %v4068_v10 }
  0x9d   : > { %3926 = vmatmul.mubr.bf16.gmra.mxu0 %v4069_v11 }
  0x9e   : > { %3929 = vmatprep.mubr.bf16.mxu0 %v4070_v12  ;;  %v3659_v12 = vunpack.c.h.bf16 %v3746_v0  ;;  %v1118_v0 = vld [vmem:[#allocation11 + $0x1c0] sm:$0xff] }
  0xa5   : > { %3930 = vmatmul.mubr.bf16.gmra.mxu0 %v4071_v13 }
  0xa6   : > { %3933 = vmatprep.mubr.bf16.mxu0 %v4072_v14 }
  0xad   : > { %3934 = vmatmul.mubr.bf16.gmra.mxu0 %v4073_v15 }
 0x155   : > { %v3923_v20 = vpop.f32.mrf.mxu0 }
 0x156   : > { %v720_v22 = vadd.f32 %v3923_v20, %v3634_v18 }
 0x157   : > { %v655_v24 = vpop.f32.mrf.mxu0 }
 0x158   : > { %v4904_v25 = vadd.f32 %v4901_v21, %v720_v22  ;;  %v718_v26 = vadd.f32 %v3630_v19, %v655_v24 }
 0x159   : > { %v3924_v28 = vpop.f32.mrf.mxu0 }
 0x15a   : > { %6134 = vst [vmem:[#allocation24_spill] sm:$0xff] %v4904_v25  ;;  %v4909_v31 = vadd.f32 %v4901_v21, %v718_v26  ;;  %v721_v32 = vadd.f32 %v3924_v28, %v3635_v23  ;;  %761 = vadd.xlane.f32.xlu1 %v4904_v25 }
 0x15b   : > { %v658_v33 = vpop.f32.mrf.mxu0 }
 0x15c   : > { %6135 = vst [vmem:[#allocation25_spill] sm:$0xff] %v4909_v31  ;;  %v4913_v34 = vadd.f32 %v4901_v21, %v721_v32  ;;  %v719_v35 = vadd.f32 %v3631_v27, %v658_v33  ;;  %757 = vadd.xlane.f32.xlu0 %v4909_v31 }
 0x15d   : > { %v3927_v38 = vpop.f32.mrf.mxu0 }
 0x15e   : > { %6136 = vst [vmem:[#allocation26_spill] sm:$0xff] %v4913_v34  ;;  %v4917_v39 = vadd.f32 %v4901_v21, %v719_v35  ;;  %763 = vadd.xlane.f32.xlu1 %v4913_v34  ;;  %v724_v41 = vadd.f32 %v3927_v38, %v3642_v36 }
 0x15f   : > { %v671_v40 = vpop.f32.mrf.mxu0 }
 0x160   : > { %6137 = vst [vmem:[#allocation27_spill] sm:$0xff] %v4917_v39  ;;  %v722_v42 = vadd.f32 %v3638_v37, %v671_v40  ;;  %759 = vadd.xlane.f32.xlu0 %v4917_v39  ;;  %v4927_v50 = vadd.f32 %v4901_v21, %v724_v41 }
 0x161   : > { %v3928_v44 = vpop.f32.mrf.mxu0 }
 0x162   : > { %v4924_v47 = vadd.f32 %v4901_v21, %v722_v42  ;;  %6139 = vst [vmem:[#allocation29_spill] sm:$0xff] %v4927_v50  ;;  %v725_v55 = vadd.f32 %v3928_v44, %v3643_v48 }
 0x163   : > { %v674_v49 = vpop.f32.mrf.mxu0 }
 0x164   : > { %6138 = vst [vmem:[#allocation28_spill] sm:$0xff] %v4924_v47  ;;  %v723_v51 = vadd.f32 %v3639_v43, %v674_v49  ;;  %765 = vadd.xlane.f32.xlu0 %v4924_v47  ;;  %v4938_v1 = vadd.f32 %v4901_v21, %v725_v55 }
 0x165   : > { %v3931_v54 = vpop.f32.mrf.mxu0 }
 0x166   : > { %v4931_v56 = vadd.f32 %v4901_v21, %v723_v51  ;;  %v728_v58 = vadd.f32 %v3931_v54, %v3650_v52  ;;  %6141 = vst [vmem:[#allocation31_spill] sm:$0xff] %v4938_v1 }
 0x167   : > { %v687_v57 = vpop.f32.mrf.mxu0 }
 0x168   : > { %6140 = vst [vmem:[#allocation30_spill] sm:$0xff] %v4931_v56  ;;  %v726_v59 = vadd.f32 %v3646_v53, %v687_v57  ;;  %767 = vadd.xlane.f32.xlu1 %v4931_v56  ;;  %769 = vadd.xlane.f32.xlu0 %v4927_v50  ;;  %v4944_v5 = vadd.f32 %v4901_v21, %v728_v58 }
 0x169   : > { %v3932_v63 = vpop.f32.mrf.mxu0 }
 0x16a   : > { %v4941_v2 = vadd.f32 %v4901_v21, %v726_v59  ;;  %6143 = vst [vmem:[#allocation33_spill] sm:$0xff] %v4944_v5  ;;  %v729_v6 = vadd.f32 %v3932_v63, %v3651_v60 }
 0x16b   : > { %v690_v3 = vpop.f32.mrf.mxu0 }
 0x16c   : > { %6142 = vst [vmem:[#allocation32_spill] sm:$0xff] %v4941_v2  ;;  %v727_v7 = vadd.f32 %v3647_v61, %v690_v3  ;;  %771 = vadd.xlane.f32.xlu1 %v4938_v1  ;;  %773 = vadd.xlane.f32.xlu0 %v4941_v2  ;;  %v4952_v13 = vadd.f32 %v4901_v21, %v729_v6  ;;  %v1122_v3 = vld [vmem:[#allocation11 + $0x1e0] sm:$0xff]  ;;  %v1119_v6 = vld [vmem:[#allocation11 + $0x1c8] sm:$0xff] }
 0x16d   : > { %v3935_v9 = vpop.f32.mrf.mxu0 }
 0x16e   : > { %v4949_v10 = vadd.f32 %v4901_v21, %v727_v7  ;;  %6145 = vst [vmem:[#allocation35_spill] sm:$0xff] %v4952_v13  ;;  %v732_v14 = vadd.f32 %v3935_v9, %v3658_v8  ;;  %v1123_v7 = vld [vmem:[#allocation11 + $0x1e8] sm:$0xff] }
 0x16f   : > { %v703_v11 = vpop.f32.mrf.mxu0 }
 0x170   : > { %6144 = vst [vmem:[#allocation34_spill] sm:$0xff] %v4949_v10  ;;  %v730_v15 = vadd.f32 %v3654_v4, %v703_v11  ;;  %775 = vadd.xlane.f32.xlu1 %v4949_v10  ;;  %777 = vadd.xlane.f32.xlu0 %v4944_v5  ;;  %v4960_v20 = vadd.f32 %v4901_v21, %v732_v14 }
 0x171   : > { %v3936_v17 = vpop.f32.mrf.mxu0  ;;  %v3468_v4 = vcombine.high %v1118_v0, %v1122_v3  ;;  %v3470_v11 = vcombine.high %v1119_v6, %v1123_v7 }
 0x172   : > { %v4957_v18 = vadd.f32 %v4901_v21, %v730_v15  ;;  %6147 = vst [vmem:[#allocation37_spill] sm:$0xff] %v4960_v20  ;;  %v733_v22 = vadd.f32 %v3936_v17, %v3659_v12  ;;  %v3467_v15 = vcombine.low %v1118_v0, %v1122_v3 }
 0x173   : > { %v706_v19 = vpop.f32.mrf.mxu0  ;;  %1536 = vmatprep.subr.bf16.mxu1 %v3468_v4  ;;  %1649 = vmatprep.subr.bf16.mxu0 %v3470_v11 }
 0x174   : > { %6146 = vst [vmem:[#allocation36_spill] sm:$0xff] %v4957_v18  ;;  %v731_v23 = vadd.f32 %v3655_v16, %v706_v19  ;;  %779 = vadd.xlane.f32.xlu1 %v4952_v13  ;;  %781 = vadd.xlane.f32.xlu0 %v4957_v18  ;;  %v4968_v26 = vadd.f32 %v4901_v21, %v733_v22 }
 0x175   : > { %v3469_v16 = vcombine.low %v1119_v6, %v1123_v7  ;;  %1537 = vmatpush1.bf16.msra.mxu1 %v3467_v15  ;;  %v1098_v15 = vld [vmem:[#allocation11 + $0x120] sm:$0xff] }
 0x176   : > { %v4965_v24 = vadd.f32 %v4901_v21, %v731_v23  ;;  %6149 = vst [vmem:[#allocation39_spill] sm:$0xff] %v4968_v26 }
 0x177   : > { %1650 = vmatpush1.bf16.msra.mxu0 %v3469_v16  ;;  %v1095_v16 = vld [vmem:[#allocation11 + $0x108] sm:$0xff] }
 0x178   : > { %6148 = vst [vmem:[#allocation38_spill] sm:$0xff] %v4965_v24  ;;  %783 = vadd.xlane.f32.xlu1 %v4965_v24  ;;  %785 = vadd.xlane.f32.xlu0 %v4960_v20 }
 0x17c   : > { %787 = vadd.xlane.f32.xlu1 %v4968_v26 }
 0x1e3   : > { %v762_v27 = vpop.xlane.xlu1 %761 }
 0x1e4   : > { %v792_v29 = vmul.f32 0.0078125, %v762_v27  ;;  %v1110_v27 = vld [vmem:[#allocation11 + $0x180] sm:$0xff] }
 0x1e5   : > { %v758_v28 = vpop.xlane.xlu0 %757 }
 0x1e6   : > { %v790_v30 = vmul.f32 0.0078125, %v758_v28  ;;  %v4977_v36 = vsub.f32 %v4904_v25, %v792_v29  ;;  %v1114_v28 = vld [vmem:[#allocation11 + $0x1a0] sm:$0xff]  ;;  %v1111_v29 = vld [vmem:[#allocation11 + $0x188] sm:$0xff] }
 0x1e7   : > { %v764_v32 = vpop.xlane.xlu1 %763 }
 0x1e8   : > { %v4974_v33 = vsub.f32 %v4909_v31, %v790_v30  ;;  %v793_v21 = vmul.f32 0.0078125, %v764_v32  ;;  %v824_v44 = vmul.f32 %v4977_v36, %v4977_v36 }
 0x1e9   : > { %v760_v35 = vpop.xlane.xlu0 %759 }
 0x1ea   : > { %v791_v37 = vmul.f32 0.0078125, %v760_v35  ;;  %v822_v38 = vmul.f32 %v4974_v33, %v4974_v33  ;;  %v4985_v42 = vsub.f32 %v4913_v34, %v793_v21  ;;  %v3460_v35 = vcombine.high %v1110_v27, %v1114_v28  ;;  %v1115_v21 = vld [vmem:[#allocation11 + $0x1a8] sm:$0xff] }
 0x1ec   : > { %v4982_v40 = vsub.f32 %v4917_v39, %v791_v37  ;;  %838 = vadd.xlane.f32.xlu0 %v822_v38  ;;  %v825_v53 = vmul.f32 %v4985_v42, %v4985_v42  ;;  %1538 = vmatprep.subr.bf16.mxu1 %v3460_v35 }
 0x1ed   : > { %v766_v41 = vpop.xlane.xlu0 %765 }
 0x1ee   : > { %v794_v43 = vmul.f32 0.0078125, %v766_v41  ;;  %v823_v45 = vmul.f32 %v4982_v40, %v4982_v40  ;;  %v3459_v41 = vcombine.low %v1110_v27, %v1114_v28 }
 0x1f0   : > { %v4992_v46 = vsub.f32 %v4924_v47, %v794_v43  ;;  %842 = vadd.xlane.f32.xlu0 %v824_v44  ;;  %840 = vadd.xlane.f32.xlu1 %v823_v45  ;;  %v3461_v43 = vcombine.low %v1111_v29, %v1115_v21  ;;  %v3462_v44 = vcombine.high %v1111_v29, %v1115_v21 }
 0x1f1   : > { %v768_v48 = vpop.xlane.xlu1 %767  ;;  %v770_v49 = vpop.xlane.xlu0 %769  ;;  %1539 = vmatpush1.bf16.msra.mxu1 %v3459_v41  ;;  %v1086_v41 = vld [vmem:[#allocation11 + $0xc0] sm:$0xff] }
 0x1f2   : > { %v795_v51 = vmul.f32 0.0078125, %v768_v48  ;;  %v796_v52 = vmul.f32 0.0078125, %v770_v49  ;;  %v826_v54 = vmul.f32 %v4992_v46, %v4992_v46  ;;  %1651 = vmatprep.subr.bf16.mxu0 %v3462_v44  ;;  %v1087_v44 = vld [vmem:[#allocation11 + $0xc8] sm:$0xff] }
 0x1f3   : > { %1652 = vmatpush1.bf16.msra.mxu0 %v3461_v43  ;;  %v1090_v43 = vld [vmem:[#allocation11 + $0xe0] sm:$0xff] }
 0x1f4   : > { %v4999_v55 = vsub.f32 %v4931_v56, %v795_v51  ;;  %v5002_v57 = vsub.f32 %v4927_v50, %v796_v52  ;;  %844 = vadd.xlane.f32.xlu1 %v825_v53  ;;  %846 = vadd.xlane.f32.xlu0 %v826_v54  ;;  %v1102_v52 = vld [vmem:[#allocation11 + $0x140] sm:$0xff]  ;;  %v1103_v54 = vld [vmem:[#allocation11 + $0x148] sm:$0xff] }
 0x1f5   : > { %v772_v58 = vpop.xlane.xlu1 %771  ;;  %v774_v59 = vpop.xlane.xlu0 %773  ;;  %v1106_v53 = vld [vmem:[#allocation11 + $0x160] sm:$0xff] }
 0x1f6   : > { %v797_v60 = vmul.f32 0.0078125, %v772_v58  ;;  %v798_v61 = vmul.f32 0.0078125, %v774_v59  ;;  %v827_v62 = vmul.f32 %v4999_v55, %v4999_v55  ;;  %v828_v63 = vmul.f32 %v5002_v57, %v5002_v57 }
 0x1f7   : > { %v3451_v0 = vcombine.low %v1102_v52, %v1106_v53 }
 0x1f8   : > { %v5009_v8 = vsub.f32 %v4938_v1, %v797_v60  ;;  %v5012_v9 = vsub.f32 %v4941_v2, %v798_v61  ;;  %848 = vadd.xlane.f32.xlu1 %v827_v62  ;;  %850 = vadd.xlane.f32.xlu0 %v828_v63  ;;  %v3452_v60 = vcombine.high %v1102_v52, %v1106_v53  ;;  %v1107_v61 = vld [vmem:[#allocation11 + $0x168] sm:$0xff] }
 0x1f9   : > { %v776_v12 = vpop.xlane.xlu1 %775  ;;  %v778_v14 = vpop.xlane.xlu0 %777  ;;  %v3453_v3 = vcombine.low %v1103_v54, %v1107_v61  ;;  %v3454_v4 = vcombine.high %v1103_v54, %v1107_v61  ;;  %v1082_v61 = vld [vmem:[#allocation11 + $0xa0] sm:$0xff] }
 0x1fa   : > { %v799_v17 = vmul.f32 0.0078125, %v776_v12  ;;  %v800_v19 = vmul.f32 0.0078125, %v778_v14  ;;  %v829_v22 = vmul.f32 %v5009_v8, %v5009_v8  ;;  %v830_v23 = vmul.f32 %v5012_v9, %v5012_v9  ;;  %1540 = vmatprep.subr.bf16.mxu1 %v3452_v60  ;;  %v1094_v14 = vld [vmem:[#allocation11 + $0x100] sm:$0xff] }
 0x1fb   : > { %1541 = vmatpush1.bf16.msra.mxu1 %v3451_v0  ;;  %1653 = vmatprep.subr.bf16.mxu0 %v3454_v4  ;;  %v3443_v28 = vcombine.low %v1094_v14, %v1098_v15  ;;  %v1078_v60 = vld [vmem:[#allocation11 + $0x80] sm:$0xff]  ;;  %v1083_v0 = vld [vmem:[#allocation11 + $0xa8] sm:$0xff] }
 0x1fc   : > { %v5019_v30 = vsub.f32 %v4949_v10, %v799_v17  ;;  %v5022_v32 = vsub.f32 %v4944_v5, %v800_v19  ;;  %852 = vadd.xlane.f32.xlu1 %v829_v22  ;;  %854 = vadd.xlane.f32.xlu0 %v830_v23  ;;  %v3444_v22 = vcombine.high %v1094_v14, %v1098_v15  ;;  %v1099_v23 = vld [vmem:[#allocation11 + $0x128] sm:$0xff] }
 0x1fd   : > { %v780_v37 = vpop.xlane.xlu1 %779  ;;  %v782_v38 = vpop.xlane.xlu0 %781  ;;  %1654 = vmatpush1.bf16.msra.mxu0 %v3453_v3  ;;  %v3445_v29 = vcombine.low %v1095_v16, %v1099_v23  ;;  %v3446_v35 = vcombine.high %v1095_v16, %v1099_v23  ;;  %v3427_v3 = vcombine.low %v1078_v60, %v1082_v61  ;;  %v1075_v15 = vld [vmem:[#allocation11 + $0x68] sm:$0xff] }
 0x1fe   : > { %v801_v45 = vmul.f32 0.0078125, %v780_v37  ;;  %v802_v48 = vmul.f32 0.0078125, %v782_v38  ;;  %v831_v49 = vmul.f32 %v5019_v30, %v5019_v30  ;;  %v832_v51 = vmul.f32 %v5022_v32, %v5022_v32  ;;  %1542 = vmatprep.subr.bf16.mxu1 %v3444_v22 }
 0x1ff   : > { %1543 = vmatpush1.bf16.msra.mxu1 %v3443_v28  ;;  %1655 = vmatprep.subr.bf16.mxu0 %v3446_v35  ;;  %v1066_v28 = vld [vmem:[#allocation11 + $0x20] sm:$0xff] }
 0x200   : > { %v5029_v58 = vsub.f32 %v4952_v13, %v801_v45  ;;  %v5032_v59 = vsub.f32 %v4957_v18, %v802_v48  ;;  %856 = vadd.xlane.f32.xlu1 %v831_v49  ;;  %858 = vadd.xlane.f32.xlu0 %v832_v51  ;;  %v3436_v48 = vcombine.high %v1086_v41, %v1090_v43  ;;  %v1091_v49 = vld [vmem:[#allocation11 + $0xe8] sm:$0xff] }
 0x201   : > { %v784_v62 = vpop.xlane.xlu1 %783  ;;  %v786_v63 = vpop.xlane.xlu0 %785  ;;  %1656 = vmatpush1.bf16.msra.mxu0 %v3445_v29  ;;  %v3435_v51 = vcombine.low %v1086_v41, %v1090_v43  ;;  %v3437_v52 = vcombine.low %v1087_v44, %v1091_v49  ;;  %v3438_v53 = vcombine.high %v1087_v44, %v1091_v49  ;;  %v1063_v29 = vld [vmem:[#allocation11 + $0x8] sm:$0xff]  ;;  %v4654_v43 = vmov 0   ;;  %v5055_v44 = vld [vmem:[#allocation11 + $0x1d0] sm:$0xff] }
 0x202   : > { %v803_v6 = vmul.f32 0.0078125, %v784_v62  ;;  %v804_v7 = vmul.f32 0.0078125, %v786_v63  ;;  %v833_v11 = vmul.f32 %v5029_v58, %v5029_v58  ;;  %v834_v12 = vmul.f32 %v5032_v59, %v5032_v59  ;;  %1544 = vmatprep.subr.bf16.mxu1 %v3436_v48  ;;  %v1079_v62 = vld [vmem:[#allocation11 + $0x88] sm:$0xff]  ;;  %1568 = vmatprep.mubr.bf16.mxu1 %v4654_v43  ;;  %v5057_v48 = vld [vmem:[#allocation11 + $0x1f0] sm:$0xff] }
 0x203   : > { %1545 = vmatpush1.bf16.msra.mxu1 %v3435_v51  ;;  %1657 = vmatprep.subr.bf16.mxu0 %v3438_v53  ;;  %v3428_v63 = vcombine.high %v1078_v60, %v1082_v61  ;;  %v3429_v4 = vcombine.low %v1079_v62, %v1083_v0  ;;  %v3471_v49 = vcombine.low %v5055_v44, %v5057_v48  ;;  %v5065_v53 = vld [vmem:[#allocation11 + $0x1f8] sm:$0xff] }
 0x204   : > { %v5039_v17 = vsub.f32 %v4965_v24, %v803_v6  ;;  %v5042_v19 = vsub.f32 %v4960_v20, %v804_v7  ;;  %860 = vadd.xlane.f32.xlu1 %v833_v11  ;;  %862 = vadd.xlane.f32.xlu0 %v834_v12  ;;  %v3430_v6 = vcombine.high %v1079_v62, %v1083_v0  ;;  %v1070_v7 = vld [vmem:[#allocation11 + $0x40] sm:$0xff]  ;;  %v1071_v12 = vld [vmem:[#allocation11 + $0x48] sm:$0xff] }
 0x205   : > { %v788_v27 = vpop.xlane.xlu1 %787  ;;  %1658 = vmatpush1.bf16.msra.mxu0 %v3437_v52  ;;  %1546 = vmatprep.subr.bf16.mxu1 %v3428_v63  ;;  %v1074_v11 = vld [vmem:[#allocation11 + $0x60] sm:$0xff]  ;;  %v3421_v22 = vcombine.low %v1071_v12, %v1075_v15  ;;  %v3422_v23 = vcombine.high %v1071_v12, %v1075_v15  ;;  %v3472_v51 = vcombine.high %v5055_v44, %v5057_v48  ;;  %v5063_v52 = vld [vmem:[#allocation11 + $0x1d8] sm:$0xff] }
 0x206   : > { %v805_v21 = vmul.f32 0.0078125, %v788_v27  ;;  %v835_v37 = vmul.f32 %v5039_v17, %v5039_v17  ;;  %v836_v38 = vmul.f32 %v5042_v19, %v5042_v19  ;;  %1659 = vmatprep.subr.bf16.mxu0 %v3430_v6  ;;  %v3420_v14 = vcombine.high %v1070_v7, %v1074_v11  ;;  %v1062_v27 = vld [vmem:[#allocation11] sm:$0xff]  ;;  %1681 = vmatprep.mubr.bf16.mxu0 %v4654_v43  ;;  %v1105_v44 = vld [vmem:[#allocation11 + $0x158] sm:$0xff] }
 0x207   : > { %1547 = vmatpush1.bf16.msra.mxu1 %v3427_v3  ;;  %v3419_v16 = vcombine.low %v1070_v7, %v1074_v11  ;;  %v3412_v35 = vcombine.high %v1062_v27, %v1066_v28  ;;  %v3474_v60 = vcombine.high %v5063_v52, %v5065_v53  ;;  %v1109_v48 = vld [vmem:[#allocation11 + $0x178] sm:$0xff] }
 0x208   : > { %v5049_v45 = vsub.f32 %v4968_v26, %v805_v21  ;;  %864 = vadd.xlane.f32.xlu1 %v835_v37  ;;  %866 = vadd.xlane.f32.xlu0 %v836_v38  ;;  %v1067_v21 = vld [vmem:[#allocation11 + $0x28] sm:$0xff]  ;;  %v3411_v37 = vcombine.low %v1062_v27, %v1066_v28 }
 0x209   : > { %1660 = vmatpush1.bf16.msra.mxu0 %v3429_v4  ;;  %1548 = vmatprep.subr.bf16.mxu1 %v3420_v14  ;;  %v3413_v38 = vcombine.low %v1063_v29, %v1067_v21  ;;  %v3414_v41 = vcombine.high %v1063_v29, %v1067_v21 }
 0x20a   : > { %v837_v54 = vmul.f32 %v5049_v45, %v5049_v45  ;;  %1661 = vmatprep.subr.bf16.mxu0 %v3422_v23 }
 0x20b   : > { %1549 = vmatpush1.bf16.msra.mxu1 %v3419_v16 }
 0x20c   : > { %868 = vadd.xlane.f32.xlu1 %v837_v54  ;;  %1550 = vmatprep.subr.bf16.mxu1 %v3412_v35  ;;  %v3473_v54 = vcombine.low %v5063_v52, %v5065_v53 }
 0x20d   : > { %1662 = vmatpush1.bf16.msra.mxu0 %v3421_v22 }
 0x20e   : > { %1663 = vmatprep.subr.bf16.mxu0 %v3414_v41 }
 0x20f   : > { %1551 = vmatpush1.bf16.msra.mxu1 %v3411_v37 }
 0x210   : > { %1762 = vmatprep.subr.bf16.mxu1 %v3472_v51 }
 0x211   : > { %1664 = vmatpush1.bf16.msra.mxu0 %v3413_v38 }
 0x212   : > { %1875 = vmatprep.subr.bf16.mxu0 %v3474_v60 }
 0x275   : > { %v839_v61 = vpop.xlane.xlu0 %838 }
 0x276   : > { %v870_v62 = vmul.f32 0.0078125, %v839_v61 }
 0x278   : > { %v902_v63 = vadd.f32 1e-06, %v870_v62 }
 0x279   : > { %v841_v0 = vpop.xlane.xlu1 %840  ;;  %v843_v3 = vpop.xlane.xlu0 %842 }
 0x27a   : > { %v871_v4 = vmul.f32 0.0078125, %v841_v0  ;;  %v872_v6 = vmul.f32 0.0078125, %v843_v3  ;;  %4114 = vrsqrt.f32 %v902_v63 }
 0x27c   : > { %v903_v7 = vadd.f32 1e-06, %v871_v4  ;;  %v904_v11 = vadd.f32 1e-06, %v872_v6 }
 0x27d   : > { %v845_v12 = vpop.xlane.xlu1 %844  ;;  %v847_v14 = vpop.xlane.xlu0 %846 }
 0x27e   : > { %4116 = vrsqrt.f32 %v903_v7  ;;  %v873_v15 = vmul.f32 0.0078125, %v845_v12  ;;  %v874_v16 = vmul.f32 0.0078125, %v847_v14 }
 0x27f   : > { %4118 = vrsqrt.f32 %v904_v11 }
 0x280   : > { %v905_v22 = vadd.f32 1e-06, %v873_v15  ;;  %v906_v23 = vadd.f32 1e-06, %v874_v16 }
 0x281   : > { %v849_v27 = vpop.xlane.xlu1 %848  ;;  %v851_v28 = vpop.xlane.xlu0 %850 }
 0x282   : > { %4120 = vrsqrt.f32 %v905_v22  ;;  %v875_v29 = vmul.f32 0.0078125, %v849_v27  ;;  %v876_v35 = vmul.f32 0.0078125, %v851_v28 }
 0x283   : > { %4122 = vrsqrt.f32 %v906_v23 }
 0x284   : > { %v907_v21 = vadd.f32 1e-06, %v875_v29  ;;  %v908_v37 = vadd.f32 1e-06, %v876_v35 }
 0x285   : > { %v853_v38 = vpop.xlane.xlu1 %852  ;;  %v855_v41 = vpop.xlane.xlu0 %854 }
 0x286   : > { %4124 = vrsqrt.f32 %v907_v21  ;;  %v877_v51 = vmul.f32 0.0078125, %v853_v38  ;;  %v878_v60 = vmul.f32 0.0078125, %v855_v41 }
 0x287   : > { %v4115_v61 = vpop.eup %4114  ;;  %4126 = vrsqrt.f32 %v908_v37 }
 0x288   : > { %v909_v62 = vadd.f32 1e-06, %v877_v51  ;;  %v910_v63 = vadd.f32 1e-06, %v878_v60  ;;  %v934_v11 = vmul.f32 %v4115_v61, %v4974_v33 }
 0x289   : > { %v857_v0 = vpop.xlane.xlu1 %856  ;;  %v859_v3 = vpop.xlane.xlu0 %858 }
 0x28a   : > { %4128 = vrsqrt.f32 %v909_v62  ;;  %v879_v4 = vmul.f32 0.0078125, %v857_v0  ;;  %v880_v6 = vmul.f32 0.0078125, %v859_v3 }
 0x28b   : > { %v4117_v7 = vpop.eup %4116  ;;  %4130 = vrsqrt.f32 %v910_v63 }
 0x28c   : > { %v4119_v12 = vpop.eup %4118  ;;  %v935_v14 = vmul.f32 %v4117_v7, %v4982_v40  ;;  %v911_v15 = vadd.f32 1e-06, %v879_v4  ;;  %v912_v16 = vadd.f32 1e-06, %v880_v6  ;;  %v1112_v6 = vld [vmem:[#allocation11 + $0x190] sm:$0xff] }
 0x28d   : > { %v861_v22 = vpop.xlane.xlu1 %860  ;;  %v863_v23 = vpop.xlane.xlu0 %862  ;;  %v936_v21 = vmul.f32 %v4119_v12, %v4977_v36 }
 0x28e   : > { %v3663_v27 = vpack.c.bf16 %v935_v14, %v934_v11  ;;  %4132 = vrsqrt.f32 %v911_v15  ;;  %v881_v28 = vmul.f32 0.0078125, %v861_v22  ;;  %v882_v29 = vmul.f32 0.0078125, %v863_v23  ;;  %v1113_v15 = vld [vmem:[#allocation11 + $0x198] sm:$0xff] }
 0x28f   : > { %v4121_v35 = vpop.eup %4120  ;;  %4134 = vrsqrt.f32 %v912_v16  ;;  %v1117_v16 = vld [vmem:[#allocation11 + $0x1b8] sm:$0xff] }
 0x290   : > { %v4123_v37 = vpop.eup %4122  ;;  %3664 = vst [vmem:[#allocation3] sm:$0xff] %v3663_v27   ;;  %v937_v38 = vmul.f32 %v4121_v35, %v4985_v42  ;;  %v913_v33 = vadd.f32 1e-06, %v881_v28  ;;  %v914_v41 = vadd.f32 1e-06, %v882_v29  ;;  %v1116_v42 = vld [vmem:[#allocation11 + $0x1b0] sm:$0xff] }
 0x291   : > { %v865_v40 = vpop.xlane.xlu1 %864  ;;  %v867_v51 = vpop.xlane.xlu0 %866  ;;  %v938_v0 = vmul.f32 %v4123_v37, %v4992_v46  ;;  %v3464_v27 = vcombine.high %v1112_v6, %v1116_v42  ;;  %v1104_v29 = vld [vmem:[#allocation11 + $0x150] sm:$0xff]  ;;  %v3466_v37 = vcombine.high %v1113_v15, %v1117_v16 }
 0x292   : > { %v3668_v60 = vpack.c.bf16 %v937_v38, %v936_v21  ;;  %4136 = vrsqrt.f32 %v913_v33  ;;  %v883_v61 = vmul.f32 0.0078125, %v865_v40  ;;  %v884_v62 = vmul.f32 0.0078125, %v867_v51  ;;  %v1108_v35 = vld [vmem:[#allocation11 + $0x170] sm:$0xff] }
 0x293   : > { %v4125_v63 = vpop.eup %4124  ;;  %4138 = vrsqrt.f32 %v914_v41  ;;  %v3456_v33 = vcombine.high %v1104_v29, %v1108_v35  ;;  %v3465_v51 = vcombine.low %v1113_v15, %v1117_v16  ;;  %v1080_v15 = vld [vmem:[#allocation11 + $0x90] sm:$0xff] }
 0x294   : > { %3747 = vst [vmem:[#allocation3 + $0x8] sm:$0xff] %v3668_v60   ;;  %v939_v3 = vmul.f32 %v4125_v63, %v4999_v55  ;;  %v915_v36 = vadd.f32 1e-06, %v883_v61  ;;  %v916_v4 = vadd.f32 1e-06, %v884_v62  ;;  %v4127_v7 = vpop.eup %4126  ;;  %v1096_v60 = vld [vmem:[#allocation11 + $0x110] sm:$0xff] }
 0x295   : > { %v869_v11 = vpop.xlane.xlu1 %868  ;;  %v940_v46 = vmul.f32 %v4127_v7, %v5002_v57  ;;  %v3463_v57 = vcombine.low %v1112_v6, %v1116_v42  ;;  %v1100_v61 = vld [vmem:[#allocation11 + $0x130] sm:$0xff]  ;;  %v1097_v63 = vld [vmem:[#allocation11 + $0x118] sm:$0xff]  ;;  %v3457_v42 = vcombine.low %v1105_v44, %v1109_v48 }
 0x296   : > { %v3673_v12 = vpack.c.bf16 %v939_v3, %v938_v0  ;;  %4140 = vrsqrt.f32 %v915_v36  ;;  %v885_v14 = vmul.f32 0.0078125, %v869_v11  ;;  %v1101_v0 = vld [vmem:[#allocation11 + $0x138] sm:$0xff]  ;;  %v1092_v6 = vld [vmem:[#allocation11 + $0xf0] sm:$0xff] }
 0x297   : > { %v4129_v22 = vpop.eup %4128  ;;  %v5077_v23 = vld [vmem:[#allocation3] sm:$0xff]   ;;  %4142 = vrsqrt.f32 %v916_v4  ;;  %v1088_v4 = vld [vmem:[#allocation11 + $0xd0] sm:$0xff]  ;;  %v3450_v11 = vcombine.high %v1097_v63, %v1101_v0 }
 0x298   : > { %3748 = vst [vmem:[#allocation3 + $0x10] sm:$0xff] %v3673_v12   ;;  %v941_v55 = vmul.f32 %v4129_v22, %v5009_v8  ;;  %v917_v28 = vadd.f32 1e-06, %v885_v14  ;;  %v4131_v21 = vpop.eup %4130  ;;  %1569 = vmatmul.mubr.bf16.vlgmr.msra.gmra.mxu1 %v5077_v23  ;;  %1682 = vmatmul.mubr.bf16.vlgmr.msra.gmra.mxu0 %v5077_v23 }
 0x299   : > { %1763 = vmatpush1.bf16.msra.mxu1 %v3471_v49  ;;  %1578 = vmatprep.mubr.bf16.mxu1 %v4654_v43  ;;  %v942_v41 = vmul.f32 %v4131_v21, %v5012_v9  ;;  %v3455_v9 = vcombine.low %v1104_v29, %v1108_v35  ;;  %v1081_v21 = vld [vmem:[#allocation11 + $0x98] sm:$0xff] }
 0x29a   : > { %v3678_v38 = vpack.c.bf16 %v941_v55, %v940_v46  ;;  %4144 = vrsqrt.f32 %v917_v28  ;;  %1691 = vmatprep.mubr.bf16.mxu0 %v4654_v43  ;;  %1764 = vmatprep.subr.bf16.mxu1 %v3464_v27  ;;  %v1084_v27 = vld [vmem:[#allocation11 + $0xb0] sm:$0xff]  ;;  %v3449_v46 = vcombine.low %v1097_v63, %v1101_v0  ;;  %v1089_v55 = vld [vmem:[#allocation11 + $0xd8] sm:$0xff] }
 0x29b   : > { %v4133_v8 = vpop.eup %4132  ;;  %1876 = vmatpush1.bf16.msra.mxu0 %v3473_v54  ;;  %v5093_v36 = vld [vmem:[#allocation3 + $0x8] sm:$0xff]   ;;  %v3448_v54 = vcombine.high %v1096_v60, %v1100_v61  ;;  %v1093_v28 = vld [vmem:[#allocation11 + $0xf8] sm:$0xff]  ;;  %v1064_v63 = vld [vmem:[#allocation11 + $0x10] sm:$0xff] }
 0x29c   : > { %3749 = vst [vmem:[#allocation3 + $0x18] sm:$0xff] %v3678_v38   ;;  %v943_v40 = vmul.f32 %v4133_v8, %v5019_v30  ;;  %v4135_v49 = vpop.eup %4134  ;;  %1877 = vmatprep.subr.bf16.mxu0 %v3466_v37  ;;  %v3458_v30 = vcombine.high %v1105_v44, %v1109_v48  ;;  %v1085_v37 = vld [vmem:[#allocation11 + $0xb8] sm:$0xff]  ;;  %v3439_v8 = vcombine.low %v1088_v4, %v1092_v6  ;;  %v1076_v44 = vld [vmem:[#allocation11 + $0x70] sm:$0xff] }
 0x29d   : > { %1765 = vmatpush1.bf16.msra.mxu1 %v3463_v57  ;;  %v944_v52 = vmul.f32 %v4135_v49, %v5022_v32  ;;  %v3447_v32 = vcombine.low %v1096_v60, %v1100_v61  ;;  %v3434_v48 = vcombine.high %v1081_v21, %v1085_v37  ;;  %v3431_v60 = vcombine.low %v1080_v15, %v1084_v27  ;;  %v1073_v61 = vld [vmem:[#allocation11 + $0x58] sm:$0xff]  ;;  %v1068_v0 = vld [vmem:[#allocation11 + $0x30] sm:$0xff] }
 0x29e   : > { %v3683_v62 = vpack.c.bf16 %v943_v40, %v942_v41  ;;  %1766 = vmatprep.subr.bf16.mxu1 %v3456_v33  ;;  %v3432_v33 = vcombine.high %v1080_v15, %v1084_v27  ;;  %v3441_v40 = vcombine.low %v1089_v55, %v1093_v28  ;;  %v4085_v15 = vld [vmem:[#allocation13 + $0x30] sm:$0xff]   ;;  %v4091_v27 = vld [vmem:[#allocation13 + $0xf8] sm:$0xff]  }
 0x29f   : > { %v4137_v3 = vpop.eup %4136  ;;  %1878 = vmatpush1.bf16.msra.mxu0 %v3465_v51  ;;  %v5103_v57 = vld [vmem:[#allocation3 + $0x10] sm:$0xff]  }
 0x2a0   : > { %3750 = vst [vmem:[#allocation3 + $0x20] sm:$0xff] %v3683_v62   ;;  %v945_v53 = vmul.f32 %v4137_v3, %v5029_v58  ;;  %v4139_v7 = vpop.eup %4138  ;;  %1579 = vmatmul.mubr.bf16.gmra.mxu1 %v5093_v36  ;;  %1692 = vmatmul.mubr.bf16.gmra.mxu0 %v5093_v36  ;;  %v3440_v58 = vcombine.high %v1088_v4, %v1092_v6  ;;  %v1072_v51 = vld [vmem:[#allocation11 + $0x50] sm:$0xff]  ;;  %v1077_v62 = vld [vmem:[#allocation11 + $0x78] sm:$0xff] }
 0x2a1   : > { %1588 = vmatprep.mubr.bf16.mxu1 %v4654_v43  ;;  %1701 = vmatprep.mubr.bf16.mxu0 %v4654_v43  ;;  %v946_v16 = vmul.f32 %v4139_v7, %v5032_v59  ;;  %v3442_v59 = vcombine.high %v1089_v55, %v1093_v28  ;;  %v1065_v3 = vld [vmem:[#allocation11 + $0x18] sm:$0xff]  ;;  %v3425_v4 = vcombine.low %v1073_v61, %v1077_v62  ;;  %v4088_v55 = vld [vmem:[#allocation13 + $0x60] sm:$0xff]  }
 0x2a2   : > { %v3688_v12 = vpack.c.bf16 %v945_v53, %v944_v52  ;;  %1767 = vmatpush1.bf16.msra.mxu1 %v3455_v9  ;;  %1879 = vmatprep.subr.bf16.mxu0 %v3458_v30  ;;  %v1069_v9 = vld [vmem:[#allocation11 + $0x38] sm:$0xff]  ;;  %v3423_v52 = vcombine.low %v1072_v51, %v1076_v44  ;;  %v3426_v53 = vcombine.high %v1073_v61, %v1077_v62  ;;  %v4089_v28 = vld [vmem:[#allocation13 + $0x20] sm:$0xff]  }
 0x2a3   : > { %v4141_v14 = vpop.eup %4140  ;;  %1768 = vmatprep.subr.bf16.mxu1 %v3448_v54  ;;  %1880 = vmatpush1.bf16.msra.mxu0 %v3457_v42  ;;  %v4077_v30 = vld [vmem:[#allocation3 + $0x18] sm:$0xff]   ;;  %v3416_v54 = vcombine.high %v1064_v63, %v1068_v0  ;;  %v3418_v6 = vcombine.high %v1065_v3, %v1069_v9  ;;  %v3415_v42 = vcombine.low %v1064_v63, %v1068_v0  ;;  %v4108_v63 = vld [vmem:[#allocation13 + $0x40] sm:$0xff]  }
 0x2a4   : > { %3751 = vst [vmem:[#allocation3 + $0x28] sm:$0xff] %v3688_v12   ;;  %v947_v22 = vmul.f32 %v4141_v14, %v5039_v17  ;;  %v4143_v29 = vpop.eup %4142  ;;  %1881 = vmatprep.subr.bf16.mxu0 %v3450_v11  ;;  %v3417_v7 = vcombine.low %v1065_v3, %v1069_v9  ;;  %v4112_v0 = vld [vmem:[#allocation13 + $0xc0] sm:$0xff]  }
 0x2a5   : > { %v948_v17 = vmul.f32 %v4143_v29, %v5042_v19  ;;  %v3424_v19 = vcombine.high %v1072_v51, %v1076_v44  ;;  %v4092_v29 = vld [vmem:[#allocation13 + $0x18] sm:$0xff]   ;;  %v4097_v51 = vld [vmem:[#allocation13 + $0x10] sm:$0xff]   ;;  %v5148_v3 = vld [vmem:[%s6040_s5] sm:$0xff] }
 0x2a6   : > { %v3693_v35 = vpack.c.bf16 %v947_v22, %v946_v16  ;;  %1769 = vmatpush1.bf16.msra.mxu1 %v3447_v32  ;;  %v4086_v16 = vld [vmem:[#allocation13 + $0x68] sm:$0xff]   ;;  %v4107_v44 = vld [vmem:[#allocation13 + $0x90] sm:$0xff]   ;;  %v4109_v9 = vld [vmem:[#allocation13] sm:$0xff]  }
 0x2a7   : > { %v4145_v38 = vpop.eup %4144  ;;  %1770 = vmatprep.subr.bf16.mxu1 %v3440_v58  ;;  %1882 = vmatpush1.bf16.msra.mxu0 %v3449_v46  ;;  %v4078_v11 = vld [vmem:[#allocation3 + $0x20] sm:$0xff]   ;;  %v4084_v58 = vld [vmem:[#allocation13 + $0x70] sm:$0xff]   ;;  %v4087_v22 = vld [vmem:[#allocation13 + $0x28] sm:$0xff]  }
 0x2a8   : > { %3752 = vst [vmem:[#allocation3 + $0x30] sm:$0xff] %v3693_v35   ;;  %v949_v41 = vmul.f32 %v4145_v38, %v5049_v45  ;;  %1589 = vmatmul.mubr.bf16.gmra.mxu1 %v5103_v57  ;;  %1702 = vmatmul.mubr.bf16.gmra.mxu0 %v5103_v57  ;;  %v3433_v45 = vcombine.low %v1081_v21, %v1085_v37  ;;  %v4093_v46 = vld [vmem:[#allocation13 + $0xb8] sm:$0xff]   ;;  %v4094_v35 = vld [vmem:[#allocation13 + $0xf0] sm:$0xff]   ;;  %v4098_v37 = vld [vmem:[#allocation13 + $0xe8] sm:$0xff]  }
 0x2a9   : > { %1598 = vmatprep.mubr.bf16.mxu1 %v4654_v43  ;;  %1711 = vmatprep.mubr.bf16.mxu0 %v4654_v43  ;;  %v4095_v21 = vld [vmem:[#allocation13 + $0xb0] sm:$0xff]   ;;  %v4099_v38 = vld [vmem:[#allocation13 + $0xa8] sm:$0xff]  }
 0x2aa   : > { %v3698_v49 = vpack.c.bf16 %v949_v41, %v948_v17  ;;  %1771 = vmatpush1.bf16.msra.mxu1 %v3439_v8  ;;  %1883 = vmatprep.subr.bf16.mxu0 %v3442_v59  ;;  %v4101_v8 = vld [vmem:[#allocation13 + $0xa0] sm:$0xff]   ;;  %v4105_v59 = vld [vmem:[#allocation13 + $0x98] sm:$0xff]   ;;  %v1128_v17 = vlaneseq  ;;  %v4096_v41 = vld [vmem:[#allocation13 + $0x50] sm:$0xff]  }
 0x2ab   : > { %1772 = vmatprep.subr.bf16.mxu1 %v3432_v33  ;;  %1884 = vmatpush1.bf16.msra.mxu0 %v3441_v40  ;;  %v4079_v12 = vld [vmem:[#allocation3 + $0x28] sm:$0xff]   ;;  %v4104_v33 = vld [vmem:[#allocation13 + $0xd8] sm:$0xff]   ;;  %v4106_v40 = vld [vmem:[#allocation13 + $0xd0] sm:$0xff]  }
 0x2ac   : > { %3753 = vst [vmem:[#allocation3 + $0x38] sm:$0xff] %v3698_v49   ;;  %1885 = vmatprep.subr.bf16.mxu0 %v3434_v48  ;;  %v5141_v48 = vshrl.u32 %v1128_v17, 7  ;;  %v4102_v49 = vld [vmem:[#allocation13 + $0x48] sm:$0xff]  }
 0x2ae   : > { %1773 = vmatpush1.bf16.msra.mxu1 %v3431_v60  ;;  %v4110_v60 = vld [vmem:[#allocation13 + $0xc8] sm:$0xff]   ;;  %v1130_v61 = vsub.s32 0, %v5141_v48  ;;  %v1138_v62 = vsub.s32 2, %v5141_v48 }
 0x2af   : > { %1774 = vmatprep.subr.bf16.mxu1 %v3424_v19  ;;  %1886 = vmatpush1.bf16.msra.mxu0 %v3433_v45  ;;  %v4080_v14 = vld [vmem:[#allocation3 + $0x30] sm:$0xff]   ;;  %v4103_v19 = vld [vmem:[#allocation13 + $0x8] sm:$0xff]  }
 0x2b0   : > { %1599 = vmatmul.mubr.bf16.gmra.mxu1 %v4077_v30  ;;  %1712 = vmatmul.mubr.bf16.gmra.mxu0 %v4077_v30  ;;  %v4111_v45 = vld [vmem:[#allocation13 + $0x88] sm:$0xff]  }
 0x2b1   : > { %1608 = vmatprep.mubr.bf16.mxu1 %v4654_v43  ;;  %1721 = vmatprep.mubr.bf16.mxu0 %v4654_v43 }
 0x2b2   : > { %1775 = vmatpush1.bf16.msra.mxu1 %v3423_v52  ;;  %1887 = vmatprep.subr.bf16.mxu0 %v3426_v53  ;;  %v1134_v52 = vsub.s32 1, %v5141_v48  ;;  %v1142_v53 = vsub.s32 3, %v5141_v48 }
 0x2b3   : > { %1776 = vmatprep.subr.bf16.mxu1 %v3416_v54  ;;  %1888 = vmatpush1.bf16.msra.mxu0 %v3425_v4  ;;  %v4081_v32 = vld [vmem:[#allocation3 + $0x38] sm:$0xff]   ;;  %v5153_v54 = vrot.slane %v5148_v3, %v1130_v61  ;;  %v5156_v4 = vrot.slane %v5148_v3, %v1138_v62 }
 0x2b4   : > { %1889 = vmatprep.subr.bf16.mxu0 %v3418_v6  ;;  %v5159_v6 = vrot.slane %v5148_v3, %v1134_v52 }
 0x2b6   : > { %1777 = vmatpush1.bf16.msra.mxu1 %v3415_v42  ;;  %v5162_v42 = vrot.slane %v5148_v3, %v1142_v53 }
 0x2b7   : > { %1890 = vmatpush1.bf16.msra.mxu0 %v3417_v7 }
 0x2b8   : > { %1609 = vmatmul.mubr.bf16.gmra.mxu1 %v4078_v11  ;;  %1722 = vmatmul.mubr.bf16.gmra.mxu0 %v4078_v11 }
 0x2b9   : > { %1618 = vmatprep.mubr.bf16.mxu1 %v4654_v43  ;;  %1731 = vmatprep.mubr.bf16.mxu0 %v4654_v43 }
 0x2ba   : > { %3841 = vmatprep.subr.bf16.mxu0 %v4091_v27 }
 0x2c0   : > { %1619 = vmatmul.mubr.bf16.gmra.mxu1 %v4079_v12  ;;  %1732 = vmatmul.mubr.bf16.gmra.mxu0 %v4079_v12 }
 0x2c1   : > { %1628 = vmatprep.mubr.bf16.mxu1 %v4654_v43  ;;  %1741 = vmatprep.mubr.bf16.mxu0 %v4654_v43 }
 0x2c8   : > { %1629 = vmatmul.mubr.bf16.gmra.mxu1 %v4080_v14  ;;  %1742 = vmatmul.mubr.bf16.gmra.mxu0 %v4080_v14 }
 0x2c9   : > { %1638 = vmatprep.mubr.bf16.mxu1 %v4654_v43  ;;  %1751 = vmatprep.mubr.bf16.mxu0 %v4654_v43 }
 0x2d0   : > { %1639 = vmatmul.mubr.bf16.gmra.mxu1 %v4081_v32  ;;  %1752 = vmatmul.mubr.bf16.gmra.mxu0 %v4081_v32 }
 0x2d1   : > { %1794 = vmatprep.mubr.bf16.mxu1 %v4654_v43  ;;  %1907 = vmatprep.mubr.bf16.mxu0 %v4654_v43 }
 0x2d8   : > { %1795 = vmatmul.mubr.bf16.vlgmr.msra.gmra.mxu1 %v5077_v23  ;;  %1908 = vmatmul.mubr.bf16.vlgmr.msra.gmra.mxu0 %v5077_v23  ;;  %v4082_v23 = vld [vmem:[#allocation13 + $0x78] sm:$0xff]  }
 0x2d9   : > { %1804 = vmatprep.mubr.bf16.mxu1 %v4654_v43  ;;  %1917 = vmatprep.mubr.bf16.mxu0 %v4654_v43 }
 0x2da   : > { %3777 = vmatprep.subr.bf16.mxu1 %v4082_v23  ;;  %3842 = vmatpush3.bf16.msra.mxu0 %v4093_v46 }
 0x2db   : > { %3843 = vmatprep.subr.bf16.mxu0 %v4094_v35 }
 0x2de   : > { %3844 = vmatpush3.bf16.msra.mxu0 %v4095_v21 }
 0x2df   : > { %3845 = vmatprep.subr.bf16.mxu0 %v4098_v37 }
 0x2e0   : > { %1805 = vmatmul.mubr.bf16.gmra.mxu1 %v5093_v36  ;;  %1918 = vmatmul.mubr.bf16.gmra.mxu0 %v5093_v36  ;;  %v4083_v36 = vld [vmem:[#allocation13 + $0x38] sm:$0xff]  }
 0x2e1   : > { %1814 = vmatprep.mubr.bf16.mxu1 %v4654_v43  ;;  %1927 = vmatprep.mubr.bf16.mxu0 %v4654_v43 }
 0x2e2   : > { %3778 = vmatpush3.bf16.msra.mxu1 %v4083_v36  ;;  %3846 = vmatpush3.bf16.msra.mxu0 %v4099_v38 }
 0x2e3   : > { %3779 = vmatprep.subr.bf16.mxu1 %v4084_v58 }
 0x2e6   : > { %3780 = vmatpush3.bf16.msra.mxu1 %v4085_v15 }
 0x2e7   : > { %3781 = vmatprep.subr.bf16.mxu1 %v4086_v16 }
 0x2e8   : > { %1815 = vmatmul.mubr.bf16.gmra.mxu1 %v5103_v57  ;;  %1928 = vmatmul.mubr.bf16.gmra.mxu0 %v5103_v57  ;;  %v4100_v57 = vld [vmem:[#allocation13 + $0xe0] sm:$0xff]  }
 0x2e9   : > { %1824 = vmatprep.mubr.bf16.mxu1 %v4654_v43  ;;  %1937 = vmatprep.mubr.bf16.mxu0 %v4654_v43 }
 0x2ea   : > { %3782 = vmatpush3.bf16.msra.mxu1 %v4087_v22  ;;  %3847 = vmatprep.subr.bf16.mxu0 %v4100_v57 }
 0x2eb   : > { %3783 = vmatprep.subr.bf16.mxu1 %v4088_v55  ;;  %3848 = vmatpush3.bf16.msra.mxu0 %v4101_v8 }
 0x2ec   : > { %3849 = vmatprep.subr.bf16.mxu0 %v4104_v33 }
 0x2ee   : > { %3784 = vmatpush3.bf16.msra.mxu1 %v4089_v28 }
 0x2ef   : > { %3850 = vmatpush3.bf16.msra.mxu0 %v4105_v59 }
 0x2f0   : > { %1825 = vmatmul.mubr.bf16.gmra.mxu1 %v4077_v30  ;;  %1938 = vmatmul.mubr.bf16.gmra.mxu0 %v4077_v30  ;;  %v4113_v30 = vld [vmem:[#allocation13 + $0x80] sm:$0xff]  }
 0x2f1   : > { %1834 = vmatprep.mubr.bf16.mxu1 %v4654_v43  ;;  %1947 = vmatprep.mubr.bf16.mxu0 %v4654_v43 }
 0x2f2   : > { %3851 = vmatprep.subr.bf16.mxu0 %v4106_v40 }
 0x2f3   : > { %3852 = vmatpush3.bf16.msra.mxu0 %v4107_v44 }
 0x2f4   : > { %3853 = vmatprep.subr.bf16.mxu0 %v4110_v60 }
 0x2f7   : > { %3854 = vmatpush3.bf16.msra.mxu0 %v4111_v45 }
 0x2f8   : > { %1835 = vmatmul.mubr.bf16.gmra.mxu1 %v4078_v11  ;;  %1948 = vmatmul.mubr.bf16.gmra.mxu0 %v4078_v11 }
 0x2f9   : > { %1844 = vmatprep.mubr.bf16.mxu1 %v4654_v43  ;;  %1957 = vmatprep.mubr.bf16.mxu0 %v4654_v43 }
 0x2fa   : > { %3855 = vmatprep.subr.bf16.mxu0 %v4112_v0 }
 0x2fb   : > { %3856 = vmatpush3.bf16.msra.mxu0 %v4113_v30 }
 0x300   : > { %1845 = vmatmul.mubr.bf16.gmra.mxu1 %v4079_v12  ;;  %1958 = vmatmul.mubr.bf16.gmra.mxu0 %v4079_v12 }
 0x301   : > { %1854 = vmatprep.mubr.bf16.mxu1 %v4654_v43  ;;  %1967 = vmatprep.mubr.bf16.mxu0 %v4654_v43 }
 0x308   : > { %1855 = vmatmul.mubr.bf16.gmra.mxu1 %v4080_v14  ;;  %1968 = vmatmul.mubr.bf16.gmra.mxu0 %v4080_v14 }
 0x309   : > { %1864 = vmatprep.mubr.bf16.mxu1 %v4654_v43  ;;  %1977 = vmatprep.mubr.bf16.mxu0 %v4654_v43  ;;  %v4090_v43 = vld [vmem:[#allocation13 + $0x58] sm:$0xff]  }
 0x30a   : > { %3785 = vmatprep.subr.bf16.mxu1 %v4090_v43 }
 0x30b   : > { %3786 = vmatpush3.bf16.msra.mxu1 %v4092_v29 }
 0x30c   : > { %3787 = vmatprep.subr.bf16.mxu1 %v4096_v41 }
 0x30f   : > { %3788 = vmatpush3.bf16.msra.mxu1 %v4097_v51 }
 0x310   : > { %1865 = vmatmul.mubr.bf16.gmra.mxu1 %v4081_v32  ;;  %1978 = vmatmul.mubr.bf16.gmra.mxu0 %v4081_v32 }
 0x311   : > { %3789 = vmatprep.subr.bf16.mxu1 %v4102_v49 }
 0x313   : > { %3790 = vmatpush3.bf16.msra.mxu1 %v4103_v19 }
 0x314   : > { %3791 = vmatprep.subr.bf16.mxu1 %v4108_v63 }
 0x317   : > { %3792 = vmatpush3.bf16.msra.mxu1 %v4109_v9 }
 0x318   : > { %3937 = vmatprep.subr.bf16.mxu1 %v4091_v27 }
 0x358   : > { %v1570_v7 = vpop.f32.mrf.mxu1  ;;  %v1683_v11 = vpop.f32.mrf.mxu0 }
 0x359   : > { %v5165_v12 = vadd.f32 %v1570_v7, %v5153_v54  ;;  %v5168_v14 = vadd.f32 %v1683_v11, %v5156_v4 }
 0x35a   : > { %v1572_v32 = vpop.f32.mrf.mxu1  ;;  %v1685_v23 = vpop.f32.mrf.mxu0 }
 0x35b   : > { %v3475_v36 = vmul.f32 -1.442695, %v5165_v12  ;;  %v3477_v58 = vmul.f32 -1.442695, %v5168_v14  ;;  %v5173_v15 = vadd.f32 %v1572_v32, %v5159_v6  ;;  %v5176_v16 = vadd.f32 %v1685_v23, %v5162_v42 }
 0x35c   : > { %v1574_v22 = vpop.f32.mrf.mxu1  ;;  %v1687_v27 = vpop.f32.mrf.mxu0 }
 0x35d   : > { %4146 = vpow2.f32 %v3475_v36  ;;  %v3476_v46 = vmul.f32 -1.442695, %v5173_v15  ;;  %v3478_v55 = vmul.f32 -1.442695, %v5176_v16  ;;  %v5181_v28 = vadd.f32 %v1574_v22, %v5153_v54 }
 0x35e   : > { %4148 = vpow2.f32 %v3477_v58  ;;  %v5184_v43 = vadd.f32 %v1687_v27, %v5156_v4  ;;  %v1576_v29 = vpop.f32.mrf.mxu1  ;;  %v1689_v35 = vpop.f32.mrf.mxu0  ;;  %v1146_v22 = vsub.s32 4, %v5141_v48 }
 0x35f   : > { %4150 = vpow2.f32 %v3476_v46  ;;  %v3479_v21 = vmul.f32 -1.442695, %v5181_v28  ;;  %v5188_v37 = vadd.f32 %v1576_v29, %v5159_v6  ;;  %v5191_v38 = vadd.f32 %v1689_v35, %v5162_v42 }
 0x360   : > { %4152 = vpow2.f32 %v3478_v55  ;;  %v3481_v57 = vmul.f32 -1.442695, %v5184_v43  ;;  %v1580_v8 = vpop.f32.mrf.mxu1  ;;  %v1693_v33 = vpop.f32.mrf.mxu0  ;;  %v1154_v55 = vsub.s32 6, %v5141_v48 }
 0x361   : > { %4154 = vpow2.f32 %v3479_v21  ;;  %v3480_v59 = vmul.f32 -1.442695, %v5188_v37  ;;  %v3482_v17 = vmul.f32 -1.442695, %v5191_v38  ;;  %v5197_v41 = vadd.f32 %v1580_v8, %v5153_v54 }
 0x362   : > { %4156 = vpow2.f32 %v3481_v57  ;;  %v5200_v40 = vadd.f32 %v1693_v33, %v5156_v4  ;;  %v1582_v51 = vpop.f32.mrf.mxu1  ;;  %v1695_v44 = vpop.f32.mrf.mxu0  ;;  %v1150_v57 = vsub.s32 5, %v5141_v48 }
 0x363   : > { %4158 = vpow2.f32 %v3480_v59  ;;  %v3483_v49 = vmul.f32 -1.442695, %v5197_v41  ;;  %v5204_v60 = vadd.f32 %v1582_v51, %v5159_v6  ;;  %v5207_v19 = vadd.f32 %v1695_v44, %v5162_v42 }
 0x364   : > { %4160 = vpow2.f32 %v3482_v17  ;;  %v3485_v45 = vmul.f32 -1.442695, %v5200_v40  ;;  %v1584_v61 = vpop.f32.mrf.mxu1  ;;  %v1697_v62 = vpop.f32.mrf.mxu0  ;;  %v1158_v59 = vsub.s32 7, %v5141_v48 }
 0x365   : > { %4162 = vpow2.f32 %v3483_v49  ;;  %v3484_v63 = vmul.f32 -1.442695, %v5204_v60  ;;  %v3486_v0 = vmul.f32 -1.442695, %v5207_v19  ;;  %v5213_v9 = vadd.f32 %v1584_v61, %v5153_v54 }
 0x366   : > { %4164 = vpow2.f32 %v3485_v45  ;;  %v5216_v30 = vadd.f32 %v1697_v62, %v5156_v4  ;;  %v1586_v52 = vpop.f32.mrf.mxu1  ;;  %v1699_v53 = vpop.f32.mrf.mxu0  ;;  %v5233_v62 = vrot.slane %v5148_v3, %v1146_v22 }
 0x367   : > { %4166 = vpow2.f32 %v3484_v63  ;;  %v3487_v7 = vmul.f32 -1.442695, %v5213_v9  ;;  %v5220_v11 = vadd.f32 %v1586_v52, %v5159_v6  ;;  %v5223_v32 = vadd.f32 %v1699_v53, %v5162_v42 }
 0x368   : > { %4168 = vpow2.f32 %v3486_v0  ;;  %v3489_v23 = vmul.f32 -1.442695, %v5216_v30  ;;  %v1590_v36 = vpop.f32.mrf.mxu1  ;;  %v1703_v58 = vpop.f32.mrf.mxu0  ;;  %v5236_v63 = vrot.slane %v5148_v3, %v1154_v55  ;;  %v5248_v55 = vrot.slane %v5148_v3, %v1158_v59 }
 0x369   : > { %4170 = vpow2.f32 %v3487_v7  ;;  %v3488_v27 = vmul.f32 -1.442695, %v5220_v11  ;;  %v3490_v46 = vmul.f32 -1.442695, %v5223_v32  ;;  %v5239_v53 = vadd.f32 %v1590_v36, %v5153_v54 }
 0x36a   : > { %v4147_v29 = vpop.eup %4146  ;;  %4172 = vpow2.f32 %v3489_v23  ;;  %v1592_v35 = vpop.f32.mrf.mxu1  ;;  %v5242_v23 = vrot.slane %v5148_v3, %v1150_v57  ;;  %v5245_v22 = vadd.f32 %v1703_v58, %v5156_v4 }
 0x36b   : > { %v1705_v21 = vpop.f32.mrf.mxu0  ;;  %v4149_v8 = vpop.eup %4148  ;;  %v2180_v33 = vadd.f32 1.0, %v4147_v29  ;;  %4174 = vpow2.f32 %v3488_v27  ;;  %v5251_v36 = vadd.f32 %v1592_v35, %v5159_v6  ;;  %v5263_v35 = vmul.f32 -1.442695, %v5239_v53 }
 0x36c   : > { %v4151_v17 = vpop.eup %4150  ;;  %v2182_v51 = vadd.f32 1.0, %v4149_v8  ;;  %4176 = vpow2.f32 %v3490_v46  ;;  %v1594_v44 = vpop.f32.mrf.mxu1 }
 0x36d   : > { %v1707_v49 = vpop.f32.mrf.mxu0  ;;  %v4153_v45 = vpop.eup %4152  ;;  %4178 = vrcp.f32 %v2180_v33  ;;  %v2181_v61 = vadd.f32 1.0, %v4151_v17  ;;  %v5254_v33 = vadd.f32 %v1705_v21, %v5162_v42  ;;  %v5257_v58 = vadd.f32 %v1594_v44, %v5153_v54 }
 0x36e   : > { %v4155_v0 = vpop.eup %4154  ;;  %4180 = vrcp.f32 %v2182_v51  ;;  %v2183_v52 = vadd.f32 1.0, %v4153_v45  ;;  %v1596_v48 = vpop.f32.mrf.mxu1  ;;  %v5260_v3 = vadd.f32 %v1707_v49, %v5156_v4  ;;  %v3493_v44 = vmul.f32 -1.442695, %v5245_v22 }
 0x36f   : > { %v1709_v7 = vpop.f32.mrf.mxu0  ;;  %v4157_v27 = vpop.eup %4156  ;;  %4182 = vrcp.f32 %v2181_v61  ;;  %v2184_v46 = vadd.f32 1.0, %v4155_v0  ;;  %v5266_v21 = vadd.f32 %v1596_v48, %v5159_v6  ;;  %v5276_v26 = vmul.f32 -1.442695, %v5254_v33 }
 0x370   : > { %v4159_v29 = vpop.eup %4158  ;;  %4184 = vrcp.f32 %v2183_v52  ;;  %v2186_v8 = vadd.f32 1.0, %v4157_v27  ;;  %v1600_v57 = vpop.f32.mrf.mxu1  ;;  %6150 = vst [vmem:[#allocation40_spill] sm:$0xff] %v5260_v3 }
 0x371   : > { %v1713_v17 = vpop.f32.mrf.mxu0  ;;  %v4161_v51 = vpop.eup %4160  ;;  %4186 = vrcp.f32 %v2184_v46  ;;  %v2185_v45 = vadd.f32 1.0, %v4159_v29  ;;  %6151 = vst [vmem:[#allocation41_spill] sm:$0xff] %v5266_v21  ;;  %v5270_v29 = vadd.f32 %v1709_v7, %v5162_v42  ;;  %v5282_v7 = vmul.f32 -1.442695, %v5260_v3 }
 0x372   : > { %v4163_v59 = vpop.eup %4162  ;;  %4188 = vrcp.f32 %v2186_v8  ;;  %v2187_v61 = vadd.f32 1.0, %v4161_v51  ;;  %v1602_v0 = vpop.f32.mrf.mxu1  ;;  %v5273_v51 = vmul.f32 -1.442695, %v5251_v36  ;;  %v5288_v13 = vadd.f32 %v1600_v57, %v5153_v54 }
 0x373   : > { %v1715_v52 = vpop.f32.mrf.mxu0  ;;  %v4165_v27 = vpop.eup %4164  ;;  %4190 = vrcp.f32 %v2185_v45  ;;  %v2188_v46 = vadd.f32 1.0, %v4163_v59  ;;  %6152 = vst [vmem:[#allocation42_spill] sm:$0xff] %v5270_v29  ;;  %v5279_v59 = vmul.f32 -1.442695, %v5257_v58  ;;  %v5294_v1 = vadd.f32 %v1713_v17, %v5156_v4 }
 0x374   : > { %v4167_v49 = vpop.eup %4166  ;;  %4192 = vrcp.f32 %v2187_v61  ;;  %v2190_v8 = vadd.f32 1.0, %v4165_v27  ;;  %v1604_v48 = vpop.f32.mrf.mxu1  ;;  %v5285_v27 = vmul.f32 -1.442695, %v5266_v21  ;;  %6153 = vst [vmem:[#allocation43_spill] sm:$0xff] %v5288_v13  ;;  %v5300_v57 = vadd.f32 %v1715_v52, %v5162_v42 }
 0x375   : > { %v1717_v20 = vpop.f32.mrf.mxu0  ;;  %v4169_v24 = vpop.eup %4168  ;;  %4194 = vrcp.f32 %v2188_v46  ;;  %v2189_v45 = vadd.f32 1.0, %v4167_v49  ;;  %v5291_v49 = vmul.f32 -1.442695, %v5270_v29  ;;  %6154 = vst [vmem:[#allocation44_spill] sm:$0xff] %v5294_v1 }
 0x376   : > { %v4171_v18 = vpop.eup %4170  ;;  %4196 = vrcp.f32 %v2190_v8  ;;  %v2191_v61 = vadd.f32 1.0, %v4169_v24  ;;  %v1606_v5 = vpop.f32.mrf.mxu1  ;;  %v5297_v8 = vadd.f32 %v1602_v0, %v5159_v6  ;;  %6156 = vst [vmem:[#allocation46_spill] sm:$0xff] %v5300_v57  ;;  %v5306_v17 = vadd.f32 %v1717_v20, %v5156_v4 }
 0x377   : > { %v1719_v10 = vpop.f32.mrf.mxu0  ;;  %v4173_v2 = vpop.eup %4172  ;;  %4198 = vrcp.f32 %v2189_v45  ;;  %v2192_v46 = vadd.f32 1.0, %v4171_v18  ;;  %v5303_v45 = vadd.f32 %v1604_v48, %v5153_v54  ;;  %v5309_v0 = vadd.f32 %v1606_v5, %v5159_v6 }
 0x378   : > { %v4175_v50 = vpop.eup %4174  ;;  %4200 = vrcp.f32 %v2191_v61  ;;  %v2194_v24 = vadd.f32 1.0, %v4173_v2  ;;  %6155 = vst [vmem:[#allocation45_spill] sm:$0xff] %v5297_v8  ;;  %v1610_v56 = vpop.f32.mrf.mxu1  ;;  %6158 = vst [vmem:[#allocation48_spill] sm:$0xff] %v5306_v17  ;;  %v5312_v52 = vadd.f32 %v1719_v10, %v5162_v42  ;;  %v5316_v48 = vmul.f32 -1.442695, %v5294_v1 }
 0x379   : > { %v1723_v47 = vpop.f32.mrf.mxu0  ;;  %v4177_v34 = vpop.eup %4176  ;;  %4202 = vrcp.f32 %v2192_v46  ;;  %v2193_v18 = vadd.f32 1.0, %v4175_v50  ;;  %6157 = vst [vmem:[#allocation47_spill] sm:$0xff] %v5303_v45  ;;  %6159 = vst [vmem:[#allocation49_spill] sm:$0xff] %v5309_v0  ;;  %v3499_v50 = vmul.f32 -1.442695, %v5288_v13  ;;  %v5319_v20 = vadd.f32 %v1610_v56, %v5153_v54 }
 0x37a   : > { %v4179_v25 = vpop.eup %4178  ;;  %4204 = vrcp.f32 %v2194_v24  ;;  %v2195_v2 = vadd.f32 1.0, %v4177_v34  ;;  %6160 = vst [vmem:[#allocation50_spill] sm:$0xff] %v5312_v52  ;;  %v1612_v61 = vpop.f32.mrf.mxu1  ;;  %v5322_v34 = vmul.f32 -1.442695, %v5297_v8  ;;  %v5325_v5 = vmul.f32 -1.442695, %v5300_v57 }
 0x37b   : > { %v1725_v39 = vpop.f32.mrf.mxu0  ;;  %v4181_v31 = vpop.eup %4180  ;;  %4206 = vrcp.f32 %v2193_v18  ;;  %6161 = vst [vmem:[#allocation51_spill] sm:$0xff] %v5319_v20  ;;  %v5328_v10 = vadd.f32 %v1723_v47, %v5156_v4  ;;  %v5332_v1 = vmul.f32 -1.442695, %v5303_v45  ;;  %v5335_v56 = vmul.f32 -1.442695, %v5306_v17 }
 0x37c   : > { %v4183_v46 = vpop.eup %4182  ;;  %4208 = vrcp.f32 %v2195_v2  ;;  %v1614_v24 = vpop.f32.mrf.mxu1  ;;  %v5338_v2 = vadd.f32 %v1612_v61, %v5159_v6  ;;  %v5341_v57 = vmul.f32 -1.442695, %v5309_v0  ;;  %v5344_v47 = vmul.f32 -1.442695, %v5312_v52 }
 0x37d   : > { %6162 = vst [vmem:[#allocation52_spill] sm:$0xff] %v5328_v10  ;;  %v1727_v18 = vpop.f32.mrf.mxu0  ;;  %v4185_v13 = vpop.eup %4184  ;;  %4210 = vpow2.f32 %v5263_v35  ;;  %v5347_v29 = vadd.f32 %v1725_v39, %v5162_v42  ;;  %v5350_v17 = vmul.f32 %v4179_v25, %v5165_v12  ;;  %v5354_v61 = vmul.f32 -1.442695, %v5319_v20 }
 0x37e   : > { %6163 = vst [vmem:[#allocation53_spill] sm:$0xff] %v5338_v2  ;;  %v4187_v8 = vpop.eup %4186  ;;  %4212 = vpow2.f32 %v3493_v44  ;;  %v1616_v35 = vpop.f32.mrf.mxu1  ;;  %v5357_v44 = vadd.f32 %v1614_v24, %v5153_v54  ;;  %v5360_v52 = vmul.f32 %v4181_v31, %v5168_v14  ;;  %v5364_v39 = vmul.f32 -1.442695, %v5328_v10 }
 0x37f   : > { %6164 = vst [vmem:[#allocation54_spill] sm:$0xff] %v5347_v29  ;;  %v1729_v45 = vpop.f32.mrf.mxu0  ;;  %v4189_v21 = vpop.eup %4188  ;;  %4214 = vpow2.f32 %v5273_v51  ;;  %v5367_v25 = vadd.f32 %v1727_v18, %v5156_v4  ;;  %v5370_v20 = vmul.f32 %v4183_v46, %v5173_v15  ;;  %v5374_v24 = vmul.f32 -1.442695, %v5338_v2 }
 0x380   : > { %6165 = vst [vmem:[#allocation55_spill] sm:$0xff] %v5357_v44  ;;  %v4191_v0 = vpop.eup %4190  ;;  %4216 = vpow2.f32 %v5276_v26  ;;  %v1620_v12 = vpop.f32.mrf.mxu1  ;;  %v5377_v31 = vadd.f32 %v1616_v35, %v5159_v6  ;;  %v5380_v14 = vmul.f32 %v4185_v13, %v5176_v16  ;;  %v5384_v18 = vmul.f32 -1.442695, %v5347_v29 }
 0x381   : > { %6166 = vst [vmem:[#allocation56_spill] sm:$0xff] %v5367_v25  ;;  %v1733_v51 = vpop.f32.mrf.mxu0  ;;  %v4193_v3 = vpop.eup %4192  ;;  %4218 = vpow2.f32 %v5279_v59  ;;  %v5387_v15 = vadd.f32 %v1729_v45, %v5162_v42  ;;  %v5390_v2 = vmul.f32 %v4187_v8, %v5181_v28  ;;  %v5394_v35 = vmul.f32 -1.442695, %v5357_v44 }
 0x382   : > { %6167 = vst [vmem:[#allocation57_spill] sm:$0xff] %v5377_v31  ;;  %v4195_v26 = vpop.eup %4194  ;;  %4220 = vpow2.f32 %v5282_v7  ;;  %v1622_v46 = vpop.f32.mrf.mxu1  ;;  %v5397_v13 = vadd.f32 %v1620_v12, %v5153_v54  ;;  %v5400_v7 = vmul.f32 %v4189_v21, %v5184_v43  ;;  %v5404_v45 = vmul.f32 -1.442695, %v5367_v25 }
 0x383   : > { %6168 = vst [vmem:[#allocation58_spill] sm:$0xff] %v5387_v15  ;;  %v1735_v59 = vpop.f32.mrf.mxu0  ;;  %v4197_v10 = vpop.eup %4196  ;;  %4222 = vpow2.f32 %v5285_v27  ;;  %v5407_v28 = vadd.f32 %v1733_v51, %v5156_v4  ;;  %v5410_v44 = vmul.f32 %v4191_v0, %v5188_v37  ;;  %v5413_v12 = vmul.f32 -1.442695, %v5377_v31 }
 0x384   : > { %6169 = vst [vmem:[#allocation59_spill] sm:$0xff] %v5397_v13  ;;  %v4199_v16 = vpop.eup %4198  ;;  %4224 = vpow2.f32 %v5291_v49  ;;  %v1624_v8 = vpop.f32.mrf.mxu1  ;;  %v5416_v43 = vadd.f32 %v1622_v46, %v5159_v6  ;;  %v5419_v49 = vmul.f32 %v4193_v3, %v5191_v38  ;;  %v5423_v51 = vmul.f32 -1.442695, %v5387_v15 }
 0x385   : > { %6170 = vst [vmem:[#allocation60_spill] sm:$0xff] %v5407_v28  ;;  %v1737_v27 = vpop.f32.mrf.mxu0  ;;  %v4201_v29 = vpop.eup %4200  ;;  %4226 = vpow2.f32 %v3499_v50  ;;  %v5426_v25 = vadd.f32 %v1735_v59, %v5162_v42  ;;  %v5429_v31 = vmul.f32 %v4195_v26, %v5197_v41  ;;  %v5432_v46 = vmul.f32 %v4197_v10, %v5200_v40 }
 0x386   : > { %6171 = vst [vmem:[#allocation61_spill] sm:$0xff] %v5416_v43  ;;  %v4203_v21 = vpop.eup %4202  ;;  %4228 = vpow2.f32 %v5316_v48  ;;  %v1626_v37 = vpop.f32.mrf.mxu1  ;;  %v5436_v38 = vmul.f32 -1.442695, %v5397_v13  ;;  %v5439_v48 = vmul.f32 %v4199_v16, %v5204_v60  ;;  %v5443_v59 = vmul.f32 -1.442695, %v5407_v28 }
 0x387   : > { %6172 = vst [vmem:[#allocation62_spill] sm:$0xff] %v5426_v25  ;;  %v1739_v0 = vpop.f32.mrf.mxu0  ;;  %v4205_v50 = vpop.eup %4204  ;;  %4230 = vpow2.f32 %v5322_v34  ;;  %v5446_v41 = vadd.f32 %v1624_v8, %v5153_v54  ;;  %v5449_v34 = vmul.f32 %v4201_v29, %v5207_v19  ;;  %v5453_v13 = vmul.f32 -1.442695, %v5416_v43 }
 0x388   : > { %v4207_v3 = vpop.eup %4206  ;;  %6173 = vst [vmem:[#allocation63_spill] sm:$0xff] %v5439_v48  ;;  %4232 = vpow2.f32 %v5325_v5  ;;  %v1630_v26 = vpop.f32.mrf.mxu1  ;;  %v5456_v60 = vadd.f32 %v1737_v27, %v5156_v4  ;;  %v5460_v16 = vmul.f32 -1.442695, %v5426_v25  ;;  %v5463_v8 = vadd.f32 %v1626_v37, %v5159_v6 }
 0x389   : > { %6174 = vst [vmem:[#allocation64_spill] sm:$0xff] %v5446_v41  ;;  %v1743_v40 = vpop.f32.mrf.mxu0  ;;  %v4209_v10 = vpop.eup %4208  ;;  %6175 = vst [vmem:[#allocation65_spill] sm:$0xff] %v5449_v34  ;;  %4234 = vpow2.f32 %v5332_v1  ;;  %v5469_v43 = vmul.f32 %v4203_v21, %v5213_v9  ;;  %v5476_v15 = vmul.f32 %v4205_v50, %v5216_v30  ;;  %v5483_v21 = vmul.f32 %v4207_v3, %v5220_v11 }
 0x38a   : > { %6176 = vst [vmem:[#allocation66_spill] sm:$0xff] %v5456_v60  ;;  %v4211_v5 = vpop.eup %4210  ;;  %4236 = vpow2.f32 %v5335_v56  ;;  %6177 = vst [vmem:[#allocation67_spill] sm:$0xff] %v5463_v8  ;;  %v5466_v19 = vadd.f32 %v1743_v40, %v5156_v4  ;;  %v1632_v29 = vpop.f32.mrf.mxu1  ;;  %v5473_v56 = vadd.f32 %v1739_v0, %v5162_v42  ;;  %v5480_v40 = vmul.f32 -1.442695, %v5446_v41 }
 0x38b   : > { %v1745_v1 = vpop.f32.mrf.mxu0  ;;  %v4213_v28 = vpop.eup %4212  ;;  %6179 = vst [vmem:[#allocation69_spill] sm:$0xff] %v5469_v43  ;;  %v2196_v27 = vadd.f32 1.0, %v4211_v5  ;;  %4238 = vpow2.f32 %v5341_v57  ;;  %6181 = vst [vmem:[#allocation71_spill] sm:$0xff] %v5476_v15  ;;  %v5486_v0 = vmul.f32 -1.442695, %v5456_v60  ;;  %v5495_v11 = vmul.f32 %v4209_v10, %v5223_v32 }
 0x38c   : > { %6178 = vst [vmem:[#allocation68_spill] sm:$0xff] %v5466_v19  ;;  %6180 = vst [vmem:[#allocation70_spill] sm:$0xff] %v5473_v56  ;;  %v4215_v25 = vpop.eup %4214  ;;  %v2198_v37 = vadd.f32 1.0, %v4213_v28  ;;  %4240 = vpow2.f32 %v5344_v47  ;;  %v1634_v34 = vpop.f32.mrf.mxu1  ;;  %v5489_v28 = vmul.f32 -1.442695, %v5463_v8  ;;  %v5492_v47 = vadd.f32 %v1630_v26, %v5153_v54 }
 0x38d   : > { %v1747_v48 = vpop.f32.mrf.mxu0  ;;  %v4217_v9 = vpop.eup %4216  ;;  %6182 = vst [vmem:[#allocation72_spill] sm:$0xff] %v5483_v21  ;;  %4242 = vrcp.f32 %v2196_v27  ;;  %v2197_v57 = vadd.f32 1.0, %v4215_v25  ;;  %6184 = vst [vmem:[#allocation74_spill] sm:$0xff] %v5495_v11  ;;  %v5498_v3 = vmul.f32 -1.442695, %v5473_v56  ;;  %v5504_v26 = vadd.f32 %v1745_v1, %v5162_v42 }
 0x38e   : > { %v4219_v5 = vpop.eup %4218  ;;  %4244 = vrcp.f32 %v2198_v37  ;;  %v2199_v30 = vadd.f32 1.0, %v4217_v9  ;;  %6183 = vst [vmem:[#allocation73_spill] sm:$0xff] %v5492_v47  ;;  %v1636_v50 = vpop.f32.mrf.mxu1  ;;  %v5501_v9 = vadd.f32 %v1632_v29, %v5159_v6  ;;  %v5507_v10 = vadd.f32 %v1634_v34, %v5153_v54 }
 0x38f   : > { %v1749_v41 = vpop.f32.mrf.mxu0  ;;  %v4221_v15 = vpop.eup %4220  ;;  %4246 = vrcp.f32 %v2197_v57  ;;  %v2200_v25 = vadd.f32 1.0, %v4219_v5  ;;  %6186 = vst [vmem:[#allocation76_spill] sm:$0xff] %v5504_v26  ;;  %v5510_v57 = vadd.f32 %v1747_v48, %v5156_v4  ;;  %v5513_v29 = vmul.f32 -1.442695, %v5492_v47 }
 0x390   : > { %v4223_v27 = vpop.eup %4222  ;;  %4248 = vrcp.f32 %v2199_v30  ;;  %v2202_v37 = vadd.f32 1.0, %v4221_v15  ;;  %6185 = vst [vmem:[#allocation75_spill] sm:$0xff] %v5501_v9  ;;  %v1640_v8 = vpop.f32.mrf.mxu1  ;;  %6187 = vst [vmem:[#allocation77_spill] sm:$0xff] %v5507_v10  ;;  %v5519_v34 = vmul.f32 -1.442695, %v5466_v19  ;;  %v5522_v48 = vadd.f32 %v1636_v50, %v5159_v6 }
 0x391   : > { %v1753_v60 = vpop.f32.mrf.mxu0  ;;  %v4225_v43 = vpop.eup %4224  ;;  %4250 = vrcp.f32 %v2200_v25  ;;  %v2201_v32 = vadd.f32 1.0, %v4223_v27  ;;  %6188 = vst [vmem:[#allocation78_spill] sm:$0xff] %v5510_v57  ;;  %6189 = vst [vmem:[#allocation79_spill] sm:$0xff] %v5513_v29  ;;  %v5534_v50 = vmul.f32 -1.442695, %v5510_v57 }
 0x392   : > { %v4227_v5 = vpop.eup %4226  ;;  %4252 = vrcp.f32 %v2202_v37  ;;  %v2203_v15 = vadd.f32 1.0, %v4225_v43  ;;  %v5516_v1 = vadd.f32 %v1753_v60, %v5156_v4  ;;  %v1642_v30 = vpop.f32.mrf.mxu1  ;;  %6191 = vst [vmem:[#allocation81_spill] sm:$0xff] %v5522_v48  ;;  %v5525_v37 = vmul.f32 -1.442695, %v5501_v9 }
 0x393   : > { %v1755_v56 = vpop.f32.mrf.mxu0  ;;  %v4229_v11 = vpop.eup %4228  ;;  %4254 = vrcp.f32 %v2201_v32  ;;  %v2204_v25 = vadd.f32 1.0, %v4227_v5  ;;  %v5528_v60 = vmul.f32 -1.442695, %v5504_v26  ;;  %v5531_v5 = vmul.f32 -1.442695, %v5507_v10  ;;  %6195 = vst [vmem:[#allocation85_spill] sm:$0xff] %v5534_v50 }
 0x394   : > { %6190 = vst [vmem:[#allocation80_spill] sm:$0xff] %v5516_v1  ;;  %v4231_v27 = vpop.eup %4230  ;;  %4256 = vrcp.f32 %v2203_v15  ;;  %v2206_v43 = vadd.f32 1.0, %v4229_v11  ;;  %6192 = vst [vmem:[#allocation82_spill] sm:$0xff] %v5525_v37  ;;  %v1644_v47 = vpop.f32.mrf.mxu1  ;;  %v5537_v15 = vadd.f32 %v1749_v41, %v5162_v42  ;;  %v5540_v26 = vadd.f32 %v1640_v8, %v5153_v54 }
 0x395   : > { %6193 = vst [vmem:[#allocation83_spill] sm:$0xff] %v5528_v60  ;;  %v1757_v29 = vpop.f32.mrf.mxu0  ;;  %v4233_v21 = vpop.eup %4232  ;;  %4258 = vrcp.f32 %v2204_v25  ;;  %v2205_v32 = vadd.f32 1.0, %v4231_v27  ;;  %6194 = vst [vmem:[#allocation84_spill] sm:$0xff] %v5531_v5  ;;  %v5543_v27 = vmul.f32 -1.442695, %v5522_v48  ;;  %v5546_v57 = vadd.f32 %v1642_v30, %v5159_v6 }
 0x396   : > { %v4235_v19 = vpop.eup %4234  ;;  %4260 = vrcp.f32 %v2206_v43  ;;  %v2207_v11 = vadd.f32 1.0, %v4233_v21  ;;  %6196 = vst [vmem:[#allocation86_spill] sm:$0xff] %v5537_v15  ;;  %6197 = vst [vmem:[#allocation87_spill] sm:$0xff] %v5540_v26  ;;  %v1646_v9 = vpop.f32.mrf.mxu1  ;;  %v5549_v41 = vadd.f32 %v1755_v56, %v5162_v42  ;;  %v5552_v8 = vadd.f32 %v1644_v47, %v5153_v54 }
 0x397   : > { %v1759_v60 = vpop.f32.mrf.mxu0  ;;  %v4237_v37 = vpop.eup %4236  ;;  %4262 = vrcp.f32 %v2205_v32  ;;  %v2208_v25 = vadd.f32 1.0, %v4235_v19  ;;  %6198 = vst [vmem:[#allocation88_spill] sm:$0xff] %v5543_v27  ;;  %6199 = vst [vmem:[#allocation89_spill] sm:$0xff] %v5546_v57  ;;  %v5555_v32 = vadd.f32 %v1757_v29, %v5156_v4  ;;  %v5558_v30 = vadd.f32 %v1646_v9, %v5159_v6 }
 0x398   : > { %v4239_v10 = vpop.eup %4238  ;;  %4264 = vrcp.f32 %v2207_v11  ;;  %v2210_v21 = vadd.f32 1.0, %v4237_v37  ;;  %6200 = vst [vmem:[#allocation90_spill] sm:$0xff] %v5549_v41  ;;  %6201 = vst [vmem:[#allocation91_spill] sm:$0xff] %v5552_v8  ;;  %v1796_v43 = vpop.f32.mrf.mxu1  ;;  %v5561_v56 = vmul.f32 -1.442695, %v5537_v15  ;;  %v5573_v6 = vadd.f32 %v1759_v60, %v5162_v42 }
 0x399   : > { %v1909_v50 = vpop.f32.mrf.mxu0  ;;  %v4241_v5 = vpop.eup %4240  ;;  %4266 = vrcp.f32 %v2208_v25  ;;  %v2209_v19 = vadd.f32 1.0, %v4239_v10  ;;  %6202 = vst [vmem:[#allocation92_spill] sm:$0xff] %v5555_v32  ;;  %6203 = vst [vmem:[#allocation93_spill] sm:$0xff] %v5558_v30  ;;  %v5564_v54 = vmul.f32 -1.442695, %v5540_v26  ;;  %v1797_v25 = vadd.f32 %v1796_v43, %v5233_v62 }
 0x39a   : > { %v4243_v48 = vpop.eup %4242  ;;  %4268 = vrcp.f32 %v2210_v21  ;;  %v2211_v37 = vadd.f32 1.0, %v4241_v5  ;;  %v1798_v47 = vpop.f32.mrf.mxu1  ;;  %v5567_v10 = vmul.f32 -1.442695, %v5516_v1  ;;  %v5570_v4 = vmul.f32 -1.442695, %v5546_v57  ;;  %6204 = vst [vmem:[#allocation94_spill] sm:$0xff] %v5573_v6 }
 0x39b   : > { %v1911_v11 = vpop.f32.mrf.mxu0  ;;  %v4245_v27 = vpop.eup %4244  ;;  %4270 = vrcp.f32 %v2209_v19  ;;  %v5576_v29 = vmul.f32 -1.442695, %v5549_v41  ;;  %v5579_v5 = vmul.f32 -1.442695, %v5552_v8  ;;  %v5584_v57 = vmul.f32 -1.442695, %v5555_v32 }
 0x39c   : > { %v4247_v9 = vpop.eup %4246  ;;  %4272 = vrcp.f32 %v2211_v37  ;;  %v1800_v21 = vpop.f32.mrf.mxu1  ;;  %v5587_v42 = vmul.f32 -1.442695, %v5558_v30  ;;  %v1910_v60 = vadd.f32 %v1909_v50, %v5236_v63  ;;  %v1799_v41 = vadd.f32 %v1798_v47, %v5242_v23 }
 0x39d   : > { %v1913_v19 = vpop.f32.mrf.mxu0  ;;  %v4249_v26 = vpop.eup %4248  ;;  %4274 = vpow2.f32 %v5354_v61  ;;  %v1801_v43 = vadd.f32 %v1800_v21, %v5233_v62  ;;  %v5595_v32 = vmul.f32 %v4243_v48, %v5239_v53  ;;  %v5599_v30 = vmul.f32 -1.442695, %v5573_v6 }
 0x39e   : > { %6205 = vst [vmem:[#allocation95_spill] sm:$0xff] %v5587_v42  ;;  %v4251_v37 = vpop.eup %4250  ;;  %4276 = vpow2.f32 %v5364_v39  ;;  %v1914_v15 = vadd.f32 %v1913_v19, %v5236_v63  ;;  %v1802_v8 = vpop.f32.mrf.mxu1  ;;  %v1912_v50 = vadd.f32 %v1911_v11, %v5248_v55  ;;  %v5604_v47 = vmul.f32 %v5350_v17, %v1797_v25 }
 0x39f   : > { %v1915_v1 = vpop.f32.mrf.mxu0  ;;  %v4253_v61 = vpop.eup %4252  ;;  %4278 = vpow2.f32 %v5374_v24  ;;  %v1803_v21 = vadd.f32 %v1802_v8, %v5242_v23  ;;  %v5609_v24 = vmul.f32 %v4245_v27, %v5245_v22  ;;  %v5612_v6 = vmul.f32 %v4247_v9, %v5251_v36  ;;  %v6206_v9 = vld [vmem:[#allocation40_spill] sm:$0xff] }
 0x3a0   : > { %v4255_v39 = vpop.eup %4254  ;;  %4280 = vpow2.f32 %v5384_v18  ;;  %v1916_v19 = vadd.f32 %v1915_v1, %v5248_v55  ;;  %v1806_v42 = vpop.f32.mrf.mxu1  ;;  %v5616_v18 = vmul.f32 %v5360_v52, %v1910_v60  ;;  %v2437_v8 = vmul.f32 %v5370_v20, %v1799_v41  ;;  %v6207_v41 = vld [vmem:[#allocation41_spill] sm:$0xff] }
 0x3a1   : > { %v1919_v53 = vpop.f32.mrf.mxu0  ;;  %v4257_v48 = vpop.eup %4256  ;;  %4282 = vpow2.f32 %v5394_v35  ;;  %v2440_v1 = vmul.f32 %v5390_v2, %v1801_v43  ;;  %v2442_v11 = vmul.f32 %v5400_v7, %v1914_v15  ;;  %v5623_v36 = vmul.f32 %v4249_v26, %v5254_v33 }
 0x3a2   : > { %v4259_v17 = vpop.eup %4258  ;;  %4284 = vpow2.f32 %v5404_v45  ;;  %v1808_v25 = vpop.f32.mrf.mxu1  ;;  %v5626_v35 = vmul.f32 %v4251_v37, %v5257_v58  ;;  %v2439_v52 = vmul.f32 %v5380_v14, %v1912_v50  ;;  %v5631_v20 = vmul.f32 %v4253_v61, %v6206_v9  ;;  %v6208_v37 = vld [vmem:[#allocation42_spill] sm:$0xff] }
 0x3a3   : > { %v1921_v22 = vpop.f32.mrf.mxu0  ;;  %v4261_v27 = vpop.eup %4260  ;;  %4286 = vpow2.f32 %v5413_v12  ;;  %v2441_v2 = vmul.f32 %v5410_v44, %v1803_v21  ;;  %v2443_v7 = vmul.f32 %v5419_v49, %v1916_v19  ;;  %v5637_v58 = vmul.f32 %v4255_v39, %v6207_v41  ;;  %v6209_v39 = vld [vmem:[#allocation43_spill] sm:$0xff] }
 0x3a4   : > { %v4263_v45 = vpop.eup %4262  ;;  %4288 = vpow2.f32 %v5423_v51  ;;  %v1810_v15 = vpop.f32.mrf.mxu1  ;;  %v1807_v14 = vadd.f32 %v1806_v42, %v5233_v62  ;;  %v1920_v12 = vadd.f32 %v1919_v53, %v5236_v63  ;;  %v5643_v43 = vmul.f32 %v4257_v48, %v6208_v37 }
 0x3a5   : > { %v1923_v33 = vpop.f32.mrf.mxu0  ;;  %v4265_v26 = vpop.eup %4264  ;;  %4290 = vpow2.f32 %v5436_v38  ;;  %v2516_v44 = vpack.c.bf16 %v2440_v1, %v5604_v47  ;;  %v2518_v49 = vpack.c.bf16 %v2442_v11, %v5616_v18  ;;  %v5649_v21 = vmul.f32 %v4259_v17, %v6209_v39  ;;  %v6210_v38 = vld [vmem:[#allocation44_spill] sm:$0xff]  ;;  %v6211_v11 = vld [vmem:[#allocation45_spill] sm:$0xff] }
 0x3a6   : > { %v4267_v60 = vpop.eup %4266  ;;  %4292 = vpow2.f32 %v5443_v59  ;;  %v1812_v51 = vpop.f32.mrf.mxu1  ;;  %v5652_v42 = vmul.f32 %v4261_v27, %v6210_v38  ;;  %v1809_v19 = vadd.f32 %v1808_v25, %v5242_v23  ;;  %v1922_v59 = vadd.f32 %v1921_v22, %v5248_v55  ;;  %v6212_v22 = vld [vmem:[#allocation46_spill] sm:$0xff]  ;;  %v6215_v38 = vld [vmem:[#allocation47_spill] sm:$0xff] }
 0x3a7   : > { %v1925_v61 = vpop.f32.mrf.mxu0  ;;  %v4269_v50 = vpop.eup %4268  ;;  %4294 = vpow2.f32 %v5453_v13  ;;  %v2517_v47 = vpack.c.bf16 %v2441_v2, %v2437_v8  ;;  %v2519_v48 = vpack.c.bf16 %v2443_v7, %v2439_v52  ;;  %v5663_v9 = vmul.f32 %v4263_v45, %v6211_v11  ;;  %v6218_v11 = vld [vmem:[#allocation74_spill] sm:$0xff] }
 0x3a8   : > { %v4271_v53 = vpop.eup %4270  ;;  %4296 = vpow2.f32 %v5460_v16  ;;  %v5658_v18 = vpop.f32.mrf.mxu1  ;;  %v5667_v13 = vmul.f32 %v5429_v31, %v1807_v14  ;;  %v5670_v25 = vmul.f32 %v5432_v46, %v1920_v12  ;;  %v5673_v8 = vmul.f32 %v4265_v26, %v6212_v22  ;;  %v6213_v46 = vld [vmem:[#allocation63_spill] sm:$0xff]  ;;  %v6214_v14 = vld [vmem:[#allocation65_spill] sm:$0xff] }
 0x3a9   : > { %v5660_v1 = vpop.f32.mrf.mxu0  ;;  %v4273_v17 = vpop.eup %4272  ;;  %4298 = vpow2.f32 %v5480_v40  ;;  %2836 = vmatprep.mubr.bf16.mxu1 %v2517_v47  ;;  %2933 = vmatprep.mubr.bf16.mxu0 %v2519_v48  ;;  %v1813_v27 = vadd.f32 %v1812_v51, %v5242_v23  ;;  %v1926_v52 = vadd.f32 %v1925_v61, %v5248_v55  ;;  %v5680_v7 = vmul.f32 %v6213_v46, %v1809_v19  ;;  %v4402_v51 = vld [vmem:[#allocation13 + $0xb8] sm:$0xff]   ;;  %v6216_v47 = vld [vmem:[#allocation48_spill] sm:$0xff] }
 0x3aa   : > { %v4275_v16 = vpop.eup %4274  ;;  %4300 = vpow2.f32 %v5486_v0  ;;  %v1818_v45 = vpop.f32.mrf.mxu1  ;;  %v1811_v26 = vadd.f32 %v1810_v15, %v5233_v62  ;;  %2837 = vmatmul.mubr.bf16.vlgmr.msra.gmra.mxu1 %v2516_v44  ;;  %2934 = vmatmul.mubr.bf16.vlgmr.msra.gmra.mxu0 %v2518_v49  ;;  %v2447_v12 = vmul.f32 %v6214_v14, %v1922_v59  ;;  %v1924_v37 = vadd.f32 %v1923_v33, %v5236_v63  ;;  %v4403_v49 = vld [vmem:[#allocation13 + $0xf0] sm:$0xff]   ;;  %v6217_v48 = vld [vmem:[#allocation72_spill] sm:$0xff]  ;;  %v6219_v14 = vld [vmem:[#allocation49_spill] sm:$0xff] }
 0x3ab   : > { %v1931_v40 = vpop.f32.mrf.mxu0  ;;  %v4277_v2 = vpop.eup %4276  ;;  %v2212_v31 = vadd.f32 1.0, %v4275_v16  ;;  %4302 = vpow2.f32 %v5489_v28  ;;  %3945 = vmatpush3.bf16.msra.mxu1 %v4402_v51  ;;  %v5687_v19 = vmul.f32 %v4267_v60, %v6215_v38  ;;  %v5690_v15 = vmul.f32 %v4269_v50, %v6216_v47  ;;  %v6220_v51 = vld [vmem:[#allocation69_spill] sm:$0xff]  ;;  %v6221_v38 = vld [vmem:[#allocation50_spill] sm:$0xff] }
 0x3ac   : > { %v4279_v0 = vpop.eup %4278  ;;  %v2214_v41 = vadd.f32 1.0, %v4277_v2  ;;  %4304 = vpow2.f32 %v5498_v3  ;;  %v1820_v61 = vpop.f32.mrf.mxu1  ;;  %3938 = vmatprep.subr.bf16.mxu1 %v4403_v49  ;;  %v2449_v33 = vmul.f32 %v6217_v48, %v1813_v27  ;;  %v2451_v16 = vmul.f32 %v6218_v11, %v1926_v52  ;;  %v4404_v49 = vld [vmem:[#allocation13 + $0xb0] sm:$0xff]   ;;  %v4405_v11 = vld [vmem:[#allocation13 + $0xe8] sm:$0xff]  }
 0x3ad   : > { %v1933_v39 = vpop.f32.mrf.mxu0  ;;  %v4281_v28 = vpop.eup %4280  ;;  %4306 = vrcp.f32 %v2212_v31  ;;  %v2213_v44 = vadd.f32 1.0, %v4279_v0  ;;  %v5695_v60 = vmul.f32 %v4271_v53, %v6219_v14  ;;  %v2448_v31 = vmul.f32 %v6220_v51, %v1811_v26 }
 0x3ae   : > { %v4283_v3 = vpop.eup %4282  ;;  %4308 = vrcp.f32 %v2214_v41  ;;  %v2215_v59 = vadd.f32 1.0, %v4281_v28  ;;  %v1822_v22 = vpop.f32.mrf.mxu1  ;;  %v5699_v47 = vmul.f32 %v4273_v17, %v6221_v38  ;;  %v6222_v28 = vld [vmem:[#allocation71_spill] sm:$0xff]  ;;  %v1932_v26 = vadd.f32 %v1931_v40, %v5248_v55 }
 0x3af   : > { %v1935_v2 = vpop.f32.mrf.mxu0  ;;  %v4285_v46 = vpop.eup %4284  ;;  %4310 = vrcp.f32 %v2213_v44  ;;  %v2216_v50 = vadd.f32 1.0, %v4283_v3  ;;  %v2450_v27 = vmul.f32 %v6222_v28, %v1924_v37  ;;  %3946 = vmatpush3.bf16.msra.mxu1 %v4404_v49  ;;  %v1819_v3 = vadd.f32 %v1818_v45, %v5242_v23 }
 0x3b0   : > { %v4287_v0 = vpop.eup %4286  ;;  %4312 = vrcp.f32 %v2215_v59  ;;  %v2218_v41 = vadd.f32 1.0, %v4285_v46  ;;  %v5702_v52 = vpop.f32.mrf.mxu1  ;;  %3939 = vmatprep.subr.bf16.mxu1 %v4405_v11  ;;  %v2521_v37 = vpack.c.bf16 %v2449_v33, %v5680_v7  ;;  %v2523_v46 = vpack.c.bf16 %v2451_v16, %v2447_v12 }
 0x3b1   : > { %v5704_v48 = vpop.f32.mrf.mxu0  ;;  %v4289_v53 = vpop.eup %4288  ;;  %4314 = vrcp.f32 %v2216_v50  ;;  %v2217_v44 = vadd.f32 1.0, %v4287_v0  ;;  %v1823_v0 = vadd.f32 %v1822_v22, %v5242_v23  ;;  %v1936_v45 = vadd.f32 %v1935_v2, %v5248_v55  ;;  %v4406_v2 = vld [vmem:[#allocation13 + $0xa8] sm:$0xff]  }
 0x3b2   : > { %v4291_v17 = vpop.eup %4290  ;;  %4316 = vrcp.f32 %v2218_v41  ;;  %v2219_v59 = vadd.f32 1.0, %v4289_v53  ;;  %v5709_v14 = vpop.f32.mrf.mxu1  ;;  %2844 = vmatprep.mubr.bf16.mxu1 %v2521_v37  ;;  %2941 = vmatprep.mubr.bf16.mxu0 %v2523_v46  ;;  %v2520_v41 = vpack.c.bf16 %v2448_v31, %v5667_v13  ;;  %v2522_v7 = vpack.c.bf16 %v2450_v27, %v5670_v25  ;;  %v4407_v37 = vld [vmem:[#allocation13 + $0xe0] sm:$0xff]  }
 0x3b3   : > { %v5711_v51 = vpop.f32.mrf.mxu0  ;;  %v4293_v38 = vpop.eup %4292  ;;  %4318 = vrcp.f32 %v2217_v44  ;;  %v2220_v50 = vadd.f32 1.0, %v4291_v17  ;;  %v1821_v53 = vadd.f32 %v1820_v61, %v5233_v62  ;;  %v1934_v22 = vadd.f32 %v1933_v39, %v5236_v63  ;;  %3947 = vmatpush3.bf16.msra.mxu1 %v4406_v2 }
 0x3b4   : > { %v4295_v40 = vpop.eup %4294  ;;  %4320 = vrcp.f32 %v2219_v59  ;;  %v2222_v28 = vadd.f32 1.0, %v4293_v38  ;;  %v1830_v12 = vpop.f32.mrf.mxu1  ;;  %v1817_v13 = vadd.f32 %v5658_v18, %v5233_v62  ;;  %v1930_v25 = vadd.f32 %v5660_v1, %v5236_v63  ;;  %2845 = vmatmul.mubr.bf16.gmra.mxu1 %v2520_v41  ;;  %2942 = vmatmul.mubr.bf16.gmra.mxu0 %v2522_v7 }
 0x3b5   : > { %v5717_v33 = vpop.f32.mrf.mxu0  ;;  %v4297_v16 = vpop.eup %4296  ;;  %4322 = vrcp.f32 %v2220_v50  ;;  %v2221_v49 = vadd.f32 1.0, %v4295_v40  ;;  %v2457_v39 = vmul.f32 %v5637_v58, %v1823_v0  ;;  %v2459_v59 = vmul.f32 %v5643_v43, %v1936_v45  ;;  %3940 = vmatprep.subr.bf16.mxu1 %v4407_v37  ;;  %v4408_v0 = vld [vmem:[#allocation13 + $0xa0] sm:$0xff]  }
 0x3b6   : > { %v4299_v44 = vpop.eup %4298  ;;  %4324 = vrcp.f32 %v2222_v28  ;;  %v2223_v11 = vadd.f32 1.0, %v4297_v16  ;;  %v1832_v31 = vpop.f32.mrf.mxu1  ;;  %v2453_v18 = vmul.f32 %v5612_v6, %v1819_v3  ;;  %v2455_v1 = vmul.f32 %v5623_v36, %v1932_v26  ;;  %v4409_v16 = vld [vmem:[#allocation13 + $0xd8] sm:$0xff]  }
 0x3b7   : > { %v1945_v27 = vpop.f32.mrf.mxu0  ;;  %v4301_v17 = vpop.eup %4300  ;;  %4326 = vrcp.f32 %v2221_v49  ;;  %v2224_v61 = vadd.f32 1.0, %v4299_v44  ;;  %v2456_v58 = vmul.f32 %v5626_v35, %v1821_v53  ;;  %v2458_v43 = vmul.f32 %v5631_v20, %v1934_v22  ;;  %3948 = vmatpush3.bf16.msra.mxu1 %v4408_v0 }
 0x3b8   : > { %v4303_v46 = vpop.eup %4302  ;;  %4328 = vrcp.f32 %v2223_v11  ;;  %v2226_v38 = vadd.f32 1.0, %v4301_v17  ;;  %v5729_v50 = vpop.f32.mrf.mxu1  ;;  %v1827_v6 = vadd.f32 %v5702_v52, %v5233_v62  ;;  %v1940_v36 = vadd.f32 %v5704_v48, %v5236_v63  ;;  %3941 = vmatprep.subr.bf16.mxu1 %v4409_v16 }
 0x3b9   : > { %v5731_v40 = vpop.f32.mrf.mxu0  ;;  %v4305_v28 = vpop.eup %4304  ;;  %4330 = vrcp.f32 %v2224_v61  ;;  %v2225_v41 = vadd.f32 1.0, %v4303_v46  ;;  %v1829_v20 = vadd.f32 %v5709_v14, %v5242_v23  ;;  %v2525_v49 = vpack.c.bf16 %v2457_v39, %v2453_v18  ;;  %v6223_v61 = vld [vmem:[#allocation79_spill] sm:$0xff] }
 0x3ba   : > { %v4307_v45 = vpop.eup %4306  ;;  %4332 = vrcp.f32 %v2226_v38  ;;  %v2227_v7 = vadd.f32 1.0, %v4305_v28  ;;  %v5739_v3 = vpop.f32.mrf.mxu1  ;;  %v2527_v53 = vpack.c.bf16 %v2459_v59, %v2455_v1  ;;  %v2452_v52 = vmul.f32 %v5595_v32, %v1817_v13  ;;  %v4410_v46 = vld [vmem:[#allocation13 + $0x98] sm:$0xff]   ;;  %v6224_v38 = vld [vmem:[#allocation82_spill] sm:$0xff] }
 0x3bb   : > { %v5741_v26 = vpop.f32.mrf.mxu0  ;;  %v4309_v35 = vpop.eup %4308  ;;  %4334 = vrcp.f32 %v2225_v41  ;;  %v2454_v2 = vmul.f32 %v5609_v24, %v1930_v25  ;;  %v1942_v48 = vadd.f32 %v5711_v51, %v5248_v55  ;;  %v1831_v14 = vadd.f32 %v1830_v12, %v5233_v62  ;;  %2852 = vmatprep.mubr.bf16.mxu1 %v2525_v49  ;;  %3949 = vmatpush3.bf16.msra.mxu1 %v4410_v46  ;;  %v6225_v1 = vld [vmem:[#allocation51_spill] sm:$0xff]  ;;  %v6226_v41 = vld [vmem:[#allocation52_spill] sm:$0xff] }
 0x3bc   : > { %v4311_v22 = vpop.eup %4310  ;;  %4336 = vrcp.f32 %v2227_v7  ;;  %v5749_v44 = vpop.f32.mrf.mxu1  ;;  %2949 = vmatprep.mubr.bf16.mxu0 %v2527_v53  ;;  %v1833_v39 = vadd.f32 %v1832_v31, %v5242_v23  ;;  %v1946_v32 = vadd.f32 %v1945_v27, %v5248_v55  ;;  %v1944_v24 = vadd.f32 %v5717_v33, %v5236_v63  ;;  %v4411_v33 = vld [vmem:[#allocation13 + $0xd0] sm:$0xff]  }
 0x3bd   : > { %v5751_v11 = vpop.f32.mrf.mxu0  ;;  %v4313_v17 = vpop.eup %4312  ;;  %4338 = vpow2.f32 %v6223_v61  ;;  %v2524_v51 = vpack.c.bf16 %v2456_v58, %v2452_v52  ;;  %v2526_v25 = vpack.c.bf16 %v2458_v43, %v2454_v2  ;;  %v5766_v31 = vmul.f32 %v5649_v21, %v1827_v6  ;;  %3942 = vmatprep.subr.bf16.mxu1 %v4411_v33  ;;  %v6227_v43 = vld [vmem:[#allocation83_spill] sm:$0xff]  ;;  %v6228_v6 = vld [vmem:[#allocation84_spill] sm:$0xff] }
 0x3be   : > { %v4315_v13 = vpop.eup %4314  ;;  %4340 = vpow2.f32 %v5519_v34  ;;  %v5760_v59 = vpop.f32.mrf.mxu1  ;;  %v5769_v27 = vmul.f32 %v5652_v42, %v1940_v36  ;;  %v2461_v34 = vmul.f32 %v5663_v9, %v1829_v20  ;;  %v2404_v28 = vmul.f32 %v4307_v45, %v6225_v1  ;;  %v6232_v61 = vld [vmem:[#allocation55_spill] sm:$0xff] }
 0x3bf   : > { %v5762_v37 = vpop.f32.mrf.mxu0  ;;  %v4317_v12 = vpop.eup %4316  ;;  %4342 = vpow2.f32 %v6224_v38  ;;  %v2406_v58 = vmul.f32 %v4309_v35, %v6226_v41  ;;  %v2463_v0 = vmul.f32 %v5673_v8, %v1942_v48  ;;  %2853 = vmatmul.mubr.bf16.gmra.mxu1 %v2524_v51  ;;  %2950 = vmatmul.mubr.bf16.gmra.mxu0 %v2526_v25  ;;  %v5782_v9 = vmul.f32 %v5687_v19, %v1831_v14  ;;  %v6229_v35 = vld [vmem:[#allocation53_spill] sm:$0xff]  ;;  %v4412_v19 = vld [vmem:[#allocation13 + $0x90] sm:$0xff]  }
 0x3c0   : > { %v4319_v18 = vpop.eup %4318  ;;  %4344 = vpow2.f32 %v6227_v43  ;;  %v5776_v21 = vpop.f32.mrf.mxu1  ;;  %v2465_v45 = vmul.f32 %v5695_v60, %v1833_v39  ;;  %v2467_v36 = vmul.f32 %v5699_v47, %v1946_v32  ;;  %v2405_v20 = vmul.f32 %v4311_v22, %v6229_v35  ;;  %v6230_v8 = vld [vmem:[#allocation85_spill] sm:$0xff]  ;;  %3950 = vmatpush3.bf16.msra.mxu1 %v4412_v19  ;;  %v6231_v60 = vld [vmem:[#allocation54_spill] sm:$0xff]  ;;  %v6233_v22 = vld [vmem:[#allocation88_spill] sm:$0xff] }
 0x3c1   : > { %v5778_v7 = vpop.f32.mrf.mxu0  ;;  %v4321_v42 = vpop.eup %4320  ;;  %4346 = vpow2.f32 %v6228_v6  ;;  %v2466_v49 = vmul.f32 %v5690_v15, %v1944_v24  ;;  %v1837_v53 = vadd.f32 %v5729_v50, %v5233_v62  ;;  %v2407_v47 = vmul.f32 %v4313_v17, %v6231_v60  ;;  %v4413_v39 = vld [vmem:[#allocation13 + $0xc8] sm:$0xff]   ;;  %v6234_v32 = vld [vmem:[#allocation56_spill] sm:$0xff]  ;;  %v6236_v41 = vld [vmem:[#allocation58_spill] sm:$0xff] }
 0x3c2   : > { %v4323_v16 = vpop.eup %4322  ;;  %4348 = vpow2.f32 %v6230_v8  ;;  %v5791_v52 = vpop.f32.mrf.mxu1  ;;  %v2408_v14 = vmul.f32 %v4315_v13, %v6232_v61  ;;  %v1950_v15 = vadd.f32 %v5731_v40, %v5236_v63  ;;  %3943 = vmatprep.subr.bf16.mxu1 %v4413_v39  ;;  %v2410_v24 = vmul.f32 %v4317_v12, %v6234_v32  ;;  %v6235_v51 = vld [vmem:[#allocation57_spill] sm:$0xff]  ;;  %v6239_v19 = vld [vmem:[#allocation62_spill] sm:$0xff] }
 0x3c3   : > { %v5793_v2 = vpop.f32.mrf.mxu0  ;;  %v5795_v48 = vpop.eup %4324  ;;  %4350 = vpow2.f32 %v6233_v22  ;;  %v2409_v25 = vmul.f32 %v4319_v18, %v6235_v51  ;;  %v1839_v46 = vadd.f32 %v5739_v3, %v5242_v23  ;;  %v1952_v40 = vadd.f32 %v5741_v26, %v5248_v55  ;;  %v4414_v6 = vld [vmem:[#allocation13 + $0x88] sm:$0xff]   ;;  %v6241_v22 = vld [vmem:[#allocation64_spill] sm:$0xff]  ;;  %v6242_v32 = vld [vmem:[#allocation66_spill] sm:$0xff] }
 0x3c4   : > { %v4327_v50 = vpop.eup %4326  ;;  %4352 = vpow2.f32 %v5561_v56  ;;  %v5807_v17 = vpop.f32.mrf.mxu1  ;;  %v2529_v33 = vpack.c.bf16 %v2465_v45, %v2461_v34  ;;  %v2531_v1 = vpack.c.bf16 %v2467_v36, %v2463_v0  ;;  %v2411_v18 = vmul.f32 %v4321_v42, %v6236_v41  ;;  %3951 = vmatpush3.bf16.msra.mxu1 %v4414_v6  ;;  %v4415_v45 = vld [vmem:[#allocation13 + $0xc0] sm:$0xff]   ;;  %v6237_v36 = vld [vmem:[#allocation59_spill] sm:$0xff] }
 0x3c5   : > { %v5809_v13 = vpop.f32.mrf.mxu0  ;;  %v4329_v38 = vpop.eup %4328  ;;  %4354 = vpow2.f32 %v5564_v54  ;;  %v5816_v56 = vmul.f32 %v2404_v28, %v1837_v53  ;;  %v1841_v3 = vadd.f32 %v5749_v44, %v5233_v62  ;;  %v5823_v26 = vmul.f32 %v2406_v58, %v1950_v15  ;;  %3944 = vmatprep.subr.bf16.mxu1 %v4415_v45  ;;  %v6238_v53 = vld [vmem:[#allocation61_spill] sm:$0xff] }
 0x3c6   : > { %v4331_v12 = vpop.eup %4330  ;;  %4356 = vpow2.f32 %v5567_v10  ;;  %v5820_v43 = vpop.f32.mrf.mxu1  ;;  %2860 = vmatprep.mubr.bf16.mxu1 %v2529_v33  ;;  %2957 = vmatprep.mubr.bf16.mxu0 %v2531_v1  ;;  %v1843_v34 = vadd.f32 %v5760_v59, %v5242_v23  ;;  %v1956_v10 = vadd.f32 %v5762_v37, %v5248_v55  ;;  %v1954_v0 = vadd.f32 %v5751_v11, %v5236_v63  ;;  %v6244_v33 = vld [vmem:[#allocation70_spill] sm:$0xff] }
 0x3c7   : > { %v4333_v54 = vpop.eup %4332  ;;  %4358 = vpow2.f32 %v5570_v4  ;;  %v5829_v28 = vpop.f32.mrf.mxu0  ;;  %v2528_v4 = vpack.c.bf16 %v5782_v9, %v5766_v31  ;;  %v2530_v58 = vpack.c.bf16 %v2466_v49, %v5769_v27  ;;  %v5840_v37 = vmul.f32 %v4323_v16, %v6237_v36  ;;  %v6240_v16 = vld [vmem:[#allocation95_spill] sm:$0xff] }
 0x3c8   : > { %v4335_v44 = vpop.eup %4334  ;;  %4360 = vpow2.f32 %v5576_v29  ;;  %v5837_v42 = vpop.f32.mrf.mxu1  ;;  %v2469_v35 = vmul.f32 %v2405_v20, %v1839_v46  ;;  %v2471_v29 = vmul.f32 %v2407_v47, %v1952_v40  ;;  %v5844_v11 = vmul.f32 %v4327_v50, %v6238_v53  ;;  %v4416_v47 = vld [vmem:[#allocation13 + $0x80] sm:$0xff]   ;;  %v6243_v46 = vld [vmem:[#allocation67_spill] sm:$0xff] }
 0x3c9   : > { %v4337_v59 = vpop.eup %4336  ;;  %4362 = vpow2.f32 %v5579_v5  ;;  %v5847_v31 = vmul.f32 %v4329_v38, %v6239_v19  ;;  %v2472_v27 = vmul.f32 %v2408_v14, %v1841_v3  ;;  %2861 = vmatmul.mubr.bf16.gmra.mxu1 %v2528_v4  ;;  %2958 = vmatmul.mubr.bf16.gmra.mxu0 %v2530_v58  ;;  %v2473_v60 = vmul.f32 %v2409_v25, %v1843_v34  ;;  %v5851_v20 = vpop.f32.mrf.mxu0 }
 0x3ca   : > { %v4339_v8 = vpop.eup %4338  ;;  %4364 = vpow2.f32 %v5584_v57  ;;  %v2475_v5 = vmul.f32 %v2411_v18, %v1956_v10  ;;  %3952 = vmatpush3.bf16.msra.mxu1 %v4416_v47  ;;  %v2416_v15 = vmul.f32 %v4331_v12, %v6241_v22  ;;  %v2474_v57 = vmul.f32 %v2410_v24, %v1954_v0  ;;  %v5855_v14 = vpop.f32.mrf.mxu1  ;;  %v6245_v47 = vld [vmem:[#allocation60_spill] sm:$0xff] }
 0x3cb   : > { %v4341_v9 = vpop.eup %4340  ;;  %v2228_v49 = vadd.f32 1.0, %v4339_v8  ;;  %4366 = vpow2.f32 %v6240_v16  ;;  %v2418_v51 = vmul.f32 %v4333_v54, %v6242_v32  ;;  %v2417_v38 = vmul.f32 %v4335_v44, %v6243_v46  ;;  %v5864_v54 = vpop.f32.mrf.mxu0 }
 0x3cc   : > { %v4343_v61 = vpop.eup %4342  ;;  %v2230_v39 = vadd.f32 1.0, %v4341_v9  ;;  %4368 = vpow2.f32 %v5599_v30  ;;  %v2419_v1 = vmul.f32 %v4337_v59, %v6244_v33  ;;  %v1849_v12 = vadd.f32 %v5791_v52, %v5242_v23  ;;  %v5870_v52 = vpop.f32.mrf.mxu1 }
 0x3cd   : > { %v4345_v50 = vpop.eup %4344  ;;  %4370 = vrcp.f32 %v2228_v49  ;;  %v2229_v25 = vadd.f32 1.0, %v4343_v61  ;;  %v1962_v30 = vadd.f32 %v5793_v2, %v5248_v55  ;;  %v2533_v3 = vpack.c.bf16 %v2473_v60, %v2469_v35  ;;  %v1973_v19 = vpop.f32.mrf.mxu0 }
 0x3ce   : > { %v4347_v40 = vpop.eup %4346  ;;  %4372 = vrcp.f32 %v2230_v39  ;;  %v2231_v41 = vadd.f32 1.0, %v4345_v50  ;;  %v2535_v6 = vpack.c.bf16 %v2475_v5, %v2471_v29  ;;  %v1851_v44 = vadd.f32 %v5807_v17, %v5233_v62 }
 0x3cf   : > { %v4349_v24 = vpop.eup %4348  ;;  %v2232_v18 = vadd.f32 1.0, %v4347_v40  ;;  %4374 = vrcp.f32 %v2229_v25  ;;  %v1964_v0 = vadd.f32 %v5809_v13, %v5236_v63  ;;  %2868 = vmatprep.mubr.bf16.mxu1 %v2533_v3  ;;  %v1853_v58 = vadd.f32 %v5820_v43, %v5242_v23  ;;  %v5886_v32 = vpop.f32.mrf.mxu0 }
 0x3d0   : > { %v4351_v34 = vpop.eup %4350  ;;  %v2234_v10 = vadd.f32 1.0, %v4349_v24  ;;  %2965 = vmatprep.mubr.bf16.mxu0 %v2535_v6  ;;  %v1966_v45 = vadd.f32 %v5829_v28, %v5248_v55  ;;  %v2532_v17 = vpack.c.bf16 %v2472_v27, %v5816_v56  ;;  %v2534_v13 = vpack.c.bf16 %v2474_v57, %v5823_v26  ;;  %v1862_v56 = vpop.f32.mrf.mxu1 }
 0x3d1   : > { %v4353_v4 = vpop.eup %4352  ;;  %4376 = vrcp.f32 %v2232_v18  ;;  %v2233_v2 = vadd.f32 1.0, %v4351_v34  ;;  %v2481_v8 = vmul.f32 %v2417_v38, %v1853_v58  ;;  %v1847_v43 = vadd.f32 %v5776_v21, %v5233_v62  ;;  %v6246_v58 = vld [vmem:[#allocation68_spill] sm:$0xff] }
 0x3d2   : > { %v4355_v59 = vpop.eup %4354  ;;  %4378 = vrcp.f32 %v2234_v10  ;;  %v2235_v36 = vadd.f32 1.0, %v4353_v4  ;;  %v2483_v53 = vmul.f32 %v2419_v1, %v1966_v45  ;;  %v1960_v28 = vadd.f32 %v5778_v7, %v5236_v63  ;;  %2869 = vmatmul.mubr.bf16.gmra.mxu1 %v2532_v17  ;;  %2966 = vmatmul.mubr.bf16.gmra.mxu0 %v2534_v13  ;;  %v5889_v25 = vpop.f32.mrf.mxu1 }
 0x3d3   : > { %v4357_v35 = vpop.eup %4356  ;;  %4380 = vrcp.f32 %v2233_v2  ;;  %v2236_v29 = vadd.f32 1.0, %v4355_v59  ;;  %v2477_v16 = vmul.f32 %v5844_v11, %v1849_v12  ;;  %v2479_v60 = vmul.f32 %v5847_v31, %v1962_v30  ;;  %v1979_v12 = vpop.f32.mrf.mxu0  ;;  %v6247_v59 = vld [vmem:[#allocation77_spill] sm:$0xff] }
 0x3d4   : > { %v4359_v9 = vpop.eup %4358  ;;  %4382 = vrcp.f32 %v2231_v41  ;;  %v2238_v49 = vadd.f32 1.0, %v4357_v35  ;;  %v2414_v61 = vmul.f32 %v5795_v48, %v6245_v47  ;;  %v2480_v22 = vmul.f32 %v2416_v15, %v1851_v44  ;;  %v1868_v30 = vpop.f32.mrf.mxu1 }
 0x3d5   : > { %v4361_v27 = vpop.eup %4360  ;;  %4384 = vrcp.f32 %v2235_v36  ;;  %v2237_v26 = vadd.f32 1.0, %v4359_v9  ;;  %v2482_v21 = vmul.f32 %v2418_v51, %v1964_v0  ;;  %v2537_v57 = vpack.c.bf16 %v2481_v8, %v2477_v16  ;;  %v5899_v4 = vpop.f32.mrf.mxu0  ;;  %v6251_v9 = vld [vmem:[#allocation73_spill] sm:$0xff] }
 0x3d6   : > { %v4363_v5 = vpop.eup %4362  ;;  %4386 = vrcp.f32 %v2236_v29  ;;  %v2539_v50 = vpack.c.bf16 %v2483_v53, %v2479_v60  ;;  %v2476_v11 = vmul.f32 %v5840_v37, %v1847_v43  ;;  %v2478_v31 = vmul.f32 %v2414_v61, %v1960_v28  ;;  %v1870_v13 = vpop.f32.mrf.mxu1  ;;  %v6249_v29 = vld [vmem:[#allocation75_spill] sm:$0xff]  ;;  %v6250_v53 = vld [vmem:[#allocation81_spill] sm:$0xff] }
 0x3d7   : > { %v4365_v39 = vpop.eup %4364  ;;  %4388 = vrcp.f32 %v2238_v49  ;;  %v2240_v7 = vadd.f32 1.0, %v4363_v5  ;;  %2876 = vmatprep.mubr.bf16.mxu1 %v2537_v57  ;;  %v1970_v18 = vadd.f32 %v5851_v20, %v5236_v63  ;;  %v1861_v3 = vadd.f32 %v5870_v52, %v5233_v62  ;;  %v6248_v20 = vld [vmem:[#allocation78_spill] sm:$0xff]  ;;  %v1983_v60 = vpop.f32.mrf.mxu0 }
 0x3d8   : > { %v4367_v46 = vpop.eup %4366  ;;  %4390 = vrcp.f32 %v2237_v26  ;;  %v2242_v38 = vadd.f32 1.0, %v4365_v39  ;;  %2973 = vmatprep.mubr.bf16.mxu0 %v2539_v50  ;;  %v2536_v51 = vpack.c.bf16 %v2480_v22, %v2476_v11  ;;  %v2538_v33 = vpack.c.bf16 %v2482_v21, %v2478_v31  ;;  %v1872_v61 = vpop.f32.mrf.mxu1 }
 0x3d9   : > { %v4369_v40 = vpop.eup %4368  ;;  %4392 = vrcp.f32 %v2240_v7  ;;  %v2241_v48 = vadd.f32 1.0, %v4367_v46  ;;  %v1974_v6 = vadd.f32 %v1973_v19, %v5236_v63  ;;  %v2239_v10 = vadd.f32 1.0, %v4361_v27 }
 0x3da   : > { %v4371_v15 = vpop.eup %4370  ;;  %4394 = vrcp.f32 %v2242_v38  ;;  %2877 = vmatmul.mubr.bf16.gmra.mxu1 %v2536_v51  ;;  %2974 = vmatmul.mubr.bf16.gmra.mxu0 %v2538_v33  ;;  %v2243_v37 = vadd.f32 1.0, %v4369_v40  ;;  %v1859_v44 = vadd.f32 %v5855_v14, %v5242_v23  ;;  %v1863_v0 = vadd.f32 %v1862_v56, %v5242_v23  ;;  %v6253_v33 = vld [vmem:[#allocation91_spill] sm:$0xff] }
 0x3db   : > { %v4373_v1 = vpop.eup %4372  ;;  %4396 = vrcp.f32 %v2241_v48  ;;  %v1857_v52 = vadd.f32 %v5837_v42, %v5233_v62  ;;  %v2420_v49 = vmul.f32 %v4371_v15, %v6251_v9  ;;  %v1980_v7 = vadd.f32 %v1979_v12, %v5236_v63  ;;  %v6252_v15 = vld [vmem:[#allocation80_spill] sm:$0xff]  ;;  %v6261_v9 = vld [vmem:[#allocation90_spill] sm:$0xff] }
 0x3dc   : > { %v4375_v24 = vpop.eup %4374  ;;  %v2422_v45 = vmul.f32 %v4373_v1, %v6246_v58  ;;  %4398 = vrcp.f32 %v2243_v37  ;;  %v1871_v57 = vadd.f32 %v1870_v13, %v5233_v62  ;;  %v1984_v50 = vadd.f32 %v1983_v60, %v5236_v63  ;;  %v6254_v12 = vld [vmem:[#allocation92_spill] sm:$0xff]  ;;  %v6255_v37 = vld [vmem:[#allocation86_spill] sm:$0xff] }
 0x3dd   : > { %v2421_v8 = vmul.f32 %v4375_v24, %v6249_v29  ;;  %4400 = vrcp.f32 %v2239_v10  ;;  %v2484_v42 = vmul.f32 %v2420_v49, %v1857_v52  ;;  %v1976_v11 = vadd.f32 %v5886_v32, %v5248_v55 }
 0x3de   : > { %v4377_v41 = vpop.eup %4376  ;;  %v2486_v43 = vmul.f32 %v2422_v45, %v1970_v18  ;;  %v1869_v31 = vadd.f32 %v1868_v30, %v5242_v23  ;;  %v1873_v40 = vadd.f32 %v1872_v61, %v5242_v23  ;;  %v1867_v63 = vadd.f32 %v5889_v25, %v5233_v62  ;;  %v6256_v18 = vld [vmem:[#allocation89_spill] sm:$0xff] }
 0x3df   : > { %v4379_v34 = vpop.eup %4378  ;;  %v2424_v36 = vmul.f32 %v4377_v41, %v6247_v59  ;;  %v2485_v26 = vmul.f32 %v2421_v8, %v1859_v44  ;;  %v1972_v23 = vadd.f32 %v5864_v54, %v5248_v55 }
 0x3e0   : > { %v4381_v2 = vpop.eup %4380  ;;  %v2426_v17 = vmul.f32 %v4379_v34, %v6248_v20 }
 0x3e1   : > { %v4383_v35 = vpop.eup %4382  ;;  %v2425_v14 = vmul.f32 %v4381_v2, %v6250_v53  ;;  %v2488_v28 = vmul.f32 %v2424_v36, %v1861_v3  ;;  %v6257_v3 = vld [vmem:[#allocation93_spill] sm:$0xff]  ;;  %v6259_v2 = vld [vmem:[#allocation76_spill] sm:$0xff]  ;;  %v1985_v36 = vpop.f32.mrf.mxu0 }
 0x3e2   : > { %v4385_v19 = vpop.eup %4384  ;;  %v2490_v56 = vmul.f32 %v2426_v17, %v1974_v6  ;;  %v6258_v6 = vld [vmem:[#allocation87_spill] sm:$0xff]  ;;  %v2423_v58 = vmul.f32 %v4383_v35, %v6259_v2  ;;  %v1986_v8 = vadd.f32 %v1985_v36, %v5248_v55  ;;  %v1982_v35 = vadd.f32 %v5899_v4, %v5248_v55 }
 0x3e3   : > { %v4387_v27 = vpop.eup %4386  ;;  %v2489_v16 = vmul.f32 %v2425_v14, %v1863_v0  ;;  %v2540_v46 = vpack.c.bf16 %v2488_v28, %v2484_v42  ;;  %v2427_v41 = vmul.f32 %v4385_v19, %v6255_v37  ;;  %v6260_v14 = vld [vmem:[#allocation94_spill] sm:$0xff] }
 0x3e4   : > { %v4389_v5 = vpop.eup %4388  ;;  %v2542_v47 = vpack.c.bf16 %v2490_v56, %v2486_v43  ;;  %v2428_v34 = vmul.f32 %v4387_v27, %v6258_v6  ;;  %v2487_v17 = vmul.f32 %v2423_v58, %v1972_v23  ;;  %v6264_v23 = vld [vmem:[#allocation24_spill] sm:$0xff] }
 0x3e5   : > { %v4391_v22 = vpop.eup %4390  ;;  %v2541_v21 = vpack.c.bf16 %v2489_v16, %v2485_v26  ;;  %v2430_v51 = vmul.f32 %v4389_v5, %v6252_v15  ;;  %v2491_v45 = vmul.f32 %v2427_v41, %v1976_v11 }
 0x3e6   : > { %v4393_v39 = vpop.eup %4392  ;;  %v2429_v32 = vmul.f32 %v4391_v22, %v6256_v18  ;;  %v2492_v25 = vmul.f32 %v2428_v34, %v1867_v63 }
 0x3e7   : > { %v4395_v38 = vpop.eup %4394  ;;  %2884 = vmatprep.mubr.bf16.mxu1 %v2541_v21  ;;  %v2432_v1 = vmul.f32 %v4393_v39, %v6253_v33  ;;  %v2494_v10 = vmul.f32 %v2430_v51, %v1980_v7  ;;  %v2543_v54 = vpack.c.bf16 %v2491_v45, %v2487_v17 }
 0x3e8   : > { %v4397_v48 = vpop.eup %4396  ;;  %v2434_v24 = vmul.f32 %v4395_v38, %v6254_v12  ;;  %2885 = vmatmul.mubr.bf16.gmra.mxu1 %v2540_v46  ;;  %v2493_v59 = vmul.f32 %v2429_v32, %v1869_v31  ;;  %v6263_v38 = vld [vmem:[#allocation27_spill] sm:$0xff] }
 0x3e9   : > { %v2433_v30 = vmul.f32 %v4397_v48, %v6257_v3  ;;  %v2496_v44 = vmul.f32 %v2432_v1, %v1871_v57  ;;  %v4399_v13 = vpop.eup %4398  ;;  %v6262_v57 = vld [vmem:[#allocation25_spill] sm:$0xff] }
 0x3ea   : > { %v2498_v0 = vmul.f32 %v2434_v24, %v1984_v50  ;;  %v4401_v53 = vpop.eup %4400  ;;  %v2435_v19 = vmul.f32 %v4399_v13, %v6260_v14  ;;  %v6266_v14 = vld [vmem:[#allocation28_spill] sm:$0xff] }
 0x3eb   : > { %v2497_v62 = vmul.f32 %v2433_v30, %v1873_v40  ;;  %v2544_v29 = vpack.c.bf16 %v2496_v44, %v2492_v25  ;;  %v2431_v49 = vmul.f32 %v4401_v53, %v6261_v9 }
 0x3ec   : > { %v2546_v20 = vpack.c.bf16 %v2498_v0, %v2494_v10  ;;  %v2499_v43 = vmul.f32 %v2435_v19, %v1986_v8  ;;  %v6265_v0 = vld [vmem:[#allocation26_spill] sm:$0xff] }
 0x3ed   : > { %v2545_v52 = vpack.c.bf16 %v2497_v62, %v2493_v59  ;;  %v2495_v28 = vmul.f32 %v2431_v49, %v1982_v35 }
 0x3ef   : > { %2892 = vmatprep.mubr.bf16.mxu1 %v2545_v52  ;;  %v2547_v56 = vpack.c.bf16 %v2499_v43, %v2495_v28  ;;  %v6267_v43 = vld [vmem:[#allocation30_spill] sm:$0xff] }
 0x3f0   : > { %2893 = vmatmul.mubr.bf16.gmra.mxu1 %v2544_v29 }
 0x3f1   : > { %2981 = vmatprep.mubr.bf16.mxu1 %v2543_v54 }
 0x3f8   : > { %2982 = vmatmul.mubr.bf16.vlgmr.msra.gmra.mxu1 %v2542_v47  ;;  %v5937_v47 = vld [vmem:[%s6042_s7] ss:$0 sm:$0xff] }
 0x3f9   : > { %2989 = vmatprep.mubr.bf16.mxu1 %v2547_v56 }
 0x400   : > { %2990 = vmatmul.mubr.bf16.gmra.mxu1 %v2546_v20 }
 0x46a   : > { %v3793_v27 = vpop.f32.mrf.mxu1  ;;  %v3857_v26 = vpop.f32.mrf.mxu0 }
 0x46c   : > { %v3794_v16 = vpop.f32.mrf.mxu1  ;;  %v3858_v60 = vpop.f32.mrf.mxu0 }
 0x46d   : > { %v3795_v5 = vadd.f32 %v3794_v16, %v3793_v27  ;;  %v3859_v42 = vadd.f32 %v3858_v60, %v3857_v26 }
 0x46e   : > { %v3796_v61 = vpop.f32.mrf.mxu1  ;;  %v3860_v22 = vpop.f32.mrf.mxu0 }
 0x46f   : > { %v2936_v21 = vadd.f32 %v3859_v42, %v3795_v5 }
 0x470   : > { %v3797_v39 = vpop.f32.mrf.mxu1  ;;  %v3861_v55 = vpop.f32.mrf.mxu0 }
 0x471   : > { %v3798_v4 = vadd.f32 %v3797_v39, %v3796_v61  ;;  %v3862_v7 = vadd.f32 %v3861_v55, %v3860_v22  ;;  %v3065_v50 = vadd.f32 %v2936_v21, %v6262_v57  ;;  %v6268_v57 = vld [vmem:[#allocation29_spill] sm:$0xff] }
 0x473   : > { %v2939_v46 = vadd.f32 %v3862_v7, %v3798_v4  ;;  %v3088_v48 = vadd.f32 %v5937_v47, %v3065_v50 }
 0x474   : > { %v3799_v31 = vpop.f32.mrf.mxu1  ;;  %v3863_v40 = vpop.f32.mrf.mxu0 }
 0x475   : > { %v3066_v11 = vadd.f32 %v2939_v46, %v6263_v38 }
 0x476   : > { %v3800_v51 = vpop.f32.mrf.mxu1  ;;  %v3864_v33 = vpop.f32.mrf.mxu0 }
 0x477   : > { %v3089_v15 = vadd.f32 %v5937_v47, %v3066_v11  ;;  %v3801_v1 = vadd.f32 %v3800_v51, %v3799_v31  ;;  %v3865_v12 = vadd.f32 %v3864_v33, %v3863_v40  ;;  %v6269_v31 = vld [vmem:[#allocation31_spill] sm:$0xff] }
 0x478   : > { %v3802_v63 = vpop.f32.mrf.mxu1  ;;  %v3866_v37 = vpop.f32.mrf.mxu0 }
 0x479   : > { %v3703_v24 = vpack.c.bf16 %v3089_v15, %v3088_v48  ;;  %v2944_v41 = vadd.f32 %v3865_v12, %v3801_v1 }
 0x47a   : > { %v3803_v18 = vpop.f32.mrf.mxu1  ;;  %v3867_v32 = vpop.f32.mrf.mxu0 }
 0x47b   : > { %3704 = vst [vmem:[%s5943_s17] sm:$0xff] %v3703_v24   ;;  %v3804_v3 = vadd.f32 %v3803_v18, %v3802_v63  ;;  %v3868_v30 = vadd.f32 %v3867_v32, %v3866_v37  ;;  %v3067_v6 = vadd.f32 %v2944_v41, %v6264_v23 }
 0x47d   : > { %v2947_v34 = vadd.f32 %v3868_v30, %v3804_v3  ;;  %v3090_v59 = vadd.f32 %v5937_v47, %v3067_v6 }
 0x47f   : > { %v3805_v10 = vpop.f32.mrf.mxu1  ;;  %v3869_v44 = vpop.f32.mrf.mxu0  ;;  %v3068_v2 = vadd.f32 %v2947_v34, %v6265_v0  ;;  %v6270_v34 = vld [vmem:[#allocation32_spill] sm:$0xff] }
 0x481   : > { %v3806_v58 = vpop.f32.mrf.mxu1  ;;  %v3870_v45 = vpop.f32.mrf.mxu0  ;;  %v3091_v62 = vadd.f32 %v5937_v47, %v3068_v2 }
 0x482   : > { %v3807_v25 = vadd.f32 %v3806_v58, %v3805_v10  ;;  %v3871_v36 = vadd.f32 %v3870_v45, %v3869_v44  ;;  %v6271_v58 = vld [vmem:[#allocation34_spill] sm:$0xff] }
 0x483   : > { %v3808_v20 = vpop.f32.mrf.mxu1  ;;  %v3872_v17 = vpop.f32.mrf.mxu0  ;;  %v3708_v52 = vpack.c.bf16 %v3091_v62, %v3090_v59 }
 0x484   : > { %v2952_v13 = vadd.f32 %v3871_v36, %v3807_v25 }
 0x485   : > { %v3809_v29 = vpop.f32.mrf.mxu1  ;;  %v3873_v8 = vpop.f32.mrf.mxu0  ;;  %3754 = vst [vmem:[%s5943_s17 + $0x8] sm:$0xff] %v3708_v52  }
 0x486   : > { %v3810_v54 = vadd.f32 %v3809_v29, %v3808_v20  ;;  %v3874_v53 = vadd.f32 %v3873_v8, %v3872_v17  ;;  %v3069_v19 = vadd.f32 %v2952_v13, %v6266_v14  ;;  %v6272_v14 = vld [vmem:[#allocation33_spill] sm:$0xff] }
 0x488   : > { %v2955_v35 = vadd.f32 %v3874_v53, %v3810_v54  ;;  %v3092_v26 = vadd.f32 %v5937_v47, %v3069_v19 }
 0x489   : > { %v3811_v9 = vpop.f32.mrf.mxu1  ;;  %v3875_v49 = vpop.f32.mrf.mxu0 }
 0x48a   : > { %v3070_v28 = vadd.f32 %v2955_v35, %v6267_v43 }
 0x48b   : > { %v3812_v56 = vpop.f32.mrf.mxu1  ;;  %v3876_v27 = vpop.f32.mrf.mxu0 }
 0x48c   : > { %v3093_v16 = vadd.f32 %v5937_v47, %v3070_v28  ;;  %v3813_v60 = vadd.f32 %v3812_v56, %v3811_v9  ;;  %v3877_v5 = vadd.f32 %v3876_v27, %v3875_v49  ;;  %v6273_v9 = vld [vmem:[#allocation35_spill] sm:$0xff] }
 0x48d   : > { %v3814_v42 = vpop.f32.mrf.mxu1  ;;  %v3878_v61 = vpop.f32.mrf.mxu0 }
 0x48e   : > { %v3713_v22 = vpack.c.bf16 %v3093_v16, %v3092_v26  ;;  %v2960_v21 = vadd.f32 %v3877_v5, %v3813_v60 }
 0x48f   : > { %v3815_v39 = vpop.f32.mrf.mxu1  ;;  %v3879_v55 = vpop.f32.mrf.mxu0 }
 0x490   : > { %3755 = vst [vmem:[%s5943_s17 + $0x10] sm:$0xff] %v3713_v22   ;;  %v3816_v4 = vadd.f32 %v3815_v39, %v3814_v42  ;;  %v3880_v7 = vadd.f32 %v3879_v55, %v3878_v61  ;;  %v3071_v50 = vadd.f32 %v2960_v21, %v6268_v57 }
 0x492   : > { %v2963_v46 = vadd.f32 %v3880_v7, %v3816_v4  ;;  %v3817_v38 = vpop.f32.mrf.mxu1  ;;  %v3881_v11 = vpop.f32.mrf.mxu0  ;;  %v3094_v51 = vadd.f32 %v5937_v47, %v3071_v50 }
 0x494   : > { %v3072_v40 = vadd.f32 %v2963_v46, %v6269_v31  ;;  %v3818_v48 = vpop.f32.mrf.mxu1  ;;  %v3882_v15 = vpop.f32.mrf.mxu0  ;;  %v6274_v31 = vld [vmem:[#allocation36_spill] sm:$0xff] }
 0x495   : > { %v3819_v1 = vadd.f32 %v3818_v48, %v3817_v38  ;;  %v3883_v12 = vadd.f32 %v3882_v15, %v3881_v11 }
 0x496   : > { %v3095_v33 = vadd.f32 %v5937_v47, %v3072_v40  ;;  %v3820_v24 = vpop.f32.mrf.mxu1  ;;  %v3884_v63 = vpop.f32.mrf.mxu0 }
 0x497   : > { %v2968_v41 = vadd.f32 %v3883_v12, %v3819_v1 }
 0x498   : > { %v3718_v37 = vpack.c.bf16 %v3095_v33, %v3094_v51  ;;  %v3821_v18 = vpop.f32.mrf.mxu1  ;;  %v3885_v32 = vpop.f32.mrf.mxu0  ;;  %v6275_v33 = vld [vmem:[#allocation38_spill] sm:$0xff] }
 0x499   : > { %v3822_v3 = vadd.f32 %v3821_v18, %v3820_v24  ;;  %v3886_v30 = vadd.f32 %v3885_v32, %v3884_v63  ;;  %v3073_v10 = vadd.f32 %v2968_v41, %v6270_v34 }
 0x49a   : > { %3756 = vst [vmem:[%s5943_s17 + $0x18] sm:$0xff] %v3718_v37   ;;  %v3823_v23 = vpop.f32.mrf.mxu1  ;;  %v3887_v6 = vpop.f32.mrf.mxu0 }
 0x49b   : > { %v2971_v44 = vadd.f32 %v3886_v30, %v3822_v3  ;;  %v3096_v20 = vadd.f32 %v5937_v47, %v3073_v10  ;;  %v6277_v10 = vld [vmem:[#allocation39_spill] sm:$0xff] }
 0x49c   : > { %v3824_v0 = vpop.f32.mrf.mxu1  ;;  %v3888_v2 = vpop.f32.mrf.mxu0 }
 0x49d   : > { %v3074_v45 = vadd.f32 %v2971_v44, %v6271_v58  ;;  %v3825_v59 = vadd.f32 %v3824_v0, %v3823_v23  ;;  %v3889_v62 = vadd.f32 %v3888_v2, %v3887_v6  ;;  %v6276_v23 = vld [vmem:[#allocation37_spill] sm:$0xff] }
 0x49e   : > { %v3826_v25 = vpop.f32.mrf.mxu1  ;;  %v3890_v36 = vpop.f32.mrf.mxu0 }
 0x49f   : > { %v3097_v17 = vadd.f32 %v5937_v47, %v3074_v45  ;;  %v2976_v52 = vadd.f32 %v3889_v62, %v3825_v59 }
 0x4a0   : > { %v3827_v13 = vpop.f32.mrf.mxu1  ;;  %v3891_v29 = vpop.f32.mrf.mxu0 }
 0x4a1   : > { %v3723_v8 = vpack.c.bf16 %v3097_v17, %v3096_v20  ;;  %v3828_v54 = vadd.f32 %v3827_v13, %v3826_v25  ;;  %v3892_v53 = vadd.f32 %v3891_v29, %v3890_v36  ;;  %v3075_v19 = vadd.f32 %v2976_v52, %v6272_v14 }
 0x4a3   : > { %3757 = vst [vmem:[%s5943_s17 + $0x20] sm:$0xff] %v3723_v8   ;;  %v2979_v35 = vadd.f32 %v3892_v53, %v3828_v54  ;;  %v3098_v28 = vadd.f32 %v5937_v47, %v3075_v19 }
 0x4a5   : > { %v3076_v49 = vadd.f32 %v2979_v35, %v6273_v9 }
 0x4a7   : > { %v3099_v56 = vadd.f32 %v5937_v47, %v3076_v49 }
 0x4a8   : > { %v3829_v43 = vpop.f32.mrf.mxu1 }
 0x4a9   : > { %v3728_v26 = vpack.c.bf16 %v3099_v56, %v3098_v28 }
 0x4aa   : > { %v3830_v27 = vpop.f32.mrf.mxu1 }
 0x4ab   : > { %3758 = vst [vmem:[%s5943_s17 + $0x28] sm:$0xff] %v3728_v26   ;;  %v3831_v55 = vadd.f32 %v3830_v27, %v3829_v43 }
 0x4ac   : > { %v3832_v16 = vpop.f32.mrf.mxu1 }
 0x4ae   : > { %v3833_v60 = vpop.f32.mrf.mxu1 }
 0x4af   : > { %v3834_v46 = vadd.f32 %v3833_v60, %v3832_v16 }
 0x4b0   : > { %v3835_v5 = vpop.f32.mrf.mxu1 }
 0x4b2   : > { %v3836_v42 = vpop.f32.mrf.mxu1 }
 0x4b3   : > { %v3837_v51 = vadd.f32 %v3836_v42, %v3835_v5 }
 0x4b4   : > { %v3838_v61 = vpop.f32.mrf.mxu1 }
 0x4b6   : > { %v3839_v22 = vpop.f32.mrf.mxu1 }
 0x4b7   : > { %v3840_v32 = vadd.f32 %v3839_v22, %v3838_v61 }
 0x4b8   : > { %v3893_v21 = vpop.f32.mrf.mxu1 }
 0x4ba   : > { %v3894_v39 = vpop.f32.mrf.mxu1 }
 0x4bb   : > { %v3895_v4 = vadd.f32 %v3894_v39, %v3893_v21 }
 0x4bc   : > { %v3896_v7 = vpop.f32.mrf.mxu1 }
 0x4bd   : > { %v2984_v57 = vadd.f32 %v3895_v4, %v3831_v55 }
 0x4be   : > { %v3897_v50 = vpop.f32.mrf.mxu1 }
 0x4bf   : > { %v3898_v38 = vadd.f32 %v3897_v50, %v3896_v7  ;;  %v3077_v40 = vadd.f32 %v2984_v57, %v6274_v31 }
 0x4c0   : > { %v3899_v11 = vpop.f32.mrf.mxu1 }
 0x4c1   : > { %v2987_v48 = vadd.f32 %v3898_v38, %v3834_v46  ;;  %v3100_v63 = vadd.f32 %v5937_v47, %v3077_v40 }
 0x4c2   : > { %v3900_v15 = vpop.f32.mrf.mxu1 }
 0x4c3   : > { %v3078_v1 = vadd.f32 %v2987_v48, %v6275_v33  ;;  %v3901_v12 = vadd.f32 %v3900_v15, %v3899_v11 }
 0x4c4   : > { %v3902_v24 = vpop.f32.mrf.mxu1 }
 0x4c5   : > { %v3101_v37 = vadd.f32 %v5937_v47, %v3078_v1  ;;  %v2992_v41 = vadd.f32 %v3901_v12, %v3837_v51 }
 0x4c6   : > { %v3903_v18 = vpop.f32.mrf.mxu1 }
 0x4c7   : > { %v3733_v3 = vpack.c.bf16 %v3101_v37, %v3100_v63  ;;  %v3904_v30 = vadd.f32 %v3903_v18, %v3902_v24  ;;  %v3079_v6 = vadd.f32 %v2992_v41, %v6276_v23 }
 0x4c9   : > { %3759 = vst [vmem:[%s5943_s17 + $0x30] sm:$0xff] %v3733_v3   ;;  %v2995_v34 = vadd.f32 %v3904_v30, %v3840_v32  ;;  %v3102_v0 = vadd.f32 %v5937_v47, %v3079_v6 }
 0x4cb   : > { %v3080_v44 = vadd.f32 %v2995_v34, %v6277_v10 }
 0x4cd   : > { %v3103_v2 = vadd.f32 %v5937_v47, %v3080_v44 }
 0x4cf   : > { %v3738_v58 = vpack.c.bf16 %v3103_v2, %v3102_v0 }
 0x4d1   : > { %3760 = vst [vmem:[%s5943_s17 + $0x38] sm:$0xff] %v3738_v58  }
 0x4d2   : > { %4564 = shalt.err (!%p4561_p0)
}
 0x4d3   : > { %s4565_s9 = scalar_lea.hbm %s5985_s2, 1024  ;;  %s4569_s13 = scalar_lea.hbm %s6043_s8, 4096 }
 0x4d4   : > { %p4566_p10 = scmp.ne.s32.totalorder %s5985_s2, %s4565_s9  ;;  %p4570_p2 = scmp.lt.s32.totalorder %s5985_s2, %s6043_s8 }
 0x4d5   : > { %p4571_p7 = scmp.lt.s32.totalorder %s4569_s13, %s4565_s9 }
 0x4d6   : > { %p4567_p1 = pnand %p4566_p10, %p4810_p3 }
 0x4d7   : > { %p4572_p4 = por %p4571_p7, %p4570_p2 }
 0x4d8   : > { %p4568_p8 = pneg %p4567_p1 }
 0x4da   : > { %p4573_p5 = pnand %p4572_p4, %p4568_p8 }
 0x4dc   : > { %4576 = shalt.err (!%p4573_p5)
}
 0x4dd   : > { %s4656_s14 = smov 64   ;;  %s4657_s12 = smov 4  }
 0x4de   : > { %3969 = dma.vmem_to_hbm [thread:$0]  (%p4810_p3), %s5987_s20, 1024, %s5985_s2, %s3185_s23, %s4656_s14, %s4656_s14, %s4657_s12  }
 0x4df PF: > { %p3999_p9 = scmp.ge.s32.totalorder %s4643_s10, 2  ;;  %s3213_s24 = sand.u32 1, %s4623_s27  }
 0x4e0   : > { %s3214_s21 = scalar_lea.sflag [#allocation7], %s3213_s24 }
 0x4e1   : > { %p3989_p11 = pnand %p3999_p9, %p4748_p6 }
 0x4e3   : > { %p3990_p12 = pneg %p3989_p11 }
 0x4e5   : > { %4618 = dma.done.wait (%p3990_p12), %s3214_s21, 1024  }
 0x4e6   : > { %4620 = vsyncadd (%p3990_p12), %s3214_s21, 4294966272  ;;  %s28_s10 = sadd.s32 1, %s4643_s10   ;;  %s6279_s19 = sld [smem:[#allocation23_spill]] }
 0x4e7   : > { %p25_p13 = scmp.ge.s32.totalorder %s28_s10, 6   ;;  %s6280_s30 = sld [smem:[#allocation20_spill]] }
 0x4e8   : > { %s6281_s9 = sld [smem:[#allocation22_spill]]  ;;  %s6282_s27 = smov %s4627_s28 }
 0x4e9   : > { %s6283_s28 = smov %s4631_s29  ;;  %27 = sbr.rel (!%p25_p13) target bundleno = 13 (0xd), region = 135 }
 0x4ec   : > { %s6284_s29 = smov %s6279_s19 }
 0x4ee   :  { %3219 = vsyncpa [#allocation6], 1 }
 0x4ef   :  { %3221 = vsyncpa [#allocation6 + $0x1], 1 }
 0x4f0   :  { %3222 = vsyncpa [#allocation9], 1 }
 0x4f1   :  { %3224 = vsyncpa [#allocation9 + $0x1], 1 }
 0x4f2   :  { %3225 = vsyncpa [#allocation12], 1 }
 0x4f3   :  { %3226 = vsyncpa [#allocation7], 1 }
 0x4f4   :  { %3228 = vsyncpa [#allocation7 + $0x1], 1 }

// kernel: tpu_custom_call.1
= control target key start
LH: loop header
LB: loop body
LE: loop exit
PB: predicated region body
PF: predicated region fallthrough
CT: control target
= control target key end

     0   :  { %s6035_s0 = inlined_call_operand.hbm [shape: bf16[512,128], index: 0, kind: input, shape index: {}]   ;;  %s6036_s1 = inlined_call_operand.hbm [shape: bf16[512,128], index: 1, kind: input, shape index: {}]   ;;  %s6037_s2 = inlined_call_operand.hbm [shape: bf16[128,128], index: 2, kind: input, shape index: {}]   ;;  %s6038_s3 = inlined_call_operand.vmem [shape: f32[1,128], index: 3, kind: input, shape index: {}]   ;;  %s6039_s4 = inlined_call_operand.hbm [shape: bf16[1,128,1024], index: 4, kind: input, shape index: {}]   ;;  %s6040_s5 = inlined_call_operand.vmem [shape: f32[1,1,1024], index: 5, kind: input, shape index: {}]   ;;  %s6041_s6 = inlined_call_operand.hbm [shape: bf16[512,128], index: 6, kind: input, shape index: {}]   ;;  %s6042_s7 = inlined_call_operand.vmem [shape: f32[1,128], index: 7, kind: input, shape index: {}]   ;;  %s6043_s8 = inlined_call_operand.hbm [shape: bf16[512,128], index: 8, kind: output, shape index: {}]  }
   0x1   :  { %6111 = sst [smem:[#allocation96_spill]] %s6037_s2 }
   0x2   :  { %6112 = sst [smem:[#allocation97_spill]] %s6039_s4 }
   0x3   :  { %6113 = sst [smem:[#allocation98_spill]] %s6041_s6 }
   0x4   :  { %13 = vsyncpa [#allocation6], 0 }
   0x5   :  { %15 = vsyncpa [#allocation6 + $0x1], 0 }
   0x6   :  { %16 = vsyncpa [#allocation9], 0 }
   0x7   :  { %18 = vsyncpa [#allocation9 + $0x1], 0 }
   0x8   :  { %19 = vsyncpa [#allocation12], 0 }
   0x9   :  { %20 = vsyncpa [#allocation7], 0 }
   0xa   :  { %22 = vsyncpa [#allocation7 + $0x1], 0  ;;  %s4703_s27 = smov 0   ;;  %s4705_s28 = smov 0  }
   0xb   :  { %s4707_s29 = smov 0   ;;  %s4709_s30 = smov 0  }
   0xc   :  { %s4711_s9 = smov 0   ;;  %s4713_s10 = smov 0  }
   0xd LB: > { %6114 = sst [smem:[#allocation20_spill]] %s4639_s9  ;;  %s4734_s11 = sadd.s32 4294967295, %s4643_s10   ;;  %s4643_s10 = sphi %s4713_s10, %s28_s10   ;;  %s4639_s9 = sphi %s4711_s9, %s6281_s9   ;;  %s4635_s30 = sphi %s4709_s30, %s6280_s30   ;;  %s4631_s29 = sphi %s4707_s29, %s6284_s29   ;;  %s4627_s28 = sphi %s4705_s28, %s6283_s28   ;;  %s4623_s27 = sphi %s4703_s27, %s6282_s27  }
   0xe   : > { %s3350_s12 = sadd.s32 4294967294, %s4643_s10   ;;  %p60_p0 = scmp.ne.s32.totalorder %s4627_s28, %s4623_s27 }
   0xf   : > { %p6051_p1 = scmp.eq.s32.totalorder %s4734_s11, 0  ;;  %p251_p2 = scmp.eq.s32.totalorder %s4734_s11, 3 }
  0x10   : > { %p257_p3 = scmp.eq.s32.totalorder %s3350_s12, 3  ;;  %p3351_p5 = scmp.ge.s32.totalorder %s4643_s10, 1 }
  0x11   : > { %p4743_p4 = por %p6051_p1, %p60_p0  ;;  %p264_p7 = scmp.lt.s32.totalorder %s4643_s10, 5 }
  0x12   : > { %p4748_p6 = por %p257_p3, %p60_p0  ;;  %s4645_s16 = smov [#allocation10]  }
  0x13   : > { %p4753_p8 = pnand %p3351_p5, %p264_p7  ;;  %s276_s17 = sshll.u32 %s4645_s16, 4  ;;  %s277_s17 = int_to_ptr.vmem [resolvable:$true] %s276_s17 }
  0x14   : > { %s6116_s14 = scalar_select %p4748_p6, 1, 0 }
  0x15   : > { %p3971_p9 = pneg %p4753_p8  ;;  %s4646_s19 = smov [#allocation11]  }
  0x16   : > { %6117 = sst [smem:[#allocation21_spill]] %s6116_s14  ;;  %s295_s20 = sshll.u32 %s4646_s19, 4  ;;  %s296_s20 = int_to_ptr.vmem [resolvable:$true] %s295_s20 }
  0x17   : > { %p4761_p10 = pnand %p3971_p9, %p6051_p1  ;;  %s4428_s21 = scalar_lea.vmem %s277_s17, 1024 }
  0x18   : > { %p4429_p12 = scmp.ne.s32.totalorder %s277_s17, %s4428_s21  ;;  %p4436_p3 = scmp.lt.s32.totalorder %s277_s17, %s277_s17 }
  0x19   : > { %p4419_p11 = pneg %p4761_p10  ;;  %p4437_p5 = scmp.lt.s32.totalorder %s4428_s21, %s4428_s21 }
  0x1b   : > { %p4431_p13 = pnand %p4429_p12, %p4419_p11  ;;  %p4438_p7 = por %p4437_p5, %p4436_p3 }
  0x1d   : > { %p4432_p0 = pneg %p4431_p13 }
  0x1f   : > { %p4439_p9 = pnand %p4438_p7, %p4432_p0 }
  0x21   : > { %4442 = shalt.err (!%p4439_p9)
}
  0x22   : > { %s6044_s22 = smov 64   ;;  %s6046_s23 = smov 4  }
  0x23   : > { %s6120_s2 = sld [smem:[#allocation96_spill]]  ;;  %s4454_s26 = scalar_lea.vmem %s296_s20, 8192 }
  0x24   : > { %p4455_p12 = scmp.ne.s32.totalorder %s296_s20, %s4454_s26  ;;  %p4462_p0 = scmp.lt.s32.totalorder %s296_s20, %s296_s20 }
  0x25   : > { %p4463_p5 = scmp.lt.s32.totalorder %s4454_s26, %s4454_s26 }
  0x26   : > { %p4457_p13 = pnand %p4455_p12, %p4419_p11 }
  0x27   : > { %p4464_p7 = por %p4463_p5, %p4462_p0 }
  0x28   : > { %p4458_p3 = pneg %p4457_p13 }
  0x29   : > { %3974 = dma.hbm_to_vmem [thread:$0]  (!%p4761_p10), %s6120_s2, 1024, %s277_s17, [#allocation9], %s6044_s22, %s6044_s22, %s6046_s23  }
  0x2a   : > { %p4465_p9 = pnand %p4464_p7, %p4458_p3 }
  0x2c   : > { %4468 = shalt.err (!%p4465_p9)
}
  0x2d   : > { %s4649_s12 = smov 512   ;;  %s4650_s16 = smov 32  }
  0x2e   : > { %s6121_s4 = sld [smem:[#allocation97_spill]]  ;;  %s4651_s17 = smov [#allocation13]  }
  0x2f   : > { %s318_s24 = sshll.u32 %s4651_s17, 4  ;;  %s319_s24 = int_to_ptr.vmem [resolvable:$true] %s318_s24 }
  0x30   : > { %s4480_s25 = scalar_lea.vmem %s319_s24, 4096  ;;  %p4488_p3 = scmp.lt.s32.totalorder %s319_s24, %s319_s24 }
  0x31   : > { %p4481_p12 = scmp.ne.s32.totalorder %s319_s24, %s4480_s25  ;;  %p4489_p5 = scmp.lt.s32.totalorder %s4480_s25, %s4480_s25 }
  0x33   : > { %p4483_p13 = pnand %p4481_p12, %p4419_p11  ;;  %p4490_p7 = por %p4489_p5, %p4488_p3 }
  0x34   : > { %3977 = dma.hbm_to_vmem [thread:$0]  (!%p4761_p10), %s6121_s4, 8192, %s296_s20, [#allocation12], %s4649_s12, %s4649_s12, %s4650_s16  }
  0x35   : > { %p4484_p0 = pneg %p4483_p13 }
  0x37   : > { %p4491_p9 = pnand %p4490_p7, %p4484_p0 }
  0x39   : > { %4494 = shalt.err (!%p4491_p9)
}
  0x3a   : > { %s6122_s6 = sld [smem:[#allocation98_spill]]  ;;  %s40_s12 = sadd.s32 1, %s4639_s9 }
  0x3b   : > { %p42_p11 = scmp.ge.s32.totalorder %s40_s12, 4  ;;  %s47_s18 = sadd.s32 1, %s4631_s29 }
  0x3c   : > { %p54_p12 = scmp.ne.s32.totalorder %s4631_s29, %s4627_s28  ;;  %p55_p13 = scmp.eq.s32.totalorder %s4643_s10, 0 }
  0x3d   : > { %s6286_s12 = smov (%p42_p11, %s40_s12), 0  ;;  %s335_s17 = sand.u32 1, %s4631_s29  }
  0x3e   : > { %6123 = sst [smem:[#allocation22_spill]] %s6286_s12  ;;  %p4804_p0 = por %p55_p13, %p54_p12 }
  0x3f   : > { %p4810_p3 = por %p251_p2, %p54_p12  ;;  %s44_s21 = ssub.s32 %s4639_s9, %s6286_s12 }
  0x40   : > { %3980 = dma.hbm_to_vmem [thread:$0]  (!%p4761_p10), %s6122_s6, 4096, %s319_s24, [#allocation12], %s6044_s22, %s6044_s22, %s6046_s23  }
  0x41   : > { %p3995_p10 = scmp.lt.s32.totalorder %s4643_s10, 4  ;;  %p45_p5 = scmp.eq.s32.totalorder %s44_s21, 0 }
  0x42   : > { %s3357_s24 = sshll.u32 %s335_s17, 6  ;;  %s3593_s20 = sshll.u32 %s4639_s9, 10 }
  0x43   : > { %s4819_s25 = scalar_select %p45_p5, %s4631_s29, %s47_s18  }
  0x44   : > { %s345_s23 = scalar_lea.hbm %s6035_s0, %s3593_s20  ;;  %s339_s2 = scalar_lea.vmem [#allocation5], %s3357_s24 }
  0x45   : > { %6126 = sst [smem:[#allocation23_spill]] %s4819_s25  ;;  %s346_s4 = sshll.u32 %s339_s2, 4  ;;  %s347_s4 = int_to_ptr.vmem [resolvable:$true] %s346_s4 }
  0x46   : > { %p4827_p2 = pnand %p3995_p10, %p4804_p0  ;;  %s4834_s18 = scalar_lea.hbm %s6036_s1, %s3593_s20 }
  0x47   : > { %s360_s21 = scalar_lea.vmem [#allocation8], %s3357_s24  ;;  %s336_s25 = scalar_lea.sflag [#allocation6], %s335_s17 }
  0x48   : > { %s367_s9 = sshll.u32 %s360_s21, 4  ;;  %p4497_p7 = pneg %p4827_p2  ;;  %s368_s9 = int_to_ptr.vmem [resolvable:$true] %s367_s9 }
  0x49   : > { %s4508_s22 = scalar_lea.vmem %s347_s4, 1024  ;;  %s4652_s2 = smov [#allocation5]  }
  0x4a   : > { %p4509_p9 = scmp.ne.s32.totalorder %s347_s4, %s4508_s22  ;;  %s4513_s16 = sshll.u32 %s4652_s2, 4  ;;  %s4514_s16 = int_to_ptr.vmem [resolvable:$false] %s4513_s16 }
  0x4b   : > { %s4515_s26 = scalar_lea.vmem %s4514_s16, 2048  ;;  %p4516_p13 = scmp.lt.s32.totalorder %s347_s4, %s4514_s16 }
  0x4c   : > { %p4511_p11 = pnand %p4509_p9, %p4497_p7  ;;  %p4517_p0 = scmp.lt.s32.totalorder %s4515_s26, %s4508_s22 }
  0x4e   : > { %p4512_p12 = pneg %p4511_p11  ;;  %p4518_p10 = por %p4517_p0, %p4516_p13 }
  0x50   : > { %p4519_p5 = pnand %p4518_p10, %p4512_p12 }
  0x52   : > { %4522 = shalt.err (!%p4519_p5)
}
  0x53   : > { %s6128_s14 = smov 4   ;;  %s6129_s12 = smov 64  }
  0x54   : > { %3984 = dma.hbm_to_vmem [thread:$0]  (!%p4827_p2), %s345_s23, 1024, %s347_s4, %s336_s25, %s6129_s12, %s6129_s12, %s6128_s14  }
  0x55   : > { %s356_s17 = sand.u32 1, %s4643_s10   ;;  %s4536_s20 = scalar_lea.vmem %s368_s9, 1024 }
  0x56   : > { %s357_s24 = scalar_lea.sflag [#allocation9], %s356_s17  ;;  %p4537_p9 = scmp.ne.s32.totalorder %s368_s9, %s4536_s20 }
  0x57   : > { %s4653_s21 = smov [#allocation8]  }
  0x58   : > { %p4539_p11 = pnand %p4537_p9, %p4497_p7  ;;  %s4541_s22 = sshll.u32 %s4653_s21, 4  ;;  %s4542_s22 = int_to_ptr.vmem [resolvable:$false] %s4541_s22 }
  0x59   : > { %s4543_s2 = scalar_lea.vmem %s4542_s22, 2048  ;;  %p4544_p12 = scmp.lt.s32.totalorder %s368_s9, %s4542_s22 }
  0x5a   : > { %p4540_p1 = pneg %p4539_p11  ;;  %p4545_p13 = scmp.lt.s32.totalorder %s4543_s2, %s4536_s20 }
  0x5c   : > { %p4546_p0 = por %p4545_p13, %p4544_p12 }
  0x5e   : > { %p4547_p10 = pnand %p4546_p0, %p4540_p1 }
  0x60   : > { %4550 = shalt.err (!%p4547_p10)
}
  0x61   : > { %3987 = dma.hbm_to_vmem [thread:$0]  (!%p4827_p2), %s4834_s18, 1024, %s368_s9, %s357_s24, %s6129_s12, %s6129_s12, %s6128_s14  }
  0x62   : > { %379 = sbr.rel (%p4753_p8) target bundleno = 1247 (0x4df), region = 52 }
  0x67   : > { %s4859_s4 = sand.u32 1, %s4627_s28  }
  0x68   : > { %s4862_s23 = sshll.u32 %s4859_s4, 6  ;;  %s382_s25 = scalar_lea.sflag [#allocation6], %s4859_s4 }
  0x69   : > { %s4866_s16 = scalar_lea.vmem [#allocation5], %s4862_s23 }
  0x6a   : > { %4602 = dma.done.wait (%p4743_p4), %s382_s25, 1024  }
  0x6b   : > { %4604 = vsyncadd (%p4743_p4), %s382_s25, 4294966272  ;;  %s390_s6 = sand.u32 1, %s4734_s11   ;;  %s4874_s15 = scalar_lea.vmem [#allocation8], %s4862_s23 }
  0x6c   : > { %s391_s9 = scalar_lea.sflag [#allocation9], %s390_s6 }
  0x6d   : > { %4606 = dma.done.wait (%p4743_p4), %s391_s9, 1024  }
  0x6e   : > { %4608 = vsyncadd (%p4743_p4), %s391_s9, 4294966272  ;;  %p6130_p1 = scmp.eq.s32.totalorder %s4734_s11, 0 }
  0x70   : > { %4610 = dma.done.wait (%p6130_p1), [#allocation9], 1024   ;;  %p6131_p8 = pmov %p6130_p1 }
  0x71   : > { %p6132_p2 = pmov %p6130_p1 }
  0x72   : > { %4612 = vsyncadd (%p6131_p8), [#allocation9], 4294966272 }
  0x73   : > { %4614 = dma.done.wait (%p6132_p2), [#allocation12], 12288   ;;  %p6133_p7 = pmov %p6130_p1 }
  0x74   : > { %v4058_v0 = vld [vmem:[#allocation10 + $0x38] sm:$0xff]   ;;  %v4059_v1 = vld [vmem:[#allocation10 + $0x30] sm:$0xff]   ;;  %v4060_v2 = vld [vmem:[#allocation10 + $0x28] sm:$0xff]   ;;  %s5943_s17 = scalar_lea.vmem [#allocation14], %s4862_s23  ;;  %s3627_s24 = sshll.u32 %s4635_s30, 10 }
  0x75   : > { %4616 = vsyncadd (%p6133_p7), [#allocation12], 4294955008  ;;  %3905 = vmatprep.subr.bf16.mxu0 %v4058_v0  ;;  %v4061_v3 = vld [vmem:[#allocation10 + $0x20] sm:$0xff]   ;;  %v4062_v5 = vld [vmem:[#allocation10 + $0x18] sm:$0xff]   ;;  %s3198_s20 = sshll.u32 %s5943_s17, 4  ;;  %s5985_s2 = scalar_lea.hbm %s6043_s8, %s3627_s24  ;;  %s5987_s20 = int_to_ptr.vmem [resolvable:$true] %s3198_s20 }
  0x76   : > { %3906 = vmatpush3.bf16.msra.mxu0 %v4058_v0  ;;  %v4066_v4 = vld [vmem:[%s4874_s15] sm:$0xff]   ;;  %v4063_v6 = vld [vmem:[#allocation10 + $0x10] sm:$0xff]   ;;  %v4064_v7 = vld [vmem:[#allocation10 + $0x8] sm:$0xff]   ;;  %s3185_s23 = scalar_lea.sflag [#allocation7], %s4859_s4  ;;  %s4551_s25 = scalar_lea.vmem %s5987_s20, 1024 }
  0x77   : > { %3907 = vmatprep.subr.bf16.mxu0 %v4059_v1  ;;  %3921 = vmatprep.mubr.bf16.mxu0 %v4066_v4  ;;  %v4065_v8 = vld [vmem:[#allocation10] sm:$0xff]   ;;  %v4067_v9 = vld [vmem:[%s4874_s15 + $0x8] sm:$0xff]   ;;  %v4068_v10 = vld [vmem:[%s4874_s15 + $0x10] sm:$0xff]   ;;  %p4552_p4 = scmp.ne.s32.totalorder %s5987_s20, %s4551_s25  ;;  %s4655_s30 = smov [#allocation14]  }
  0x78   : > { %v4069_v11 = vld [vmem:[%s4874_s15 + $0x18] sm:$0xff]   ;;  %v4070_v12 = vld [vmem:[%s4874_s15 + $0x20] sm:$0xff]   ;;  %v4071_v13 = vld [vmem:[%s4874_s15 + $0x28] sm:$0xff]  }
  0x79   : > { %v4072_v14 = vld [vmem:[%s4874_s15 + $0x30] sm:$0xff]   ;;  %v4073_v15 = vld [vmem:[%s4874_s15 + $0x38] sm:$0xff]   ;;  %v3740_v16 = vld [vmem:[%s4866_s16 + $0x8] sm:$0xff]   ;;  %p4553_p5 = pnand %p4552_p4, %p4810_p3 }
  0x7a   : > { %3908 = vmatpush3.bf16.msra.mxu0 %v4059_v1  ;;  %v3629_v17 = vld [vmem:[%s4866_s16] sm:$0xff]   ;;  %v3634_v18 = vunpack.c.l.bf16 %v3740_v16  ;;  %v3635_v23 = vunpack.c.h.bf16 %v3740_v16  ;;  %v3742_v29 = vld [vmem:[%s4866_s16 + $0x18] sm:$0xff]   ;;  %v3741_v30 = vld [vmem:[%s4866_s16 + $0x10] sm:$0xff]  }
  0x7b   : > { %3909 = vmatprep.subr.bf16.mxu0 %v4060_v2  ;;  %v3630_v19 = vunpack.c.l.bf16 %v3629_v17  ;;  %v4901_v21 = vld [vmem:[%s6038_s3] ss:$0 sm:$0xff]  ;;  %v3631_v27 = vunpack.c.h.bf16 %v3629_v17  ;;  %v3642_v36 = vunpack.c.l.bf16 %v3742_v29  ;;  %v3638_v37 = vunpack.c.l.bf16 %v3741_v30  ;;  %v3744_v45 = vld [vmem:[%s4866_s16 + $0x28] sm:$0xff]   ;;  %v3745_v62 = vld [vmem:[%s4866_s16 + $0x30] sm:$0xff]   ;;  %p4554_p9 = pneg %p4553_p5 }
  0x7c   : > { %v3639_v43 = vunpack.c.h.bf16 %v3741_v30  ;;  %v3743_v46 = vld [vmem:[%s4866_s16 + $0x20] sm:$0xff]   ;;  %v3643_v48 = vunpack.c.h.bf16 %v3742_v29  ;;  %v3650_v52 = vunpack.c.l.bf16 %v3744_v45  ;;  %v3651_v60 = vunpack.c.h.bf16 %v3744_v45  ;;  %v3746_v0 = vld [vmem:[%s4866_s16 + $0x38] sm:$0xff]   ;;  %s4555_s16 = sshll.u32 %s4655_s30, 4  ;;  %s4556_s16 = int_to_ptr.vmem [resolvable:$false] %s4555_s16 }
  0x7d   : > { %v3646_v53 = vunpack.c.l.bf16 %v3743_v46  ;;  %v3647_v61 = vunpack.c.h.bf16 %v3743_v46  ;;  %v3654_v4 = vunpack.c.l.bf16 %v3745_v62  ;;  %v3655_v16 = vunpack.c.h.bf16 %v3745_v62  ;;  %s4557_s6 = scalar_lea.vmem %s4556_s16, 2048  ;;  %p4558_p11 = scmp.lt.s32.totalorder %s5987_s20, %s4556_s16 }
  0x7e   : > { %3910 = vmatpush3.bf16.msra.mxu0 %v4060_v2  ;;  %p4559_p12 = scmp.lt.s32.totalorder %s4557_s6, %s4551_s25 }
  0x7f   : > { %3911 = vmatprep.subr.bf16.mxu0 %v4061_v3 }
  0x80   : > { %p4560_p13 = por %p4559_p12, %p4558_p11 }
  0x82   : > { %3912 = vmatpush3.bf16.msra.mxu0 %v4061_v3  ;;  %p4561_p0 = pnand %p4560_p13, %p4554_p9 }
  0x83   : > { %3913 = vmatprep.subr.bf16.mxu0 %v4062_v5 }
  0x86   : > { %3914 = vmatpush3.bf16.msra.mxu0 %v4062_v5 }
  0x87   : > { %3915 = vmatprep.subr.bf16.mxu0 %v4063_v6 }
  0x8a   : > { %3916 = vmatpush3.bf16.msra.mxu0 %v4063_v6 }
  0x8b   : > { %3917 = vmatprep.subr.bf16.mxu0 %v4064_v7 }
  0x8e   : > { %3918 = vmatpush3.bf16.msra.mxu0 %v4064_v7 }
  0x8f   : > { %3919 = vmatprep.subr.bf16.mxu0 %v4065_v8 }
  0x92   : > { %3920 = vmatpush3.bf16.msra.mxu0 %v4065_v8  ;;  %v3658_v8 = vunpack.c.l.bf16 %v3746_v0 }
  0x95   : > { %3922 = vmatmul.mubr.bf16.vlgmr.msra.gmra.mxu0 %v4067_v9 }
  0x96   : > { %3925 = vmatprep.mubr.bf16.mxu0 %v4068_v10 }
  0x9d   : > { %3926 = vmatmul.mubr.bf16.gmra.mxu0 %v4069_v11 }
  0x9e   : > { %3929 = vmatprep.mubr.bf16.mxu0 %v4070_v12  ;;  %v3659_v12 = vunpack.c.h.bf16 %v3746_v0  ;;  %v1118_v0 = vld [vmem:[#allocation11 + $0x1c0] sm:$0xff] }
  0xa5   : > { %3930 = vmatmul.mubr.bf16.gmra.mxu0 %v4071_v13 }
  0xa6   : > { %3933 = vmatprep.mubr.bf16.mxu0 %v4072_v14 }
  0xad   : > { %3934 = vmatmul.mubr.bf16.gmra.mxu0 %v4073_v15 }
 0x155   : > { %v3923_v20 = vpop.f32.mrf.mxu0 }
 0x156   : > { %v720_v22 = vadd.f32 %v3923_v20, %v3634_v18 }
 0x157   : > { %v655_v24 = vpop.f32.mrf.mxu0 }
 0x158   : > { %v4904_v25 = vadd.f32 %v4901_v21, %v720_v22  ;;  %v718_v26 = vadd.f32 %v3630_v19, %v655_v24 }
 0x159   : > { %v3924_v28 = vpop.f32.mrf.mxu0 }
 0x15a   : > { %6134 = vst [vmem:[#allocation24_spill] sm:$0xff] %v4904_v25  ;;  %v4909_v31 = vadd.f32 %v4901_v21, %v718_v26  ;;  %v721_v32 = vadd.f32 %v3924_v28, %v3635_v23  ;;  %761 = vadd.xlane.f32.xlu1 %v4904_v25 }
 0x15b   : > { %v658_v33 = vpop.f32.mrf.mxu0 }
 0x15c   : > { %6135 = vst [vmem:[#allocation25_spill] sm:$0xff] %v4909_v31  ;;  %v4913_v34 = vadd.f32 %v4901_v21, %v721_v32  ;;  %v719_v35 = vadd.f32 %v3631_v27, %v658_v33  ;;  %757 = vadd.xlane.f32.xlu0 %v4909_v31 }
 0x15d   : > { %v3927_v38 = vpop.f32.mrf.mxu0 }
 0x15e   : > { %6136 = vst [vmem:[#allocation26_spill] sm:$0xff] %v4913_v34  ;;  %v4917_v39 = vadd.f32 %v4901_v21, %v719_v35  ;;  %763 = vadd.xlane.f32.xlu1 %v4913_v34  ;;  %v724_v41 = vadd.f32 %v3927_v38, %v3642_v36 }
 0x15f   : > { %v671_v40 = vpop.f32.mrf.mxu0 }
 0x160   : > { %6137 = vst [vmem:[#allocation27_spill] sm:$0xff] %v4917_v39  ;;  %v722_v42 = vadd.f32 %v3638_v37, %v671_v40  ;;  %759 = vadd.xlane.f32.xlu0 %v4917_v39  ;;  %v4927_v50 = vadd.f32 %v4901_v21, %v724_v41 }
 0x161   : > { %v3928_v44 = vpop.f32.mrf.mxu0 }
 0x162   : > { %v4924_v47 = vadd.f32 %v4901_v21, %v722_v42  ;;  %6139 = vst [vmem:[#allocation29_spill] sm:$0xff] %v4927_v50  ;;  %v725_v55 = vadd.f32 %v3928_v44, %v3643_v48 }
 0x163   : > { %v674_v49 = vpop.f32.mrf.mxu0 }
 0x164   : > { %6138 = vst [vmem:[#allocation28_spill] sm:$0xff] %v4924_v47  ;;  %v723_v51 = vadd.f32 %v3639_v43, %v674_v49  ;;  %765 = vadd.xlane.f32.xlu0 %v4924_v47  ;;  %v4938_v1 = vadd.f32 %v4901_v21, %v725_v55 }
 0x165   : > { %v3931_v54 = vpop.f32.mrf.mxu0 }
 0x166   : > { %v4931_v56 = vadd.f32 %v4901_v21, %v723_v51  ;;  %v728_v58 = vadd.f32 %v3931_v54, %v3650_v52  ;;  %6141 = vst [vmem:[#allocation31_spill] sm:$0xff] %v4938_v1 }
 0x167   : > { %v687_v57 = vpop.f32.mrf.mxu0 }
 0x168   : > { %6140 = vst [vmem:[#allocation30_spill] sm:$0xff] %v4931_v56  ;;  %v726_v59 = vadd.f32 %v3646_v53, %v687_v57  ;;  %767 = vadd.xlane.f32.xlu1 %v4931_v56  ;;  %769 = vadd.xlane.f32.xlu0 %v4927_v50  ;;  %v4944_v5 = vadd.f32 %v4901_v21, %v728_v58 }
 0x169   : > { %v3932_v63 = vpop.f32.mrf.mxu0 }
 0x16a   : > { %v4941_v2 = vadd.f32 %v4901_v21, %v726_v59  ;;  %6143 = vst [vmem:[#allocation33_spill] sm:$0xff] %v4944_v5  ;;  %v729_v6 = vadd.f32 %v3932_v63, %v3651_v60 }
 0x16b   : > { %v690_v3 = vpop.f32.mrf.mxu0 }
 0x16c   : > { %6142 = vst [vmem:[#allocation32_spill] sm:$0xff] %v4941_v2  ;;  %v727_v7 = vadd.f32 %v3647_v61, %v690_v3  ;;  %771 = vadd.xlane.f32.xlu1 %v4938_v1  ;;  %773 = vadd.xlane.f32.xlu0 %v4941_v2  ;;  %v4952_v13 = vadd.f32 %v4901_v21, %v729_v6  ;;  %v1122_v3 = vld [vmem:[#allocation11 + $0x1e0] sm:$0xff]  ;;  %v1119_v6 = vld [vmem:[#allocation11 + $0x1c8] sm:$0xff] }
 0x16d   : > { %v3935_v9 = vpop.f32.mrf.mxu0 }
 0x16e   : > { %v4949_v10 = vadd.f32 %v4901_v21, %v727_v7  ;;  %6145 = vst [vmem:[#allocation35_spill] sm:$0xff] %v4952_v13  ;;  %v732_v14 = vadd.f32 %v3935_v9, %v3658_v8  ;;  %v1123_v7 = vld [vmem:[#allocation11 + $0x1e8] sm:$0xff] }
 0x16f   : > { %v703_v11 = vpop.f32.mrf.mxu0 }
 0x170   : > { %6144 = vst [vmem:[#allocation34_spill] sm:$0xff] %v4949_v10  ;;  %v730_v15 = vadd.f32 %v3654_v4, %v703_v11  ;;  %775 = vadd.xlane.f32.xlu1 %v4949_v10  ;;  %777 = vadd.xlane.f32.xlu0 %v4944_v5  ;;  %v4960_v20 = vadd.f32 %v4901_v21, %v732_v14 }
 0x171   : > { %v3936_v17 = vpop.f32.mrf.mxu0  ;;  %v3468_v4 = vcombine.high %v1118_v0, %v1122_v3  ;;  %v3470_v11 = vcombine.high %v1119_v6, %v1123_v7 }
 0x172   : > { %v4957_v18 = vadd.f32 %v4901_v21, %v730_v15  ;;  %6147 = vst [vmem:[#allocation37_spill] sm:$0xff] %v4960_v20  ;;  %v733_v22 = vadd.f32 %v3936_v17, %v3659_v12  ;;  %v3467_v15 = vcombine.low %v1118_v0, %v1122_v3 }
 0x173   : > { %v706_v19 = vpop.f32.mrf.mxu0  ;;  %1536 = vmatprep.subr.bf16.mxu1 %v3468_v4  ;;  %1649 = vmatprep.subr.bf16.mxu0 %v3470_v11 }
 0x174   : > { %6146 = vst [vmem:[#allocation36_spill] sm:$0xff] %v4957_v18  ;;  %v731_v23 = vadd.f32 %v3655_v16, %v706_v19  ;;  %779 = vadd.xlane.f32.xlu1 %v4952_v13  ;;  %781 = vadd.xlane.f32.xlu0 %v4957_v18  ;;  %v4968_v26 = vadd.f32 %v4901_v21, %v733_v22 }
 0x175   : > { %v3469_v16 = vcombine.low %v1119_v6, %v1123_v7  ;;  %1537 = vmatpush1.bf16.msra.mxu1 %v3467_v15  ;;  %v1098_v15 = vld [vmem:[#allocation11 + $0x120] sm:$0xff] }
 0x176   : > { %v4965_v24 = vadd.f32 %v4901_v21, %v731_v23  ;;  %6149 = vst [vmem:[#allocation39_spill] sm:$0xff] %v4968_v26 }
 0x177   : > { %1650 = vmatpush1.bf16.msra.mxu0 %v3469_v16  ;;  %v1095_v16 = vld [vmem:[#allocation11 + $0x108] sm:$0xff] }
 0x178   : > { %6148 = vst [vmem:[#allocation38_spill] sm:$0xff] %v4965_v24  ;;  %783 = vadd.xlane.f32.xlu1 %v4965_v24  ;;  %785 = vadd.xlane.f32.xlu0 %v4960_v20 }
 0x17c   : > { %787 = vadd.xlane.f32.xlu1 %v4968_v26 }
 0x1e3   : > { %v762_v27 = vpop.xlane.xlu1 %761 }
 0x1e4   : > { %v792_v29 = vmul.f32 0.0078125, %v762_v27  ;;  %v1110_v27 = vld [vmem:[#allocation11 + $0x180] sm:$0xff] }
 0x1e5   : > { %v758_v28 = vpop.xlane.xlu0 %757 }
 0x1e6   : > { %v790_v30 = vmul.f32 0.0078125, %v758_v28  ;;  %v4977_v36 = vsub.f32 %v4904_v25, %v792_v29  ;;  %v1114_v28 = vld [vmem:[#allocation11 + $0x1a0] sm:$0xff]  ;;  %v1111_v29 = vld [vmem:[#allocation11 + $0x188] sm:$0xff] }
 0x1e7   : > { %v764_v32 = vpop.xlane.xlu1 %763 }
 0x1e8   : > { %v4974_v33 = vsub.f32 %v4909_v31, %v790_v30  ;;  %v793_v21 = vmul.f32 0.0078125, %v764_v32  ;;  %v824_v44 = vmul.f32 %v4977_v36, %v4977_v36 }
 0x1e9   : > { %v760_v35 = vpop.xlane.xlu0 %759 }
 0x1ea   : > { %v791_v37 = vmul.f32 0.0078125, %v760_v35  ;;  %v822_v38 = vmul.f32 %v4974_v33, %v4974_v33  ;;  %v4985_v42 = vsub.f32 %v4913_v34, %v793_v21  ;;  %v3460_v35 = vcombine.high %v1110_v27, %v1114_v28  ;;  %v1115_v21 = vld [vmem:[#allocation11 + $0x1a8] sm:$0xff] }
 0x1ec   : > { %v4982_v40 = vsub.f32 %v4917_v39, %v791_v37  ;;  %838 = vadd.xlane.f32.xlu0 %v822_v38  ;;  %v825_v53 = vmul.f32 %v4985_v42, %v4985_v42  ;;  %1538 = vmatprep.subr.bf16.mxu1 %v3460_v35 }
 0x1ed   : > { %v766_v41 = vpop.xlane.xlu0 %765 }
 0x1ee   : > { %v794_v43 = vmul.f32 0.0078125, %v766_v41  ;;  %v823_v45 = vmul.f32 %v4982_v40, %v4982_v40  ;;  %v3459_v41 = vcombine.low %v1110_v27, %v1114_v28 }
 0x1f0   : > { %v4992_v46 = vsub.f32 %v4924_v47, %v794_v43  ;;  %842 = vadd.xlane.f32.xlu0 %v824_v44  ;;  %840 = vadd.xlane.f32.xlu1 %v823_v45  ;;  %v3461_v43 = vcombine.low %v1111_v29, %v1115_v21  ;;  %v3462_v44 = vcombine.high %v1111_v29, %v1115_v21 }
 0x1f1   : > { %v768_v48 = vpop.xlane.xlu1 %767  ;;  %v770_v49 = vpop.xlane.xlu0 %769  ;;  %1539 = vmatpush1.bf16.msra.mxu1 %v3459_v41  ;;  %v1086_v41 = vld [vmem:[#allocation11 + $0xc0] sm:$0xff] }
 0x1f2   : > { %v795_v51 = vmul.f32 0.0078125, %v768_v48  ;;  %v796_v52 = vmul.f32 0.0078125, %v770_v49  ;;  %v826_v54 = vmul.f32 %v4992_v46, %v4992_v46  ;;  %1651 = vmatprep.subr.bf16.mxu0 %v3462_v44  ;;  %v1087_v44 = vld [vmem:[#allocation11 + $0xc8] sm:$0xff] }
 0x1f3   : > { %1652 = vmatpush1.bf16.msra.mxu0 %v3461_v43  ;;  %v1090_v43 = vld [vmem:[#allocation11 + $0xe0] sm:$0xff] }
 0x1f4   : > { %v4999_v55 = vsub.f32 %v4931_v56, %v795_v51  ;;  %v5002_v57 = vsub.f32 %v4927_v50, %v796_v52  ;;  %844 = vadd.xlane.f32.xlu1 %v825_v53  ;;  %846 = vadd.xlane.f32.xlu0 %v826_v54  ;;  %v1102_v52 = vld [vmem:[#allocation11 + $0x140] sm:$0xff]  ;;  %v1103_v54 = vld [vmem:[#allocation11 + $0x148] sm:$0xff] }
 0x1f5   : > { %v772_v58 = vpop.xlane.xlu1 %771  ;;  %v774_v59 = vpop.xlane.xlu0 %773  ;;  %v1106_v53 = vld [vmem:[#allocation11 + $0x160] sm:$0xff] }
 0x1f6   : > { %v797_v60 = vmul.f32 0.0078125, %v772_v58  ;;  %v798_v61 = vmul.f32 0.0078125, %v774_v59  ;;  %v827_v62 = vmul.f32 %v4999_v55, %v4999_v55  ;;  %v828_v63 = vmul.f32 %v5002_v57, %v5002_v57 }
 0x1f7   : > { %v3451_v0 = vcombine.low %v1102_v52, %v1106_v53 }
 0x1f8   : > { %v5009_v8 = vsub.f32 %v4938_v1, %v797_v60  ;;  %v5012_v9 = vsub.f32 %v4941_v2, %v798_v61  ;;  %848 = vadd.xlane.f32.xlu1 %v827_v62  ;;  %850 = vadd.xlane.f32.xlu0 %v828_v63  ;;  %v3452_v60 = vcombine.high %v1102_v52, %v1106_v53  ;;  %v1107_v61 = vld [vmem:[#allocation11 + $0x168] sm:$0xff] }
 0x1f9   : > { %v776_v12 = vpop.xlane.xlu1 %775  ;;  %v778_v14 = vpop.xlane.xlu0 %777  ;;  %v3453_v3 = vcombine.low %v1103_v54, %v1107_v61  ;;  %v3454_v4 = vcombine.high %v1103_v54, %v1107_v61  ;;  %v1082_v61 = vld [vmem:[#allocation11 + $0xa0] sm:$0xff] }
 0x1fa   : > { %v799_v17 = vmul.f32 0.0078125, %v776_v12  ;;  %v800_v19 = vmul.f32 0.0078125, %v778_v14  ;;  %v829_v22 = vmul.f32 %v5009_v8, %v5009_v8  ;;  %v830_v23 = vmul.f32 %v5012_v9, %v5012_v9  ;;  %1540 = vmatprep.subr.bf16.mxu1 %v3452_v60  ;;  %v1094_v14 = vld [vmem:[#allocation11 + $0x100] sm:$0xff] }
 0x1fb   : > { %1541 = vmatpush1.bf16.msra.mxu1 %v3451_v0  ;;  %1653 = vmatprep.subr.bf16.mxu0 %v3454_v4  ;;  %v3443_v28 = vcombine.low %v1094_v14, %v1098_v15  ;;  %v1078_v60 = vld [vmem:[#allocation11 + $0x80] sm:$0xff]  ;;  %v1083_v0 = vld [vmem:[#allocation11 + $0xa8] sm:$0xff] }
 0x1fc   : > { %v5019_v30 = vsub.f32 %v4949_v10, %v799_v17  ;;  %v5022_v32 = vsub.f32 %v4944_v5, %v800_v19  ;;  %852 = vadd.xlane.f32.xlu1 %v829_v22  ;;  %854 = vadd.xlane.f32.xlu0 %v830_v23  ;;  %v3444_v22 = vcombine.high %v1094_v14, %v1098_v15  ;;  %v1099_v23 = vld [vmem:[#allocation11 + $0x128] sm:$0xff] }
 0x1fd   : > { %v780_v37 = vpop.xlane.xlu1 %779  ;;  %v782_v38 = vpop.xlane.xlu0 %781  ;;  %1654 = vmatpush1.bf16.msra.mxu0 %v3453_v3  ;;  %v3445_v29 = vcombine.low %v1095_v16, %v1099_v23  ;;  %v3446_v35 = vcombine.high %v1095_v16, %v1099_v23  ;;  %v3427_v3 = vcombine.low %v1078_v60, %v1082_v61  ;;  %v1075_v15 = vld [vmem:[#allocation11 + $0x68] sm:$0xff] }
 0x1fe   : > { %v801_v45 = vmul.f32 0.0078125, %v780_v37  ;;  %v802_v48 = vmul.f32 0.0078125, %v782_v38  ;;  %v831_v49 = vmul.f32 %v5019_v30, %v5019_v30  ;;  %v832_v51 = vmul.f32 %v5022_v32, %v5022_v32  ;;  %1542 = vmatprep.subr.bf16.mxu1 %v3444_v22 }
 0x1ff   : > { %1543 = vmatpush1.bf16.msra.mxu1 %v3443_v28  ;;  %1655 = vmatprep.subr.bf16.mxu0 %v3446_v35  ;;  %v1066_v28 = vld [vmem:[#allocation11 + $0x20] sm:$0xff] }
 0x200   : > { %v5029_v58 = vsub.f32 %v4952_v13, %v801_v45  ;;  %v5032_v59 = vsub.f32 %v4957_v18, %v802_v48  ;;  %856 = vadd.xlane.f32.xlu1 %v831_v49  ;;  %858 = vadd.xlane.f32.xlu0 %v832_v51  ;;  %v3436_v48 = vcombine.high %v1086_v41, %v1090_v43  ;;  %v1091_v49 = vld [vmem:[#allocation11 + $0xe8] sm:$0xff] }
 0x201   : > { %v784_v62 = vpop.xlane.xlu1 %783  ;;  %v786_v63 = vpop.xlane.xlu0 %785  ;;  %1656 = vmatpush1.bf16.msra.mxu0 %v3445_v29  ;;  %v3435_v51 = vcombine.low %v1086_v41, %v1090_v43  ;;  %v3437_v52 = vcombine.low %v1087_v44, %v1091_v49  ;;  %v3438_v53 = vcombine.high %v1087_v44, %v1091_v49  ;;  %v1063_v29 = vld [vmem:[#allocation11 + $0x8] sm:$0xff]  ;;  %v4654_v43 = vmov 0   ;;  %v5055_v44 = vld [vmem:[#allocation11 + $0x1d0] sm:$0xff] }
 0x202   : > { %v803_v6 = vmul.f32 0.0078125, %v784_v62  ;;  %v804_v7 = vmul.f32 0.0078125, %v786_v63  ;;  %v833_v11 = vmul.f32 %v5029_v58, %v5029_v58  ;;  %v834_v12 = vmul.f32 %v5032_v59, %v5032_v59  ;;  %1544 = vmatprep.subr.bf16.mxu1 %v3436_v48  ;;  %v1079_v62 = vld [vmem:[#allocation11 + $0x88] sm:$0xff]  ;;  %1568 = vmatprep.mubr.bf16.mxu1 %v4654_v43  ;;  %v5057_v48 = vld [vmem:[#allocation11 + $0x1f0] sm:$0xff] }
 0x203   : > { %1545 = vmatpush1.bf16.msra.mxu1 %v3435_v51  ;;  %1657 = vmatprep.subr.bf16.mxu0 %v3438_v53  ;;  %v3428_v63 = vcombine.high %v1078_v60, %v1082_v61  ;;  %v3429_v4 = vcombine.low %v1079_v62, %v1083_v0  ;;  %v3471_v49 = vcombine.low %v5055_v44, %v5057_v48  ;;  %v5065_v53 = vld [vmem:[#allocation11 + $0x1f8] sm:$0xff] }
 0x204   : > { %v5039_v17 = vsub.f32 %v4965_v24, %v803_v6  ;;  %v5042_v19 = vsub.f32 %v4960_v20, %v804_v7  ;;  %860 = vadd.xlane.f32.xlu1 %v833_v11  ;;  %862 = vadd.xlane.f32.xlu0 %v834_v12  ;;  %v3430_v6 = vcombine.high %v1079_v62, %v1083_v0  ;;  %v1070_v7 = vld [vmem:[#allocation11 + $0x40] sm:$0xff]  ;;  %v1071_v12 = vld [vmem:[#allocation11 + $0x48] sm:$0xff] }
 0x205   : > { %v788_v27 = vpop.xlane.xlu1 %787  ;;  %1658 = vmatpush1.bf16.msra.mxu0 %v3437_v52  ;;  %1546 = vmatprep.subr.bf16.mxu1 %v3428_v63  ;;  %v1074_v11 = vld [vmem:[#allocation11 + $0x60] sm:$0xff]  ;;  %v3421_v22 = vcombine.low %v1071_v12, %v1075_v15  ;;  %v3422_v23 = vcombine.high %v1071_v12, %v1075_v15  ;;  %v3472_v51 = vcombine.high %v5055_v44, %v5057_v48  ;;  %v5063_v52 = vld [vmem:[#allocation11 + $0x1d8] sm:$0xff] }
 0x206   : > { %v805_v21 = vmul.f32 0.0078125, %v788_v27  ;;  %v835_v37 = vmul.f32 %v5039_v17, %v5039_v17  ;;  %v836_v38 = vmul.f32 %v5042_v19, %v5042_v19  ;;  %1659 = vmatprep.subr.bf16.mxu0 %v3430_v6  ;;  %v3420_v14 = vcombine.high %v1070_v7, %v1074_v11  ;;  %v1062_v27 = vld [vmem:[#allocation11] sm:$0xff]  ;;  %1681 = vmatprep.mubr.bf16.mxu0 %v4654_v43  ;;  %v1105_v44 = vld [vmem:[#allocation11 + $0x158] sm:$0xff] }
 0x207   : > { %1547 = vmatpush1.bf16.msra.mxu1 %v3427_v3  ;;  %v3419_v16 = vcombine.low %v1070_v7, %v1074_v11  ;;  %v3412_v35 = vcombine.high %v1062_v27, %v1066_v28  ;;  %v3474_v60 = vcombine.high %v5063_v52, %v5065_v53  ;;  %v1109_v48 = vld [vmem:[#allocation11 + $0x178] sm:$0xff] }
 0x208   : > { %v5049_v45 = vsub.f32 %v4968_v26, %v805_v21  ;;  %864 = vadd.xlane.f32.xlu1 %v835_v37  ;;  %866 = vadd.xlane.f32.xlu0 %v836_v38  ;;  %v1067_v21 = vld [vmem:[#allocation11 + $0x28] sm:$0xff]  ;;  %v3411_v37 = vcombine.low %v1062_v27, %v1066_v28 }
 0x209   : > { %1660 = vmatpush1.bf16.msra.mxu0 %v3429_v4  ;;  %1548 = vmatprep.subr.bf16.mxu1 %v3420_v14  ;;  %v3413_v38 = vcombine.low %v1063_v29, %v1067_v21  ;;  %v3414_v41 = vcombine.high %v1063_v29, %v1067_v21 }
 0x20a   : > { %v837_v54 = vmul.f32 %v5049_v45, %v5049_v45  ;;  %1661 = vmatprep.subr.bf16.mxu0 %v3422_v23 }
 0x20b   : > { %1549 = vmatpush1.bf16.msra.mxu1 %v3419_v16 }
 0x20c   : > { %868 = vadd.xlane.f32.xlu1 %v837_v54  ;;  %1550 = vmatprep.subr.bf16.mxu1 %v3412_v35  ;;  %v3473_v54 = vcombine.low %v5063_v52, %v5065_v53 }
 0x20d   : > { %1662 = vmatpush1.bf16.msra.mxu0 %v3421_v22 }
 0x20e   : > { %1663 = vmatprep.subr.bf16.mxu0 %v3414_v41 }
 0x20f   : > { %1551 = vmatpush1.bf16.msra.mxu1 %v3411_v37 }
 0x210   : > { %1762 = vmatprep.subr.bf16.mxu1 %v3472_v51 }
 0x211   : > { %1664 = vmatpush1.bf16.msra.mxu0 %v3413_v38 }
 0x212   : > { %1875 = vmatprep.subr.bf16.mxu0 %v3474_v60 }
 0x275   : > { %v839_v61 = vpop.xlane.xlu0 %838 }
 0x276   : > { %v870_v62 = vmul.f32 0.0078125, %v839_v61 }
 0x278   : > { %v902_v63 = vadd.f32 1e-06, %v870_v62 }
 0x279   : > { %v841_v0 = vpop.xlane.xlu1 %840  ;;  %v843_v3 = vpop.xlane.xlu0 %842 }
 0x27a   : > { %v871_v4 = vmul.f32 0.0078125, %v841_v0  ;;  %v872_v6 = vmul.f32 0.0078125, %v843_v3  ;;  %4114 = vrsqrt.f32 %v902_v63 }
 0x27c   : > { %v903_v7 = vadd.f32 1e-06, %v871_v4  ;;  %v904_v11 = vadd.f32 1e-06, %v872_v6 }
 0x27d   : > { %v845_v12 = vpop.xlane.xlu1 %844  ;;  %v847_v14 = vpop.xlane.xlu0 %846 }
 0x27e   : > { %4116 = vrsqrt.f32 %v903_v7  ;;  %v873_v15 = vmul.f32 0.0078125, %v845_v12  ;;  %v874_v16 = vmul.f32 0.0078125, %v847_v14 }
 0x27f   : > { %4118 = vrsqrt.f32 %v904_v11 }
 0x280   : > { %v905_v22 = vadd.f32 1e-06, %v873_v15  ;;  %v906_v23 = vadd.f32 1e-06, %v874_v16 }
 0x281   : > { %v849_v27 = vpop.xlane.xlu1 %848  ;;  %v851_v28 = vpop.xlane.xlu0 %850 }
 0x282   : > { %4120 = vrsqrt.f32 %v905_v22  ;;  %v875_v29 = vmul.f32 0.0078125, %v849_v27  ;;  %v876_v35 = vmul.f32 0.0078125, %v851_v28 }
 0x283   : > { %4122 = vrsqrt.f32 %v906_v23 }
 0x284   : > { %v907_v21 = vadd.f32 1e-06, %v875_v29  ;;  %v908_v37 = vadd.f32 1e-06, %v876_v35 }
 0x285   : > { %v853_v38 = vpop.xlane.xlu1 %852  ;;  %v855_v41 = vpop.xlane.xlu0 %854 }
 0x286   : > { %4124 = vrsqrt.f32 %v907_v21  ;;  %v877_v51 = vmul.f32 0.0078125, %v853_v38  ;;  %v878_v60 = vmul.f32 0.0078125, %v855_v41 }
 0x287   : > { %v4115_v61 = vpop.eup %4114  ;;  %4126 = vrsqrt.f32 %v908_v37 }
 0x288   : > { %v909_v62 = vadd.f32 1e-06, %v877_v51  ;;  %v910_v63 = vadd.f32 1e-06, %v878_v60  ;;  %v934_v11 = vmul.f32 %v4115_v61, %v4974_v33 }
 0x289   : > { %v857_v0 = vpop.xlane.xlu1 %856  ;;  %v859_v3 = vpop.xlane.xlu0 %858 }
 0x28a   : > { %4128 = vrsqrt.f32 %v909_v62  ;;  %v879_v4 = vmul.f32 0.0078125, %v857_v0  ;;  %v880_v6 = vmul.f32 0.0078125, %v859_v3 }
 0x28b   : > { %v4117_v7 = vpop.eup %4116  ;;  %4130 = vrsqrt.f32 %v910_v63 }
 0x28c   : > { %v4119_v12 = vpop.eup %4118  ;;  %v935_v14 = vmul.f32 %v4117_v7, %v4982_v40  ;;  %v911_v15 = vadd.f32 1e-06, %v879_v4  ;;  %v912_v16 = vadd.f32 1e-06, %v880_v6  ;;  %v1112_v6 = vld [vmem:[#allocation11 + $0x190] sm:$0xff] }
 0x28d   : > { %v861_v22 = vpop.xlane.xlu1 %860  ;;  %v863_v23 = vpop.xlane.xlu0 %862  ;;  %v936_v21 = vmul.f32 %v4119_v12, %v4977_v36 }
 0x28e   : > { %v3663_v27 = vpack.c.bf16 %v935_v14, %v934_v11  ;;  %4132 = vrsqrt.f32 %v911_v15  ;;  %v881_v28 = vmul.f32 0.0078125, %v861_v22  ;;  %v882_v29 = vmul.f32 0.0078125, %v863_v23  ;;  %v1113_v15 = vld [vmem:[#allocation11 + $0x198] sm:$0xff] }
 0x28f   : > { %v4121_v35 = vpop.eup %4120  ;;  %4134 = vrsqrt.f32 %v912_v16  ;;  %v1117_v16 = vld [vmem:[#allocation11 + $0x1b8] sm:$0xff] }
 0x290   : > { %v4123_v37 = vpop.eup %4122  ;;  %3664 = vst [vmem:[#allocation3] sm:$0xff] %v3663_v27   ;;  %v937_v38 = vmul.f32 %v4121_v35, %v4985_v42  ;;  %v913_v33 = vadd.f32 1e-06, %v881_v28  ;;  %v914_v41 = vadd.f32 1e-06, %v882_v29  ;;  %v1116_v42 = vld [vmem:[#allocation11 + $0x1b0] sm:$0xff] }
 0x291   : > { %v865_v40 = vpop.xlane.xlu1 %864  ;;  %v867_v51 = vpop.xlane.xlu0 %866  ;;  %v938_v0 = vmul.f32 %v4123_v37, %v4992_v46  ;;  %v3464_v27 = vcombine.high %v1112_v6, %v1116_v42  ;;  %v1104_v29 = vld [vmem:[#allocation11 + $0x150] sm:$0xff]  ;;  %v3466_v37 = vcombine.high %v1113_v15, %v1117_v16 }
 0x292   : > { %v3668_v60 = vpack.c.bf16 %v937_v38, %v936_v21  ;;  %4136 = vrsqrt.f32 %v913_v33  ;;  %v883_v61 = vmul.f32 0.0078125, %v865_v40  ;;  %v884_v62 = vmul.f32 0.0078125, %v867_v51  ;;  %v1108_v35 = vld [vmem:[#allocation11 + $0x170] sm:$0xff] }
 0x293   : > { %v4125_v63 = vpop.eup %4124  ;;  %4138 = vrsqrt.f32 %v914_v41  ;;  %v3456_v33 = vcombine.high %v1104_v29, %v1108_v35  ;;  %v3465_v51 = vcombine.low %v1113_v15, %v1117_v16  ;;  %v1080_v15 = vld [vmem:[#allocation11 + $0x90] sm:$0xff] }
 0x294   : > { %3747 = vst [vmem:[#allocation3 + $0x8] sm:$0xff] %v3668_v60   ;;  %v939_v3 = vmul.f32 %v4125_v63, %v4999_v55  ;;  %v915_v36 = vadd.f32 1e-06, %v883_v61  ;;  %v916_v4 = vadd.f32 1e-06, %v884_v62  ;;  %v4127_v7 = vpop.eup %4126  ;;  %v1096_v60 = vld [vmem:[#allocation11 + $0x110] sm:$0xff] }
 0x295   : > { %v869_v11 = vpop.xlane.xlu1 %868  ;;  %v940_v46 = vmul.f32 %v4127_v7, %v5002_v57  ;;  %v3463_v57 = vcombine.low %v1112_v6, %v1116_v42  ;;  %v1100_v61 = vld [vmem:[#allocation11 + $0x130] sm:$0xff]  ;;  %v1097_v63 = vld [vmem:[#allocation11 + $0x118] sm:$0xff]  ;;  %v3457_v42 = vcombine.low %v1105_v44, %v1109_v48 }
 0x296   : > { %v3673_v12 = vpack.c.bf16 %v939_v3, %v938_v0  ;;  %4140 = vrsqrt.f32 %v915_v36  ;;  %v885_v14 = vmul.f32 0.0078125, %v869_v11  ;;  %v1101_v0 = vld [vmem:[#allocation11 + $0x138] sm:$0xff]  ;;  %v1092_v6 = vld [vmem:[#allocation11 + $0xf0] sm:$0xff] }
 0x297   : > { %v4129_v22 = vpop.eup %4128  ;;  %v5077_v23 = vld [vmem:[#allocation3] sm:$0xff]   ;;  %4142 = vrsqrt.f32 %v916_v4  ;;  %v1088_v4 = vld [vmem:[#allocation11 + $0xd0] sm:$0xff]  ;;  %v3450_v11 = vcombine.high %v1097_v63, %v1101_v0 }
 0x298   : > { %3748 = vst [vmem:[#allocation3 + $0x10] sm:$0xff] %v3673_v12   ;;  %v941_v55 = vmul.f32 %v4129_v22, %v5009_v8  ;;  %v917_v28 = vadd.f32 1e-06, %v885_v14  ;;  %v4131_v21 = vpop.eup %4130  ;;  %1569 = vmatmul.mubr.bf16.vlgmr.msra.gmra.mxu1 %v5077_v23  ;;  %1682 = vmatmul.mubr.bf16.vlgmr.msra.gmra.mxu0 %v5077_v23 }
 0x299   : > { %1763 = vmatpush1.bf16.msra.mxu1 %v3471_v49  ;;  %1578 = vmatprep.mubr.bf16.mxu1 %v4654_v43  ;;  %v942_v41 = vmul.f32 %v4131_v21, %v5012_v9  ;;  %v3455_v9 = vcombine.low %v1104_v29, %v1108_v35  ;;  %v1081_v21 = vld [vmem:[#allocation11 + $0x98] sm:$0xff] }
 0x29a   : > { %v3678_v38 = vpack.c.bf16 %v941_v55, %v940_v46  ;;  %4144 = vrsqrt.f32 %v917_v28  ;;  %1691 = vmatprep.mubr.bf16.mxu0 %v4654_v43  ;;  %1764 = vmatprep.subr.bf16.mxu1 %v3464_v27  ;;  %v1084_v27 = vld [vmem:[#allocation11 + $0xb0] sm:$0xff]  ;;  %v3449_v46 = vcombine.low %v1097_v63, %v1101_v0  ;;  %v1089_v55 = vld [vmem:[#allocation11 + $0xd8] sm:$0xff] }
 0x29b   : > { %v4133_v8 = vpop.eup %4132  ;;  %1876 = vmatpush1.bf16.msra.mxu0 %v3473_v54  ;;  %v5093_v36 = vld [vmem:[#allocation3 + $0x8] sm:$0xff]   ;;  %v3448_v54 = vcombine.high %v1096_v60, %v1100_v61  ;;  %v1093_v28 = vld [vmem:[#allocation11 + $0xf8] sm:$0xff]  ;;  %v1064_v63 = vld [vmem:[#allocation11 + $0x10] sm:$0xff] }
 0x29c   : > { %3749 = vst [vmem:[#allocation3 + $0x18] sm:$0xff] %v3678_v38   ;;  %v943_v40 = vmul.f32 %v4133_v8, %v5019_v30  ;;  %v4135_v49 = vpop.eup %4134  ;;  %1877 = vmatprep.subr.bf16.mxu0 %v3466_v37  ;;  %v3458_v30 = vcombine.high %v1105_v44, %v1109_v48  ;;  %v1085_v37 = vld [vmem:[#allocation11 + $0xb8] sm:$0xff]  ;;  %v3439_v8 = vcombine.low %v1088_v4, %v1092_v6  ;;  %v1076_v44 = vld [vmem:[#allocation11 + $0x70] sm:$0xff] }
 0x29d   : > { %1765 = vmatpush1.bf16.msra.mxu1 %v3463_v57  ;;  %v944_v52 = vmul.f32 %v4135_v49, %v5022_v32  ;;  %v3447_v32 = vcombine.low %v1096_v60, %v1100_v61  ;;  %v3434_v48 = vcombine.high %v1081_v21, %v1085_v37  ;;  %v3431_v60 = vcombine.low %v1080_v15, %v1084_v27  ;;  %v1073_v61 = vld [vmem:[#allocation11 + $0x58] sm:$0xff]  ;;  %v1068_v0 = vld [vmem:[#allocation11 + $0x30] sm:$0xff] }
 0x29e   : > { %v3683_v62 = vpack.c.bf16 %v943_v40, %v942_v41  ;;  %1766 = vmatprep.subr.bf16.mxu1 %v3456_v33  ;;  %v3432_v33 = vcombine.high %v1080_v15, %v1084_v27  ;;  %v3441_v40 = vcombine.low %v1089_v55, %v1093_v28  ;;  %v4085_v15 = vld [vmem:[#allocation13 + $0x30] sm:$0xff]   ;;  %v4091_v27 = vld [vmem:[#allocation13 + $0xf8] sm:$0xff]  }
 0x29f   : > { %v4137_v3 = vpop.eup %4136  ;;  %1878 = vmatpush1.bf16.msra.mxu0 %v3465_v51  ;;  %v5103_v57 = vld [vmem:[#allocation3 + $0x10] sm:$0xff]  }
 0x2a0   : > { %3750 = vst [vmem:[#allocation3 + $0x20] sm:$0xff] %v3683_v62   ;;  %v945_v53 = vmul.f32 %v4137_v3, %v5029_v58  ;;  %v4139_v7 = vpop.eup %4138  ;;  %1579 = vmatmul.mubr.bf16.gmra.mxu1 %v5093_v36  ;;  %1692 = vmatmul.mubr.bf16.gmra.mxu0 %v5093_v36  ;;  %v3440_v58 = vcombine.high %v1088_v4, %v1092_v6  ;;  %v1072_v51 = vld [vmem:[#allocation11 + $0x50] sm:$0xff]  ;;  %v1077_v62 = vld [vmem:[#allocation11 + $0x78] sm:$0xff] }
 0x2a1   : > { %1588 = vmatprep.mubr.bf16.mxu1 %v4654_v43  ;;  %1701 = vmatprep.mubr.bf16.mxu0 %v4654_v43  ;;  %v946_v16 = vmul.f32 %v4139_v7, %v5032_v59  ;;  %v3442_v59 = vcombine.high %v1089_v55, %v1093_v28  ;;  %v1065_v3 = vld [vmem:[#allocation11 + $0x18] sm:$0xff]  ;;  %v3425_v4 = vcombine.low %v1073_v61, %v1077_v62  ;;  %v4088_v55 = vld [vmem:[#allocation13 + $0x60] sm:$0xff]  }
 0x2a2   : > { %v3688_v12 = vpack.c.bf16 %v945_v53, %v944_v52  ;;  %1767 = vmatpush1.bf16.msra.mxu1 %v3455_v9  ;;  %1879 = vmatprep.subr.bf16.mxu0 %v3458_v30  ;;  %v1069_v9 = vld [vmem:[#allocation11 + $0x38] sm:$0xff]  ;;  %v3423_v52 = vcombine.low %v1072_v51, %v1076_v44  ;;  %v3426_v53 = vcombine.high %v1073_v61, %v1077_v62  ;;  %v4089_v28 = vld [vmem:[#allocation13 + $0x20] sm:$0xff]  }
 0x2a3   : > { %v4141_v14 = vpop.eup %4140  ;;  %1768 = vmatprep.subr.bf16.mxu1 %v3448_v54  ;;  %1880 = vmatpush1.bf16.msra.mxu0 %v3457_v42  ;;  %v4077_v30 = vld [vmem:[#allocation3 + $0x18] sm:$0xff]   ;;  %v3416_v54 = vcombine.high %v1064_v63, %v1068_v0  ;;  %v3418_v6 = vcombine.high %v1065_v3, %v1069_v9  ;;  %v3415_v42 = vcombine.low %v1064_v63, %v1068_v0  ;;  %v4108_v63 = vld [vmem:[#allocation13 + $0x40] sm:$0xff]  }
 0x2a4   : > { %3751 = vst [vmem:[#allocation3 + $0x28] sm:$0xff] %v3688_v12   ;;  %v947_v22 = vmul.f32 %v4141_v14, %v5039_v17  ;;  %v4143_v29 = vpop.eup %4142  ;;  %1881 = vmatprep.subr.bf16.mxu0 %v3450_v11  ;;  %v3417_v7 = vcombine.low %v1065_v3, %v1069_v9  ;;  %v4112_v0 = vld [vmem:[#allocation13 + $0xc0] sm:$0xff]  }
 0x2a5   : > { %v948_v17 = vmul.f32 %v4143_v29, %v5042_v19  ;;  %v3424_v19 = vcombine.high %v1072_v51, %v1076_v44  ;;  %v4092_v29 = vld [vmem:[#allocation13 + $0x18] sm:$0xff]   ;;  %v4097_v51 = vld [vmem:[#allocation13 + $0x10] sm:$0xff]   ;;  %v5148_v3 = vld [vmem:[%s6040_s5] sm:$0xff] }
 0x2a6   : > { %v3693_v35 = vpack.c.bf16 %v947_v22, %v946_v16  ;;  %1769 = vmatpush1.bf16.msra.mxu1 %v3447_v32  ;;  %v4086_v16 = vld [vmem:[#allocation13 + $0x68] sm:$0xff]   ;;  %v4107_v44 = vld [vmem:[#allocation13 + $0x90] sm:$0xff]   ;;  %v4109_v9 = vld [vmem:[#allocation13] sm:$0xff]  }
 0x2a7   : > { %v4145_v38 = vpop.eup %4144  ;;  %1770 = vmatprep.subr.bf16.mxu1 %v3440_v58  ;;  %1882 = vmatpush1.bf16.msra.mxu0 %v3449_v46  ;;  %v4078_v11 = vld [vmem:[#allocation3 + $0x20] sm:$0xff]   ;;  %v4084_v58 = vld [vmem:[#allocation13 + $0x70] sm:$0xff]   ;;  %v4087_v22 = vld [vmem:[#allocation13 + $0x28] sm:$0xff]  }
 0x2a8   : > { %3752 = vst [vmem:[#allocation3 + $0x30] sm:$0xff] %v3693_v35   ;;  %v949_v41 = vmul.f32 %v4145_v38, %v5049_v45  ;;  %1589 = vmatmul.mubr.bf16.gmra.mxu1 %v5103_v57  ;;  %1702 = vmatmul.mubr.bf16.gmra.mxu0 %v5103_v57  ;;  %v3433_v45 = vcombine.low %v1081_v21, %v1085_v37  ;;  %v4093_v46 = vld [vmem:[#allocation13 + $0xb8] sm:$0xff]   ;;  %v4094_v35 = vld [vmem:[#allocation13 + $0xf0] sm:$0xff]   ;;  %v4098_v37 = vld [vmem:[#allocation13 + $0xe8] sm:$0xff]  }
 0x2a9   : > { %1598 = vmatprep.mubr.bf16.mxu1 %v4654_v43  ;;  %1711 = vmatprep.mubr.bf16.mxu0 %v4654_v43  ;;  %v4095_v21 = vld [vmem:[#allocation13 + $0xb0] sm:$0xff]   ;;  %v4099_v38 = vld [vmem:[#allocation13 + $0xa8] sm:$0xff]  }
 0x2aa   : > { %v3698_v49 = vpack.c.bf16 %v949_v41, %v948_v17  ;;  %1771 = vmatpush1.bf16.msra.mxu1 %v3439_v8  ;;  %1883 = vmatprep.subr.bf16.mxu0 %v3442_v59  ;;  %v4101_v8 = vld [vmem:[#allocation13 + $0xa0] sm:$0xff]   ;;  %v4105_v59 = vld [vmem:[#allocation13 + $0x98] sm:$0xff]   ;;  %v1128_v17 = vlaneseq  ;;  %v4096_v41 = vld [vmem:[#allocation13 + $0x50] sm:$0xff]  }
 0x2ab   : > { %1772 = vmatprep.subr.bf16.mxu1 %v3432_v33  ;;  %1884 = vmatpush1.bf16.msra.mxu0 %v3441_v40  ;;  %v4079_v12 = vld [vmem:[#allocation3 + $0x28] sm:$0xff]   ;;  %v4104_v33 = vld [vmem:[#allocation13 + $0xd8] sm:$0xff]   ;;  %v4106_v40 = vld [vmem:[#allocation13 + $0xd0] sm:$0xff]  }
 0x2ac   : > { %3753 = vst [vmem:[#allocation3 + $0x38] sm:$0xff] %v3698_v49   ;;  %1885 = vmatprep.subr.bf16.mxu0 %v3434_v48  ;;  %v5141_v48 = vshrl.u32 %v1128_v17, 7  ;;  %v4102_v49 = vld [vmem:[#allocation13 + $0x48] sm:$0xff]  }
 0x2ae   : > { %1773 = vmatpush1.bf16.msra.mxu1 %v3431_v60  ;;  %v4110_v60 = vld [vmem:[#allocation13 + $0xc8] sm:$0xff]   ;;  %v1130_v61 = vsub.s32 0, %v5141_v48  ;;  %v1138_v62 = vsub.s32 2, %v5141_v48 }
 0x2af   : > { %1774 = vmatprep.subr.bf16.mxu1 %v3424_v19  ;;  %1886 = vmatpush1.bf16.msra.mxu0 %v3433_v45  ;;  %v4080_v14 = vld [vmem:[#allocation3 + $0x30] sm:$0xff]   ;;  %v4103_v19 = vld [vmem:[#allocation13 + $0x8] sm:$0xff]  }
 0x2b0   : > { %1599 = vmatmul.mubr.bf16.gmra.mxu1 %v4077_v30  ;;  %1712 = vmatmul.mubr.bf16.gmra.mxu0 %v4077_v30  ;;  %v4111_v45 = vld [vmem:[#allocation13 + $0x88] sm:$0xff]  }
 0x2b1   : > { %1608 = vmatprep.mubr.bf16.mxu1 %v4654_v43  ;;  %1721 = vmatprep.mubr.bf16.mxu0 %v4654_v43 }
 0x2b2   : > { %1775 = vmatpush1.bf16.msra.mxu1 %v3423_v52  ;;  %1887 = vmatprep.subr.bf16.mxu0 %v3426_v53  ;;  %v1134_v52 = vsub.s32 1, %v5141_v48  ;;  %v1142_v53 = vsub.s32 3, %v5141_v48 }
 0x2b3   : > { %1776 = vmatprep.subr.bf16.mxu1 %v3416_v54  ;;  %1888 = vmatpush1.bf16.msra.mxu0 %v3425_v4  ;;  %v4081_v32 = vld [vmem:[#allocation3 + $0x38] sm:$0xff]   ;;  %v5153_v54 = vrot.slane %v5148_v3, %v1130_v61  ;;  %v5156_v4 = vrot.slane %v5148_v3, %v1138_v62 }
 0x2b4   : > { %1889 = vmatprep.subr.bf16.mxu0 %v3418_v6  ;;  %v5159_v6 = vrot.slane %v5148_v3, %v1134_v52 }
 0x2b6   : > { %1777 = vmatpush1.bf16.msra.mxu1 %v3415_v42  ;;  %v5162_v42 = vrot.slane %v5148_v3, %v1142_v53 }
 0x2b7   : > { %1890 = vmatpush1.bf16.msra.mxu0 %v3417_v7 }
 0x2b8   : > { %1609 = vmatmul.mubr.bf16.gmra.mxu1 %v4078_v11  ;;  %1722 = vmatmul.mubr.bf16.gmra.mxu0 %v4078_v11 }
 0x2b9   : > { %1618 = vmatprep.mubr.bf16.mxu1 %v4654_v43  ;;  %1731 = vmatprep.mubr.bf16.mxu0 %v4654_v43 }
 0x2ba   : > { %3841 = vmatprep.subr.bf16.mxu0 %v4091_v27 }
 0x2c0   : > { %1619 = vmatmul.mubr.bf16.gmra.mxu1 %v4079_v12  ;;  %1732 = vmatmul.mubr.bf16.gmra.mxu0 %v4079_v12 }
 0x2c1   : > { %1628 = vmatprep.mubr.bf16.mxu1 %v4654_v43  ;;  %1741 = vmatprep.mubr.bf16.mxu0 %v4654_v43 }
 0x2c8   : > { %1629 = vmatmul.mubr.bf16.gmra.mxu1 %v4080_v14  ;;  %1742 = vmatmul.mubr.bf16.gmra.mxu0 %v4080_v14 }
 0x2c9   : > { %1638 = vmatprep.mubr.bf16.mxu1 %v4654_v43  ;;  %1751 = vmatprep.mubr.bf16.mxu0 %v4654_v43 }
 0x2d0   : > { %1639 = vmatmul.mubr.bf16.gmra.mxu1 %v4081_v32  ;;  %1752 = vmatmul.mubr.bf16.gmra.mxu0 %v4081_v32 }
 0x2d1   : > { %1794 = vmatprep.mubr.bf16.mxu1 %v4654_v43  ;;  %1907 = vmatprep.mubr.bf16.mxu0 %v4654_v43 }
 0x2d8   : > { %1795 = vmatmul.mubr.bf16.vlgmr.msra.gmra.mxu1 %v5077_v23  ;;  %1908 = vmatmul.mubr.bf16.vlgmr.msra.gmra.mxu0 %v5077_v23  ;;  %v4082_v23 = vld [vmem:[#allocation13 + $0x78] sm:$0xff]  }
 0x2d9   : > { %1804 = vmatprep.mubr.bf16.mxu1 %v4654_v43  ;;  %1917 = vmatprep.mubr.bf16.mxu0 %v4654_v43 }
 0x2da   : > { %3777 = vmatprep.subr.bf16.mxu1 %v4082_v23  ;;  %3842 = vmatpush3.bf16.msra.mxu0 %v4093_v46 }
 0x2db   : > { %3843 = vmatprep.subr.bf16.mxu0 %v4094_v35 }
 0x2de   : > { %3844 = vmatpush3.bf16.msra.mxu0 %v4095_v21 }
 0x2df   : > { %3845 = vmatprep.subr.bf16.mxu0 %v4098_v37 }
 0x2e0   : > { %1805 = vmatmul.mubr.bf16.gmra.mxu1 %v5093_v36  ;;  %1918 = vmatmul.mubr.bf16.gmra.mxu0 %v5093_v36  ;;  %v4083_v36 = vld [vmem:[#allocation13 + $0x38] sm:$0xff]  }
 0x2e1   : > { %1814 = vmatprep.mubr.bf16.mxu1 %v4654_v43  ;;  %1927 = vmatprep.mubr.bf16.mxu0 %v4654_v43 }
 0x2e2   : > { %3778 = vmatpush3.bf16.msra.mxu1 %v4083_v36  ;;  %3846 = vmatpush3.bf16.msra.mxu0 %v4099_v38 }
 0x2e3   : > { %3779 = vmatprep.subr.bf16.mxu1 %v4084_v58 }
 0x2e6   : > { %3780 = vmatpush3.bf16.msra.mxu1 %v4085_v15 }
 0x2e7   : > { %3781 = vmatprep.subr.bf16.mxu1 %v4086_v16 }
 0x2e8   : > { %1815 = vmatmul.mubr.bf16.gmra.mxu1 %v5103_v57  ;;  %1928 = vmatmul.mubr.bf16.gmra.mxu0 %v5103_v57  ;;  %v4100_v57 = vld [vmem:[#allocation13 + $0xe0] sm:$0xff]  }
 0x2e9   : > { %1824 = vmatprep.mubr.bf16.mxu1 %v4654_v43  ;;  %1937 = vmatprep.mubr.bf16.mxu0 %v4654_v43 }
 0x2ea   : > { %3782 = vmatpush3.bf16.msra.mxu1 %v4087_v22  ;;  %3847 = vmatprep.subr.bf16.mxu0 %v4100_v57 }
 0x2eb   : > { %3783 = vmatprep.subr.bf16.mxu1 %v4088_v55  ;;  %3848 = vmatpush3.bf16.msra.mxu0 %v4101_v8 }
 0x2ec   : > { %3849 = vmatprep.subr.bf16.mxu0 %v4104_v33 }
 0x2ee   : > { %3784 = vmatpush3.bf16.msra.mxu1 %v4089_v28 }
 0x2ef   : > { %3850 = vmatpush3.bf16.msra.mxu0 %v4105_v59 }
 0x2f0   : > { %1825 = vmatmul.mubr.bf16.gmra.mxu1 %v4077_v30  ;;  %1938 = vmatmul.mubr.bf16.gmra.mxu0 %v4077_v30  ;;  %v4113_v30 = vld [vmem:[#allocation13 + $0x80] sm:$0xff]  }
 0x2f1   : > { %1834 = vmatprep.mubr.bf16.mxu1 %v4654_v43  ;;  %1947 = vmatprep.mubr.bf16.mxu0 %v4654_v43 }
 0x2f2   : > { %3851 = vmatprep.subr.bf16.mxu0 %v4106_v40 }
 0x2f3   : > { %3852 = vmatpush3.bf16.msra.mxu0 %v4107_v44 }
 0x2f4   : > { %3853 = vmatprep.subr.bf16.mxu0 %v4110_v60 }
 0x2f7   : > { %3854 = vmatpush3.bf16.msra.mxu0 %v4111_v45 }
 0x2f8   : > { %1835 = vmatmul.mubr.bf16.gmra.mxu1 %v4078_v11  ;;  %1948 = vmatmul.mubr.bf16.gmra.mxu0 %v4078_v11 }
 0x2f9   : > { %1844 = vmatprep.mubr.bf16.mxu1 %v4654_v43  ;;  %1957 = vmatprep.mubr.bf16.mxu0 %v4654_v43 }
 0x2fa   : > { %3855 = vmatprep.subr.bf16.mxu0 %v4112_v0 }
 0x2fb   : > { %3856 = vmatpush3.bf16.msra.mxu0 %v4113_v30 }
 0x300   : > { %1845 = vmatmul.mubr.bf16.gmra.mxu1 %v4079_v12  ;;  %1958 = vmatmul.mubr.bf16.gmra.mxu0 %v4079_v12 }
 0x301   : > { %1854 = vmatprep.mubr.bf16.mxu1 %v4654_v43  ;;  %1967 = vmatprep.mubr.bf16.mxu0 %v4654_v43 }
 0x308   : > { %1855 = vmatmul.mubr.bf16.gmra.mxu1 %v4080_v14  ;;  %1968 = vmatmul.mubr.bf16.gmra.mxu0 %v4080_v14 }
 0x309   : > { %1864 = vmatprep.mubr.bf16.mxu1 %v4654_v43  ;;  %1977 = vmatprep.mubr.bf16.mxu0 %v4654_v43  ;;  %v4090_v43 = vld [vmem:[#allocation13 + $0x58] sm:$0xff]  }
 0x30a   : > { %3785 = vmatprep.subr.bf16.mxu1 %v4090_v43 }
 0x30b   : > { %3786 = vmatpush3.bf16.msra.mxu1 %v4092_v29 }
 0x30c   : > { %3787 = vmatprep.subr.bf16.mxu1 %v4096_v41 }
 0x30f   : > { %3788 = vmatpush3.bf16.msra.mxu1 %v4097_v51 }
 0x310   : > { %1865 = vmatmul.mubr.bf16.gmra.mxu1 %v4081_v32  ;;  %1978 = vmatmul.mubr.bf16.gmra.mxu0 %v4081_v32 }
 0x311   : > { %3789 = vmatprep.subr.bf16.mxu1 %v4102_v49 }
 0x313   : > { %3790 = vmatpush3.bf16.msra.mxu1 %v4103_v19 }
 0x314   : > { %3791 = vmatprep.subr.bf16.mxu1 %v4108_v63 }
 0x317   : > { %3792 = vmatpush3.bf16.msra.mxu1 %v4109_v9 }
 0x318   : > { %3937 = vmatprep.subr.bf16.mxu1 %v4091_v27 }
 0x358   : > { %v1570_v7 = vpop.f32.mrf.mxu1  ;;  %v1683_v11 = vpop.f32.mrf.mxu0 }
 0x359   : > { %v5165_v12 = vadd.f32 %v1570_v7, %v5153_v54  ;;  %v5168_v14 = vadd.f32 %v1683_v11, %v5156_v4 }
 0x35a   : > { %v1572_v32 = vpop.f32.mrf.mxu1  ;;  %v1685_v23 = vpop.f32.mrf.mxu0 }
 0x35b   : > { %v3475_v36 = vmul.f32 -1.442695, %v5165_v12  ;;  %v3477_v58 = vmul.f32 -1.442695, %v5168_v14  ;;  %v5173_v15 = vadd.f32 %v1572_v32, %v5159_v6  ;;  %v5176_v16 = vadd.f32 %v1685_v23, %v5162_v42 }
 0x35c   : > { %v1574_v22 = vpop.f32.mrf.mxu1  ;;  %v1687_v27 = vpop.f32.mrf.mxu0 }
 0x35d   : > { %4146 = vpow2.f32 %v3475_v36  ;;  %v3476_v46 = vmul.f32 -1.442695, %v5173_v15  ;;  %v3478_v55 = vmul.f32 -1.442695, %v5176_v16  ;;  %v5181_v28 = vadd.f32 %v1574_v22, %v5153_v54 }
 0x35e   : > { %4148 = vpow2.f32 %v3477_v58  ;;  %v5184_v43 = vadd.f32 %v1687_v27, %v5156_v4  ;;  %v1576_v29 = vpop.f32.mrf.mxu1  ;;  %v1689_v35 = vpop.f32.mrf.mxu0  ;;  %v1146_v22 = vsub.s32 4, %v5141_v48 }
 0x35f   : > { %4150 = vpow2.f32 %v3476_v46  ;;  %v3479_v21 = vmul.f32 -1.442695, %v5181_v28  ;;  %v5188_v37 = vadd.f32 %v1576_v29, %v5159_v6  ;;  %v5191_v38 = vadd.f32 %v1689_v35, %v5162_v42 }
 0x360   : > { %4152 = vpow2.f32 %v3478_v55  ;;  %v3481_v57 = vmul.f32 -1.442695, %v5184_v43  ;;  %v1580_v8 = vpop.f32.mrf.mxu1  ;;  %v1693_v33 = vpop.f32.mrf.mxu0  ;;  %v1154_v55 = vsub.s32 6, %v5141_v48 }
 0x361   : > { %4154 = vpow2.f32 %v3479_v21  ;;  %v3480_v59 = vmul.f32 -1.442695, %v5188_v37  ;;  %v3482_v17 = vmul.f32 -1.442695, %v5191_v38  ;;  %v5197_v41 = vadd.f32 %v1580_v8, %v5153_v54 }
 0x362   : > { %4156 = vpow2.f32 %v3481_v57  ;;  %v5200_v40 = vadd.f32 %v1693_v33, %v5156_v4  ;;  %v1582_v51 = vpop.f32.mrf.mxu1  ;;  %v1695_v44 = vpop.f32.mrf.mxu0  ;;  %v1150_v57 = vsub.s32 5, %v5141_v48 }
 0x363   : > { %4158 = vpow2.f32 %v3480_v59  ;;  %v3483_v49 = vmul.f32 -1.442695, %v5197_v41  ;;  %v5204_v60 = vadd.f32 %v1582_v51, %v5159_v6  ;;  %v5207_v19 = vadd.f32 %v1695_v44, %v5162_v42 }
 0x364   : > { %4160 = vpow2.f32 %v3482_v17  ;;  %v3485_v45 = vmul.f32 -1.442695, %v5200_v40  ;;  %v1584_v61 = vpop.f32.mrf.mxu1  ;;  %v1697_v62 = vpop.f32.mrf.mxu0  ;;  %v1158_v59 = vsub.s32 7, %v5141_v48 }
 0x365   : > { %4162 = vpow2.f32 %v3483_v49  ;;  %v3484_v63 = vmul.f32 -1.442695, %v5204_v60  ;;  %v3486_v0 = vmul.f32 -1.442695, %v5207_v19  ;;  %v5213_v9 = vadd.f32 %v1584_v61, %v5153_v54 }
 0x366   : > { %4164 = vpow2.f32 %v3485_v45  ;;  %v5216_v30 = vadd.f32 %v1697_v62, %v5156_v4  ;;  %v1586_v52 = vpop.f32.mrf.mxu1  ;;  %v1699_v53 = vpop.f32.mrf.mxu0  ;;  %v5233_v62 = vrot.slane %v5148_v3, %v1146_v22 }
 0x367   : > { %4166 = vpow2.f32 %v3484_v63  ;;  %v3487_v7 = vmul.f32 -1.442695, %v5213_v9  ;;  %v5220_v11 = vadd.f32 %v1586_v52, %v5159_v6  ;;  %v5223_v32 = vadd.f32 %v1699_v53, %v5162_v42 }
 0x368   : > { %4168 = vpow2.f32 %v3486_v0  ;;  %v3489_v23 = vmul.f32 -1.442695, %v5216_v30  ;;  %v1590_v36 = vpop.f32.mrf.mxu1  ;;  %v1703_v58 = vpop.f32.mrf.mxu0  ;;  %v5236_v63 = vrot.slane %v5148_v3, %v1154_v55  ;;  %v5248_v55 = vrot.slane %v5148_v3, %v1158_v59 }
 0x369   : > { %4170 = vpow2.f32 %v3487_v7  ;;  %v3488_v27 = vmul.f32 -1.442695, %v5220_v11  ;;  %v3490_v46 = vmul.f32 -1.442695, %v5223_v32  ;;  %v5239_v53 = vadd.f32 %v1590_v36, %v5153_v54 }
 0x36a   : > { %v4147_v29 = vpop.eup %4146  ;;  %4172 = vpow2.f32 %v3489_v23  ;;  %v1592_v35 = vpop.f32.mrf.mxu1  ;;  %v5242_v23 = vrot.slane %v5148_v3, %v1150_v57  ;;  %v5245_v22 = vadd.f32 %v1703_v58, %v5156_v4 }
 0x36b   : > { %v1705_v21 = vpop.f32.mrf.mxu0  ;;  %v4149_v8 = vpop.eup %4148  ;;  %v2180_v33 = vadd.f32 1.0, %v4147_v29  ;;  %4174 = vpow2.f32 %v3488_v27  ;;  %v5251_v36 = vadd.f32 %v1592_v35, %v5159_v6  ;;  %v5263_v35 = vmul.f32 -1.442695, %v5239_v53 }
 0x36c   : > { %v4151_v17 = vpop.eup %4150  ;;  %v2182_v51 = vadd.f32 1.0, %v4149_v8  ;;  %4176 = vpow2.f32 %v3490_v46  ;;  %v1594_v44 = vpop.f32.mrf.mxu1 }
 0x36d   : > { %v1707_v49 = vpop.f32.mrf.mxu0  ;;  %v4153_v45 = vpop.eup %4152  ;;  %4178 = vrcp.f32 %v2180_v33  ;;  %v2181_v61 = vadd.f32 1.0, %v4151_v17  ;;  %v5254_v33 = vadd.f32 %v1705_v21, %v5162_v42  ;;  %v5257_v58 = vadd.f32 %v1594_v44, %v5153_v54 }
 0x36e   : > { %v4155_v0 = vpop.eup %4154  ;;  %4180 = vrcp.f32 %v2182_v51  ;;  %v2183_v52 = vadd.f32 1.0, %v4153_v45  ;;  %v1596_v48 = vpop.f32.mrf.mxu1  ;;  %v5260_v3 = vadd.f32 %v1707_v49, %v5156_v4  ;;  %v3493_v44 = vmul.f32 -1.442695, %v5245_v22 }
 0x36f   : > { %v1709_v7 = vpop.f32.mrf.mxu0  ;;  %v4157_v27 = vpop.eup %4156  ;;  %4182 = vrcp.f32 %v2181_v61  ;;  %v2184_v46 = vadd.f32 1.0, %v4155_v0  ;;  %v5266_v21 = vadd.f32 %v1596_v48, %v5159_v6  ;;  %v5276_v26 = vmul.f32 -1.442695, %v5254_v33 }
 0x370   : > { %v4159_v29 = vpop.eup %4158  ;;  %4184 = vrcp.f32 %v2183_v52  ;;  %v2186_v8 = vadd.f32 1.0, %v4157_v27  ;;  %v1600_v57 = vpop.f32.mrf.mxu1  ;;  %6150 = vst [vmem:[#allocation40_spill] sm:$0xff] %v5260_v3 }
 0x371   : > { %v1713_v17 = vpop.f32.mrf.mxu0  ;;  %v4161_v51 = vpop.eup %4160  ;;  %4186 = vrcp.f32 %v2184_v46  ;;  %v2185_v45 = vadd.f32 1.0, %v4159_v29  ;;  %6151 = vst [vmem:[#allocation41_spill] sm:$0xff] %v5266_v21  ;;  %v5270_v29 = vadd.f32 %v1709_v7, %v5162_v42  ;;  %v5282_v7 = vmul.f32 -1.442695, %v5260_v3 }
 0x372   : > { %v4163_v59 = vpop.eup %4162  ;;  %4188 = vrcp.f32 %v2186_v8  ;;  %v2187_v61 = vadd.f32 1.0, %v4161_v51  ;;  %v1602_v0 = vpop.f32.mrf.mxu1  ;;  %v5273_v51 = vmul.f32 -1.442695, %v5251_v36  ;;  %v5288_v13 = vadd.f32 %v1600_v57, %v5153_v54 }
 0x373   : > { %v1715_v52 = vpop.f32.mrf.mxu0  ;;  %v4165_v27 = vpop.eup %4164  ;;  %4190 = vrcp.f32 %v2185_v45  ;;  %v2188_v46 = vadd.f32 1.0, %v4163_v59  ;;  %6152 = vst [vmem:[#allocation42_spill] sm:$0xff] %v5270_v29  ;;  %v5279_v59 = vmul.f32 -1.442695, %v5257_v58  ;;  %v5294_v1 = vadd.f32 %v1713_v17, %v5156_v4 }
 0x374   : > { %v4167_v49 = vpop.eup %4166  ;;  %4192 = vrcp.f32 %v2187_v61  ;;  %v2190_v8 = vadd.f32 1.0, %v4165_v27  ;;  %v1604_v48 = vpop.f32.mrf.mxu1  ;;  %v5285_v27 = vmul.f32 -1.442695, %v5266_v21  ;;  %6153 = vst [vmem:[#allocation43_spill] sm:$0xff] %v5288_v13  ;;  %v5300_v57 = vadd.f32 %v1715_v52, %v5162_v42 }
 0x375   : > { %v1717_v20 = vpop.f32.mrf.mxu0  ;;  %v4169_v24 = vpop.eup %4168  ;;  %4194 = vrcp.f32 %v2188_v46  ;;  %v2189_v45 = vadd.f32 1.0, %v4167_v49  ;;  %v5291_v49 = vmul.f32 -1.442695, %v5270_v29  ;;  %6154 = vst [vmem:[#allocation44_spill] sm:$0xff] %v5294_v1 }
 0x376   : > { %v4171_v18 = vpop.eup %4170  ;;  %4196 = vrcp.f32 %v2190_v8  ;;  %v2191_v61 = vadd.f32 1.0, %v4169_v24  ;;  %v1606_v5 = vpop.f32.mrf.mxu1  ;;  %v5297_v8 = vadd.f32 %v1602_v0, %v5159_v6  ;;  %6156 = vst [vmem:[#allocation46_spill] sm:$0xff] %v5300_v57  ;;  %v5306_v17 = vadd.f32 %v1717_v20, %v5156_v4 }
 0x377   : > { %v1719_v10 = vpop.f32.mrf.mxu0  ;;  %v4173_v2 = vpop.eup %4172  ;;  %4198 = vrcp.f32 %v2189_v45  ;;  %v2192_v46 = vadd.f32 1.0, %v4171_v18  ;;  %v5303_v45 = vadd.f32 %v1604_v48, %v5153_v54  ;;  %v5309_v0 = vadd.f32 %v1606_v5, %v5159_v6 }
 0x378   : > { %v4175_v50 = vpop.eup %4174  ;;  %4200 = vrcp.f32 %v2191_v61  ;;  %v2194_v24 = vadd.f32 1.0, %v4173_v2  ;;  %6155 = vst [vmem:[#allocation45_spill] sm:$0xff] %v5297_v8  ;;  %v1610_v56 = vpop.f32.mrf.mxu1  ;;  %6158 = vst [vmem:[#allocation48_spill] sm:$0xff] %v5306_v17  ;;  %v5312_v52 = vadd.f32 %v1719_v10, %v5162_v42  ;;  %v5316_v48 = vmul.f32 -1.442695, %v5294_v1 }
 0x379   : > { %v1723_v47 = vpop.f32.mrf.mxu0  ;;  %v4177_v34 = vpop.eup %4176  ;;  %4202 = vrcp.f32 %v2192_v46  ;;  %v2193_v18 = vadd.f32 1.0, %v4175_v50  ;;  %6157 = vst [vmem:[#allocation47_spill] sm:$0xff] %v5303_v45  ;;  %6159 = vst [vmem:[#allocation49_spill] sm:$0xff] %v5309_v0  ;;  %v3499_v50 = vmul.f32 -1.442695, %v5288_v13  ;;  %v5319_v20 = vadd.f32 %v1610_v56, %v5153_v54 }
 0x37a   : > { %v4179_v25 = vpop.eup %4178  ;;  %4204 = vrcp.f32 %v2194_v24  ;;  %v2195_v2 = vadd.f32 1.0, %v4177_v34  ;;  %6160 = vst [vmem:[#allocation50_spill] sm:$0xff] %v5312_v52  ;;  %v1612_v61 = vpop.f32.mrf.mxu1  ;;  %v5322_v34 = vmul.f32 -1.442695, %v5297_v8  ;;  %v5325_v5 = vmul.f32 -1.442695, %v5300_v57 }
 0x37b   : > { %v1725_v39 = vpop.f32.mrf.mxu0  ;;  %v4181_v31 = vpop.eup %4180  ;;  %4206 = vrcp.f32 %v2193_v18  ;;  %6161 = vst [vmem:[#allocation51_spill] sm:$0xff] %v5319_v20  ;;  %v5328_v10 = vadd.f32 %v1723_v47, %v5156_v4  ;;  %v5332_v1 = vmul.f32 -1.442695, %v5303_v45  ;;  %v5335_v56 = vmul.f32 -1.442695, %v5306_v17 }
 0x37c   : > { %v4183_v46 = vpop.eup %4182  ;;  %4208 = vrcp.f32 %v2195_v2  ;;  %v1614_v24 = vpop.f32.mrf.mxu1  ;;  %v5338_v2 = vadd.f32 %v1612_v61, %v5159_v6  ;;  %v5341_v57 = vmul.f32 -1.442695, %v5309_v0  ;;  %v5344_v47 = vmul.f32 -1.442695, %v5312_v52 }
 0x37d   : > { %6162 = vst [vmem:[#allocation52_spill] sm:$0xff] %v5328_v10  ;;  %v1727_v18 = vpop.f32.mrf.mxu0  ;;  %v4185_v13 = vpop.eup %4184  ;;  %4210 = vpow2.f32 %v5263_v35  ;;  %v5347_v29 = vadd.f32 %v1725_v39, %v5162_v42  ;;  %v5350_v17 = vmul.f32 %v4179_v25, %v5165_v12  ;;  %v5354_v61 = vmul.f32 -1.442695, %v5319_v20 }
 0x37e   : > { %6163 = vst [vmem:[#allocation53_spill] sm:$0xff] %v5338_v2  ;;  %v4187_v8 = vpop.eup %4186  ;;  %4212 = vpow2.f32 %v3493_v44  ;;  %v1616_v35 = vpop.f32.mrf.mxu1  ;;  %v5357_v44 = vadd.f32 %v1614_v24, %v5153_v54  ;;  %v5360_v52 = vmul.f32 %v4181_v31, %v5168_v14  ;;  %v5364_v39 = vmul.f32 -1.442695, %v5328_v10 }
 0x37f   : > { %6164 = vst [vmem:[#allocation54_spill] sm:$0xff] %v5347_v29  ;;  %v1729_v45 = vpop.f32.mrf.mxu0  ;;  %v4189_v21 = vpop.eup %4188  ;;  %4214 = vpow2.f32 %v5273_v51  ;;  %v5367_v25 = vadd.f32 %v1727_v18, %v5156_v4  ;;  %v5370_v20 = vmul.f32 %v4183_v46, %v5173_v15  ;;  %v5374_v24 = vmul.f32 -1.442695, %v5338_v2 }
 0x380   : > { %6165 = vst [vmem:[#allocation55_spill] sm:$0xff] %v5357_v44  ;;  %v4191_v0 = vpop.eup %4190  ;;  %4216 = vpow2.f32 %v5276_v26  ;;  %v1620_v12 = vpop.f32.mrf.mxu1  ;;  %v5377_v31 = vadd.f32 %v1616_v35, %v5159_v6  ;;  %v5380_v14 = vmul.f32 %v4185_v13, %v5176_v16  ;;  %v5384_v18 = vmul.f32 -1.442695, %v5347_v29 }
 0x381   : > { %6166 = vst [vmem:[#allocation56_spill] sm:$0xff] %v5367_v25  ;;  %v1733_v51 = vpop.f32.mrf.mxu0  ;;  %v4193_v3 = vpop.eup %4192  ;;  %4218 = vpow2.f32 %v5279_v59  ;;  %v5387_v15 = vadd.f32 %v1729_v45, %v5162_v42  ;;  %v5390_v2 = vmul.f32 %v4187_v8, %v5181_v28  ;;  %v5394_v35 = vmul.f32 -1.442695, %v5357_v44 }
 0x382   : > { %6167 = vst [vmem:[#allocation57_spill] sm:$0xff] %v5377_v31  ;;  %v4195_v26 = vpop.eup %4194  ;;  %4220 = vpow2.f32 %v5282_v7  ;;  %v1622_v46 = vpop.f32.mrf.mxu1  ;;  %v5397_v13 = vadd.f32 %v1620_v12, %v5153_v54  ;;  %v5400_v7 = vmul.f32 %v4189_v21, %v5184_v43  ;;  %v5404_v45 = vmul.f32 -1.442695, %v5367_v25 }
 0x383   : > { %6168 = vst [vmem:[#allocation58_spill] sm:$0xff] %v5387_v15  ;;  %v1735_v59 = vpop.f32.mrf.mxu0  ;;  %v4197_v10 = vpop.eup %4196  ;;  %4222 = vpow2.f32 %v5285_v27  ;;  %v5407_v28 = vadd.f32 %v1733_v51, %v5156_v4  ;;  %v5410_v44 = vmul.f32 %v4191_v0, %v5188_v37  ;;  %v5413_v12 = vmul.f32 -1.442695, %v5377_v31 }
 0x384   : > { %6169 = vst [vmem:[#allocation59_spill] sm:$0xff] %v5397_v13  ;;  %v4199_v16 = vpop.eup %4198  ;;  %4224 = vpow2.f32 %v5291_v49  ;;  %v1624_v8 = vpop.f32.mrf.mxu1  ;;  %v5416_v43 = vadd.f32 %v1622_v46, %v5159_v6  ;;  %v5419_v49 = vmul.f32 %v4193_v3, %v5191_v38  ;;  %v5423_v51 = vmul.f32 -1.442695, %v5387_v15 }
 0x385   : > { %6170 = vst [vmem:[#allocation60_spill] sm:$0xff] %v5407_v28  ;;  %v1737_v27 = vpop.f32.mrf.mxu0  ;;  %v4201_v29 = vpop.eup %4200  ;;  %4226 = vpow2.f32 %v3499_v50  ;;  %v5426_v25 = vadd.f32 %v1735_v59, %v5162_v42  ;;  %v5429_v31 = vmul.f32 %v4195_v26, %v5197_v41  ;;  %v5432_v46 = vmul.f32 %v4197_v10, %v5200_v40 }
 0x386   : > { %6171 = vst [vmem:[#allocation61_spill] sm:$0xff] %v5416_v43  ;;  %v4203_v21 = vpop.eup %4202  ;;  %4228 = vpow2.f32 %v5316_v48  ;;  %v1626_v37 = vpop.f32.mrf.mxu1  ;;  %v5436_v38 = vmul.f32 -1.442695, %v5397_v13  ;;  %v5439_v48 = vmul.f32 %v4199_v16, %v5204_v60  ;;  %v5443_v59 = vmul.f32 -1.442695, %v5407_v28 }
 0x387   : > { %6172 = vst [vmem:[#allocation62_spill] sm:$0xff] %v5426_v25  ;;  %v1739_v0 = vpop.f32.mrf.mxu0  ;;  %v4205_v50 = vpop.eup %4204  ;;  %4230 = vpow2.f32 %v5322_v34  ;;  %v5446_v41 = vadd.f32 %v1624_v8, %v5153_v54  ;;  %v5449_v34 = vmul.f32 %v4201_v29, %v5207_v19  ;;  %v5453_v13 = vmul.f32 -1.442695, %v5416_v43 }
 0x388   : > { %v4207_v3 = vpop.eup %4206  ;;  %6173 = vst [vmem:[#allocation63_spill] sm:$0xff] %v5439_v48  ;;  %4232 = vpow2.f32 %v5325_v5  ;;  %v1630_v26 = vpop.f32.mrf.mxu1  ;;  %v5456_v60 = vadd.f32 %v1737_v27, %v5156_v4  ;;  %v5460_v16 = vmul.f32 -1.442695, %v5426_v25  ;;  %v5463_v8 = vadd.f32 %v1626_v37, %v5159_v6 }
 0x389   : > { %6174 = vst [vmem:[#allocation64_spill] sm:$0xff] %v5446_v41  ;;  %v1743_v40 = vpop.f32.mrf.mxu0  ;;  %v4209_v10 = vpop.eup %4208  ;;  %6175 = vst [vmem:[#allocation65_spill] sm:$0xff] %v5449_v34  ;;  %4234 = vpow2.f32 %v5332_v1  ;;  %v5469_v43 = vmul.f32 %v4203_v21, %v5213_v9  ;;  %v5476_v15 = vmul.f32 %v4205_v50, %v5216_v30  ;;  %v5483_v21 = vmul.f32 %v4207_v3, %v5220_v11 }
 0x38a   : > { %6176 = vst [vmem:[#allocation66_spill] sm:$0xff] %v5456_v60  ;;  %v4211_v5 = vpop.eup %4210  ;;  %4236 = vpow2.f32 %v5335_v56  ;;  %6177 = vst [vmem:[#allocation67_spill] sm:$0xff] %v5463_v8  ;;  %v5466_v19 = vadd.f32 %v1743_v40, %v5156_v4  ;;  %v1632_v29 = vpop.f32.mrf.mxu1  ;;  %v5473_v56 = vadd.f32 %v1739_v0, %v5162_v42  ;;  %v5480_v40 = vmul.f32 -1.442695, %v5446_v41 }
 0x38b   : > { %v1745_v1 = vpop.f32.mrf.mxu0  ;;  %v4213_v28 = vpop.eup %4212  ;;  %6179 = vst [vmem:[#allocation69_spill] sm:$0xff] %v5469_v43  ;;  %v2196_v27 = vadd.f32 1.0, %v4211_v5  ;;  %4238 = vpow2.f32 %v5341_v57  ;;  %6181 = vst [vmem:[#allocation71_spill] sm:$0xff] %v5476_v15  ;;  %v5486_v0 = vmul.f32 -1.442695, %v5456_v60  ;;  %v5495_v11 = vmul.f32 %v4209_v10, %v5223_v32 }
 0x38c   : > { %6178 = vst [vmem:[#allocation68_spill] sm:$0xff] %v5466_v19  ;;  %6180 = vst [vmem:[#allocation70_spill] sm:$0xff] %v5473_v56  ;;  %v4215_v25 = vpop.eup %4214  ;;  %v2198_v37 = vadd.f32 1.0, %v4213_v28  ;;  %4240 = vpow2.f32 %v5344_v47  ;;  %v1634_v34 = vpop.f32.mrf.mxu1  ;;  %v5489_v28 = vmul.f32 -1.442695, %v5463_v8  ;;  %v5492_v47 = vadd.f32 %v1630_v26, %v5153_v54 }
 0x38d   : > { %v1747_v48 = vpop.f32.mrf.mxu0  ;;  %v4217_v9 = vpop.eup %4216  ;;  %6182 = vst [vmem:[#allocation72_spill] sm:$0xff] %v5483_v21  ;;  %4242 = vrcp.f32 %v2196_v27  ;;  %v2197_v57 = vadd.f32 1.0, %v4215_v25  ;;  %6184 = vst [vmem:[#allocation74_spill] sm:$0xff] %v5495_v11  ;;  %v5498_v3 = vmul.f32 -1.442695, %v5473_v56  ;;  %v5504_v26 = vadd.f32 %v1745_v1, %v5162_v42 }
 0x38e   : > { %v4219_v5 = vpop.eup %4218  ;;  %4244 = vrcp.f32 %v2198_v37  ;;  %v2199_v30 = vadd.f32 1.0, %v4217_v9  ;;  %6183 = vst [vmem:[#allocation73_spill] sm:$0xff] %v5492_v47  ;;  %v1636_v50 = vpop.f32.mrf.mxu1  ;;  %v5501_v9 = vadd.f32 %v1632_v29, %v5159_v6  ;;  %v5507_v10 = vadd.f32 %v1634_v34, %v5153_v54 }
 0x38f   : > { %v1749_v41 = vpop.f32.mrf.mxu0  ;;  %v4221_v15 = vpop.eup %4220  ;;  %4246 = vrcp.f32 %v2197_v57  ;;  %v2200_v25 = vadd.f32 1.0, %v4219_v5  ;;  %6186 = vst [vmem:[#allocation76_spill] sm:$0xff] %v5504_v26  ;;  %v5510_v57 = vadd.f32 %v1747_v48, %v5156_v4  ;;  %v5513_v29 = vmul.f32 -1.442695, %v5492_v47 }
 0x390   : > { %v4223_v27 = vpop.eup %4222  ;;  %4248 = vrcp.f32 %v2199_v30  ;;  %v2202_v37 = vadd.f32 1.0, %v4221_v15  ;;  %6185 = vst [vmem:[#allocation75_spill] sm:$0xff] %v5501_v9  ;;  %v1640_v8 = vpop.f32.mrf.mxu1  ;;  %6187 = vst [vmem:[#allocation77_spill] sm:$0xff] %v5507_v10  ;;  %v5519_v34 = vmul.f32 -1.442695, %v5466_v19  ;;  %v5522_v48 = vadd.f32 %v1636_v50, %v5159_v6 }
 0x391   : > { %v1753_v60 = vpop.f32.mrf.mxu0  ;;  %v4225_v43 = vpop.eup %4224  ;;  %4250 = vrcp.f32 %v2200_v25  ;;  %v2201_v32 = vadd.f32 1.0, %v4223_v27  ;;  %6188 = vst [vmem:[#allocation78_spill] sm:$0xff] %v5510_v57  ;;  %6189 = vst [vmem:[#allocation79_spill] sm:$0xff] %v5513_v29  ;;  %v5534_v50 = vmul.f32 -1.442695, %v5510_v57 }
 0x392   : > { %v4227_v5 = vpop.eup %4226  ;;  %4252 = vrcp.f32 %v2202_v37  ;;  %v2203_v15 = vadd.f32 1.0, %v4225_v43  ;;  %v5516_v1 = vadd.f32 %v1753_v60, %v5156_v4  ;;  %v1642_v30 = vpop.f32.mrf.mxu1  ;;  %6191 = vst [vmem:[#allocation81_spill] sm:$0xff] %v5522_v48  ;;  %v5525_v37 = vmul.f32 -1.442695, %v5501_v9 }
 0x393   : > { %v1755_v56 = vpop.f32.mrf.mxu0  ;;  %v4229_v11 = vpop.eup %4228  ;;  %4254 = vrcp.f32 %v2201_v32  ;;  %v2204_v25 = vadd.f32 1.0, %v4227_v5  ;;  %v5528_v60 = vmul.f32 -1.442695, %v5504_v26  ;;  %v5531_v5 = vmul.f32 -1.442695, %v5507_v10  ;;  %6195 = vst [vmem:[#allocation85_spill] sm:$0xff] %v5534_v50 }
 0x394   : > { %6190 = vst [vmem:[#allocation80_spill] sm:$0xff] %v5516_v1  ;;  %v4231_v27 = vpop.eup %4230  ;;  %4256 = vrcp.f32 %v2203_v15  ;;  %v2206_v43 = vadd.f32 1.0, %v4229_v11  ;;  %6192 = vst [vmem:[#allocation82_spill] sm:$0xff] %v5525_v37  ;;  %v1644_v47 = vpop.f32.mrf.mxu1  ;;  %v5537_v15 = vadd.f32 %v1749_v41, %v5162_v42  ;;  %v5540_v26 = vadd.f32 %v1640_v8, %v5153_v54 }
 0x395   : > { %6193 = vst [vmem:[#allocation83_spill] sm:$0xff] %v5528_v60  ;;  %v1757_v29 = vpop.f32.mrf.mxu0  ;;  %v4233_v21 = vpop.eup %4232  ;;  %4258 = vrcp.f32 %v2204_v25  ;;  %v2205_v32 = vadd.f32 1.0, %v4231_v27  ;;  %6194 = vst [vmem:[#allocation84_spill] sm:$0xff] %v5531_v5  ;;  %v5543_v27 = vmul.f32 -1.442695, %v5522_v48  ;;  %v5546_v57 = vadd.f32 %v1642_v30, %v5159_v6 }
 0x396   : > { %v4235_v19 = vpop.eup %4234  ;;  %4260 = vrcp.f32 %v2206_v43  ;;  %v2207_v11 = vadd.f32 1.0, %v4233_v21  ;;  %6196 = vst [vmem:[#allocation86_spill] sm:$0xff] %v5537_v15  ;;  %6197 = vst [vmem:[#allocation87_spill] sm:$0xff] %v5540_v26  ;;  %v1646_v9 = vpop.f32.mrf.mxu1  ;;  %v5549_v41 = vadd.f32 %v1755_v56, %v5162_v42  ;;  %v5552_v8 = vadd.f32 %v1644_v47, %v5153_v54 }
 0x397   : > { %v1759_v60 = vpop.f32.mrf.mxu0  ;;  %v4237_v37 = vpop.eup %4236  ;;  %4262 = vrcp.f32 %v2205_v32  ;;  %v2208_v25 = vadd.f32 1.0, %v4235_v19  ;;  %6198 = vst [vmem:[#allocation88_spill] sm:$0xff] %v5543_v27  ;;  %6199 = vst [vmem:[#allocation89_spill] sm:$0xff] %v5546_v57  ;;  %v5555_v32 = vadd.f32 %v1757_v29, %v5156_v4  ;;  %v5558_v30 = vadd.f32 %v1646_v9, %v5159_v6 }
 0x398   : > { %v4239_v10 = vpop.eup %4238  ;;  %4264 = vrcp.f32 %v2207_v11  ;;  %v2210_v21 = vadd.f32 1.0, %v4237_v37  ;;  %6200 = vst [vmem:[#allocation90_spill] sm:$0xff] %v5549_v41  ;;  %6201 = vst [vmem:[#allocation91_spill] sm:$0xff] %v5552_v8  ;;  %v1796_v43 = vpop.f32.mrf.mxu1  ;;  %v5561_v56 = vmul.f32 -1.442695, %v5537_v15  ;;  %v5573_v6 = vadd.f32 %v1759_v60, %v5162_v42 }
 0x399   : > { %v1909_v50 = vpop.f32.mrf.mxu0  ;;  %v4241_v5 = vpop.eup %4240  ;;  %4266 = vrcp.f32 %v2208_v25  ;;  %v2209_v19 = vadd.f32 1.0, %v4239_v10  ;;  %6202 = vst [vmem:[#allocation92_spill] sm:$0xff] %v5555_v32  ;;  %6203 = vst [vmem:[#allocation93_spill] sm:$0xff] %v5558_v30  ;;  %v5564_v54 = vmul.f32 -1.442695, %v5540_v26  ;;  %v1797_v25 = vadd.f32 %v1796_v43, %v5233_v62 }
 0x39a   : > { %v4243_v48 = vpop.eup %4242  ;;  %4268 = vrcp.f32 %v2210_v21  ;;  %v2211_v37 = vadd.f32 1.0, %v4241_v5  ;;  %v1798_v47 = vpop.f32.mrf.mxu1  ;;  %v5567_v10 = vmul.f32 -1.442695, %v5516_v1  ;;  %v5570_v4 = vmul.f32 -1.442695, %v5546_v57  ;;  %6204 = vst [vmem:[#allocation94_spill] sm:$0xff] %v5573_v6 }
 0x39b   : > { %v1911_v11 = vpop.f32.mrf.mxu0  ;;  %v4245_v27 = vpop.eup %4244  ;;  %4270 = vrcp.f32 %v2209_v19  ;;  %v5576_v29 = vmul.f32 -1.442695, %v5549_v41  ;;  %v5579_v5 = vmul.f32 -1.442695, %v5552_v8  ;;  %v5584_v57 = vmul.f32 -1.442695, %v5555_v32 }
 0x39c   : > { %v4247_v9 = vpop.eup %4246  ;;  %4272 = vrcp.f32 %v2211_v37  ;;  %v1800_v21 = vpop.f32.mrf.mxu1  ;;  %v5587_v42 = vmul.f32 -1.442695, %v5558_v30  ;;  %v1910_v60 = vadd.f32 %v1909_v50, %v5236_v63  ;;  %v1799_v41 = vadd.f32 %v1798_v47, %v5242_v23 }
 0x39d   : > { %v1913_v19 = vpop.f32.mrf.mxu0  ;;  %v4249_v26 = vpop.eup %4248  ;;  %4274 = vpow2.f32 %v5354_v61  ;;  %v1801_v43 = vadd.f32 %v1800_v21, %v5233_v62  ;;  %v5595_v32 = vmul.f32 %v4243_v48, %v5239_v53  ;;  %v5599_v30 = vmul.f32 -1.442695, %v5573_v6 }
 0x39e   : > { %6205 = vst [vmem:[#allocation95_spill] sm:$0xff] %v5587_v42  ;;  %v4251_v37 = vpop.eup %4250  ;;  %4276 = vpow2.f32 %v5364_v39  ;;  %v1914_v15 = vadd.f32 %v1913_v19, %v5236_v63  ;;  %v1802_v8 = vpop.f32.mrf.mxu1  ;;  %v1912_v50 = vadd.f32 %v1911_v11, %v5248_v55  ;;  %v5604_v47 = vmul.f32 %v5350_v17, %v1797_v25 }
 0x39f   : > { %v1915_v1 = vpop.f32.mrf.mxu0  ;;  %v4253_v61 = vpop.eup %4252  ;;  %4278 = vpow2.f32 %v5374_v24  ;;  %v1803_v21 = vadd.f32 %v1802_v8, %v5242_v23  ;;  %v5609_v24 = vmul.f32 %v4245_v27, %v5245_v22  ;;  %v5612_v6 = vmul.f32 %v4247_v9, %v5251_v36  ;;  %v6206_v9 = vld [vmem:[#allocation40_spill] sm:$0xff] }
 0x3a0   : > { %v4255_v39 = vpop.eup %4254  ;;  %4280 = vpow2.f32 %v5384_v18  ;;  %v1916_v19 = vadd.f32 %v1915_v1, %v5248_v55  ;;  %v1806_v42 = vpop.f32.mrf.mxu1  ;;  %v5616_v18 = vmul.f32 %v5360_v52, %v1910_v60  ;;  %v2437_v8 = vmul.f32 %v5370_v20, %v1799_v41  ;;  %v6207_v41 = vld [vmem:[#allocation41_spill] sm:$0xff] }
 0x3a1   : > { %v1919_v53 = vpop.f32.mrf.mxu0  ;;  %v4257_v48 = vpop.eup %4256  ;;  %4282 = vpow2.f32 %v5394_v35  ;;  %v2440_v1 = vmul.f32 %v5390_v2, %v1801_v43  ;;  %v2442_v11 = vmul.f32 %v5400_v7, %v1914_v15  ;;  %v5623_v36 = vmul.f32 %v4249_v26, %v5254_v33 }
 0x3a2   : > { %v4259_v17 = vpop.eup %4258  ;;  %4284 = vpow2.f32 %v5404_v45  ;;  %v1808_v25 = vpop.f32.mrf.mxu1  ;;  %v5626_v35 = vmul.f32 %v4251_v37, %v5257_v58  ;;  %v2439_v52 = vmul.f32 %v5380_v14, %v1912_v50  ;;  %v5631_v20 = vmul.f32 %v4253_v61, %v6206_v9  ;;  %v6208_v37 = vld [vmem:[#allocation42_spill] sm:$0xff] }
 0x3a3   : > { %v1921_v22 = vpop.f32.mrf.mxu0  ;;  %v4261_v27 = vpop.eup %4260  ;;  %4286 = vpow2.f32 %v5413_v12  ;;  %v2441_v2 = vmul.f32 %v5410_v44, %v1803_v21  ;;  %v2443_v7 = vmul.f32 %v5419_v49, %v1916_v19  ;;  %v5637_v58 = vmul.f32 %v4255_v39, %v6207_v41  ;;  %v6209_v39 = vld [vmem:[#allocation43_spill] sm:$0xff] }
 0x3a4   : > { %v4263_v45 = vpop.eup %4262  ;;  %4288 = vpow2.f32 %v5423_v51  ;;  %v1810_v15 = vpop.f32.mrf.mxu1  ;;  %v1807_v14 = vadd.f32 %v1806_v42, %v5233_v62  ;;  %v1920_v12 = vadd.f32 %v1919_v53, %v5236_v63  ;;  %v5643_v43 = vmul.f32 %v4257_v48, %v6208_v37 }
 0x3a5   : > { %v1923_v33 = vpop.f32.mrf.mxu0  ;;  %v4265_v26 = vpop.eup %4264  ;;  %4290 = vpow2.f32 %v5436_v38  ;;  %v2516_v44 = vpack.c.bf16 %v2440_v1, %v5604_v47  ;;  %v2518_v49 = vpack.c.bf16 %v2442_v11, %v5616_v18  ;;  %v5649_v21 = vmul.f32 %v4259_v17, %v6209_v39  ;;  %v6210_v38 = vld [vmem:[#allocation44_spill] sm:$0xff]  ;;  %v6211_v11 = vld [vmem:[#allocation45_spill] sm:$0xff] }
 0x3a6   : > { %v4267_v60 = vpop.eup %4266  ;;  %4292 = vpow2.f32 %v5443_v59  ;;  %v1812_v51 = vpop.f32.mrf.mxu1  ;;  %v5652_v42 = vmul.f32 %v4261_v27, %v6210_v38  ;;  %v1809_v19 = vadd.f32 %v1808_v25, %v5242_v23  ;;  %v1922_v59 = vadd.f32 %v1921_v22, %v5248_v55  ;;  %v6212_v22 = vld [vmem:[#allocation46_spill] sm:$0xff]  ;;  %v6215_v38 = vld [vmem:[#allocation47_spill] sm:$0xff] }
 0x3a7   : > { %v1925_v61 = vpop.f32.mrf.mxu0  ;;  %v4269_v50 = vpop.eup %4268  ;;  %4294 = vpow2.f32 %v5453_v13  ;;  %v2517_v47 = vpack.c.bf16 %v2441_v2, %v2437_v8  ;;  %v2519_v48 = vpack.c.bf16 %v2443_v7, %v2439_v52  ;;  %v5663_v9 = vmul.f32 %v4263_v45, %v6211_v11  ;;  %v6218_v11 = vld [vmem:[#allocation74_spill] sm:$0xff] }
 0x3a8   : > { %v4271_v53 = vpop.eup %4270  ;;  %4296 = vpow2.f32 %v5460_v16  ;;  %v5658_v18 = vpop.f32.mrf.mxu1  ;;  %v5667_v13 = vmul.f32 %v5429_v31, %v1807_v14  ;;  %v5670_v25 = vmul.f32 %v5432_v46, %v1920_v12  ;;  %v5673_v8 = vmul.f32 %v4265_v26, %v6212_v22  ;;  %v6213_v46 = vld [vmem:[#allocation63_spill] sm:$0xff]  ;;  %v6214_v14 = vld [vmem:[#allocation65_spill] sm:$0xff] }
 0x3a9   : > { %v5660_v1 = vpop.f32.mrf.mxu0  ;;  %v4273_v17 = vpop.eup %4272  ;;  %4298 = vpow2.f32 %v5480_v40  ;;  %2836 = vmatprep.mubr.bf16.mxu1 %v2517_v47  ;;  %2933 = vmatprep.mubr.bf16.mxu0 %v2519_v48  ;;  %v1813_v27 = vadd.f32 %v1812_v51, %v5242_v23  ;;  %v1926_v52 = vadd.f32 %v1925_v61, %v5248_v55  ;;  %v5680_v7 = vmul.f32 %v6213_v46, %v1809_v19  ;;  %v4402_v51 = vld [vmem:[#allocation13 + $0xb8] sm:$0xff]   ;;  %v6216_v47 = vld [vmem:[#allocation48_spill] sm:$0xff] }
 0x3aa   : > { %v4275_v16 = vpop.eup %4274  ;;  %4300 = vpow2.f32 %v5486_v0  ;;  %v1818_v45 = vpop.f32.mrf.mxu1  ;;  %v1811_v26 = vadd.f32 %v1810_v15, %v5233_v62  ;;  %2837 = vmatmul.mubr.bf16.vlgmr.msra.gmra.mxu1 %v2516_v44  ;;  %2934 = vmatmul.mubr.bf16.vlgmr.msra.gmra.mxu0 %v2518_v49  ;;  %v2447_v12 = vmul.f32 %v6214_v14, %v1922_v59  ;;  %v1924_v37 = vadd.f32 %v1923_v33, %v5236_v63  ;;  %v4403_v49 = vld [vmem:[#allocation13 + $0xf0] sm:$0xff]   ;;  %v6217_v48 = vld [vmem:[#allocation72_spill] sm:$0xff]  ;;  %v6219_v14 = vld [vmem:[#allocation49_spill] sm:$0xff] }
 0x3ab   : > { %v1931_v40 = vpop.f32.mrf.mxu0  ;;  %v4277_v2 = vpop.eup %4276  ;;  %v2212_v31 = vadd.f32 1.0, %v4275_v16  ;;  %4302 = vpow2.f32 %v5489_v28  ;;  %3945 = vmatpush3.bf16.msra.mxu1 %v4402_v51  ;;  %v5687_v19 = vmul.f32 %v4267_v60, %v6215_v38  ;;  %v5690_v15 = vmul.f32 %v4269_v50, %v6216_v47  ;;  %v6220_v51 = vld [vmem:[#allocation69_spill] sm:$0xff]  ;;  %v6221_v38 = vld [vmem:[#allocation50_spill] sm:$0xff] }
 0x3ac   : > { %v4279_v0 = vpop.eup %4278  ;;  %v2214_v41 = vadd.f32 1.0, %v4277_v2  ;;  %4304 = vpow2.f32 %v5498_v3  ;;  %v1820_v61 = vpop.f32.mrf.mxu1  ;;  %3938 = vmatprep.subr.bf16.mxu1 %v4403_v49  ;;  %v2449_v33 = vmul.f32 %v6217_v48, %v1813_v27  ;;  %v2451_v16 = vmul.f32 %v6218_v11, %v1926_v52  ;;  %v4404_v49 = vld [vmem:[#allocation13 + $0xb0] sm:$0xff]   ;;  %v4405_v11 = vld [vmem:[#allocation13 + $0xe8] sm:$0xff]  }
 0x3ad   : > { %v1933_v39 = vpop.f32.mrf.mxu0  ;;  %v4281_v28 = vpop.eup %4280  ;;  %4306 = vrcp.f32 %v2212_v31  ;;  %v2213_v44 = vadd.f32 1.0, %v4279_v0  ;;  %v5695_v60 = vmul.f32 %v4271_v53, %v6219_v14  ;;  %v2448_v31 = vmul.f32 %v6220_v51, %v1811_v26 }
 0x3ae   : > { %v4283_v3 = vpop.eup %4282  ;;  %4308 = vrcp.f32 %v2214_v41  ;;  %v2215_v59 = vadd.f32 1.0, %v4281_v28  ;;  %v1822_v22 = vpop.f32.mrf.mxu1  ;;  %v5699_v47 = vmul.f32 %v4273_v17, %v6221_v38  ;;  %v6222_v28 = vld [vmem:[#allocation71_spill] sm:$0xff]  ;;  %v1932_v26 = vadd.f32 %v1931_v40, %v5248_v55 }
 0x3af   : > { %v1935_v2 = vpop.f32.mrf.mxu0  ;;  %v4285_v46 = vpop.eup %4284  ;;  %4310 = vrcp.f32 %v2213_v44  ;;  %v2216_v50 = vadd.f32 1.0, %v4283_v3  ;;  %v2450_v27 = vmul.f32 %v6222_v28, %v1924_v37  ;;  %3946 = vmatpush3.bf16.msra.mxu1 %v4404_v49  ;;  %v1819_v3 = vadd.f32 %v1818_v45, %v5242_v23 }
 0x3b0   : > { %v4287_v0 = vpop.eup %4286  ;;  %4312 = vrcp.f32 %v2215_v59  ;;  %v2218_v41 = vadd.f32 1.0, %v4285_v46  ;;  %v5702_v52 = vpop.f32.mrf.mxu1  ;;  %3939 = vmatprep.subr.bf16.mxu1 %v4405_v11  ;;  %v2521_v37 = vpack.c.bf16 %v2449_v33, %v5680_v7  ;;  %v2523_v46 = vpack.c.bf16 %v2451_v16, %v2447_v12 }
 0x3b1   : > { %v5704_v48 = vpop.f32.mrf.mxu0  ;;  %v4289_v53 = vpop.eup %4288  ;;  %4314 = vrcp.f32 %v2216_v50  ;;  %v2217_v44 = vadd.f32 1.0, %v4287_v0  ;;  %v1823_v0 = vadd.f32 %v1822_v22, %v5242_v23  ;;  %v1936_v45 = vadd.f32 %v1935_v2, %v5248_v55  ;;  %v4406_v2 = vld [vmem:[#allocation13 + $0xa8] sm:$0xff]  }
 0x3b2   : > { %v4291_v17 = vpop.eup %4290  ;;  %4316 = vrcp.f32 %v2218_v41  ;;  %v2219_v59 = vadd.f32 1.0, %v4289_v53  ;;  %v5709_v14 = vpop.f32.mrf.mxu1  ;;  %2844 = vmatprep.mubr.bf16.mxu1 %v2521_v37  ;;  %2941 = vmatprep.mubr.bf16.mxu0 %v2523_v46  ;;  %v2520_v41 = vpack.c.bf16 %v2448_v31, %v5667_v13  ;;  %v2522_v7 = vpack.c.bf16 %v2450_v27, %v5670_v25  ;;  %v4407_v37 = vld [vmem:[#allocation13 + $0xe0] sm:$0xff]  }
 0x3b3   : > { %v5711_v51 = vpop.f32.mrf.mxu0  ;;  %v4293_v38 = vpop.eup %4292  ;;  %4318 = vrcp.f32 %v2217_v44  ;;  %v2220_v50 = vadd.f32 1.0, %v4291_v17  ;;  %v1821_v53 = vadd.f32 %v1820_v61, %v5233_v62  ;;  %v1934_v22 = vadd.f32 %v1933_v39, %v5236_v63  ;;  %3947 = vmatpush3.bf16.msra.mxu1 %v4406_v2 }
 0x3b4   : > { %v4295_v40 = vpop.eup %4294  ;;  %4320 = vrcp.f32 %v2219_v59  ;;  %v2222_v28 = vadd.f32 1.0, %v4293_v38  ;;  %v1830_v12 = vpop.f32.mrf.mxu1  ;;  %v1817_v13 = vadd.f32 %v5658_v18, %v5233_v62  ;;  %v1930_v25 = vadd.f32 %v5660_v1, %v5236_v63  ;;  %2845 = vmatmul.mubr.bf16.gmra.mxu1 %v2520_v41  ;;  %2942 = vmatmul.mubr.bf16.gmra.mxu0 %v2522_v7 }
 0x3b5   : > { %v5717_v33 = vpop.f32.mrf.mxu0  ;;  %v4297_v16 = vpop.eup %4296  ;;  %4322 = vrcp.f32 %v2220_v50  ;;  %v2221_v49 = vadd.f32 1.0, %v4295_v40  ;;  %v2457_v39 = vmul.f32 %v5637_v58, %v1823_v0  ;;  %v2459_v59 = vmul.f32 %v5643_v43, %v1936_v45  ;;  %3940 = vmatprep.subr.bf16.mxu1 %v4407_v37  ;;  %v4408_v0 = vld [vmem:[#allocation13 + $0xa0] sm:$0xff]  }
 0x3b6   : > { %v4299_v44 = vpop.eup %4298  ;;  %4324 = vrcp.f32 %v2222_v28  ;;  %v2223_v11 = vadd.f32 1.0, %v4297_v16  ;;  %v1832_v31 = vpop.f32.mrf.mxu1  ;;  %v2453_v18 = vmul.f32 %v5612_v6, %v1819_v3  ;;  %v2455_v1 = vmul.f32 %v5623_v36, %v1932_v26  ;;  %v4409_v16 = vld [vmem:[#allocation13 + $0xd8] sm:$0xff]  }
 0x3b7   : > { %v1945_v27 = vpop.f32.mrf.mxu0  ;;  %v4301_v17 = vpop.eup %4300  ;;  %4326 = vrcp.f32 %v2221_v49  ;;  %v2224_v61 = vadd.f32 1.0, %v4299_v44  ;;  %v2456_v58 = vmul.f32 %v5626_v35, %v1821_v53  ;;  %v2458_v43 = vmul.f32 %v5631_v20, %v1934_v22  ;;  %3948 = vmatpush3.bf16.msra.mxu1 %v4408_v0 }
 0x3b8   : > { %v4303_v46 = vpop.eup %4302  ;;  %4328 = vrcp.f32 %v2223_v11  ;;  %v2226_v38 = vadd.f32 1.0, %v4301_v17  ;;  %v5729_v50 = vpop.f32.mrf.mxu1  ;;  %v1827_v6 = vadd.f32 %v5702_v52, %v5233_v62  ;;  %v1940_v36 = vadd.f32 %v5704_v48, %v5236_v63  ;;  %3941 = vmatprep.subr.bf16.mxu1 %v4409_v16 }
 0x3b9   : > { %v5731_v40 = vpop.f32.mrf.mxu0  ;;  %v4305_v28 = vpop.eup %4304  ;;  %4330 = vrcp.f32 %v2224_v61  ;;  %v2225_v41 = vadd.f32 1.0, %v4303_v46  ;;  %v1829_v20 = vadd.f32 %v5709_v14, %v5242_v23  ;;  %v2525_v49 = vpack.c.bf16 %v2457_v39, %v2453_v18  ;;  %v6223_v61 = vld [vmem:[#allocation79_spill] sm:$0xff] }
 0x3ba   : > { %v4307_v45 = vpop.eup %4306  ;;  %4332 = vrcp.f32 %v2226_v38  ;;  %v2227_v7 = vadd.f32 1.0, %v4305_v28  ;;  %v5739_v3 = vpop.f32.mrf.mxu1  ;;  %v2527_v53 = vpack.c.bf16 %v2459_v59, %v2455_v1  ;;  %v2452_v52 = vmul.f32 %v5595_v32, %v1817_v13  ;;  %v4410_v46 = vld [vmem:[#allocation13 + $0x98] sm:$0xff]   ;;  %v6224_v38 = vld [vmem:[#allocation82_spill] sm:$0xff] }
 0x3bb   : > { %v5741_v26 = vpop.f32.mrf.mxu0  ;;  %v4309_v35 = vpop.eup %4308  ;;  %4334 = vrcp.f32 %v2225_v41  ;;  %v2454_v2 = vmul.f32 %v5609_v24, %v1930_v25  ;;  %v1942_v48 = vadd.f32 %v5711_v51, %v5248_v55  ;;  %v1831_v14 = vadd.f32 %v1830_v12, %v5233_v62  ;;  %2852 = vmatprep.mubr.bf16.mxu1 %v2525_v49  ;;  %3949 = vmatpush3.bf16.msra.mxu1 %v4410_v46  ;;  %v6225_v1 = vld [vmem:[#allocation51_spill] sm:$0xff]  ;;  %v6226_v41 = vld [vmem:[#allocation52_spill] sm:$0xff] }
 0x3bc   : > { %v4311_v22 = vpop.eup %4310  ;;  %4336 = vrcp.f32 %v2227_v7  ;;  %v5749_v44 = vpop.f32.mrf.mxu1  ;;  %2949 = vmatprep.mubr.bf16.mxu0 %v2527_v53  ;;  %v1833_v39 = vadd.f32 %v1832_v31, %v5242_v23  ;;  %v1946_v32 = vadd.f32 %v1945_v27, %v5248_v55  ;;  %v1944_v24 = vadd.f32 %v5717_v33, %v5236_v63  ;;  %v4411_v33 = vld [vmem:[#allocation13 + $0xd0] sm:$0xff]  }
 0x3bd   : > { %v5751_v11 = vpop.f32.mrf.mxu0  ;;  %v4313_v17 = vpop.eup %4312  ;;  %4338 = vpow2.f32 %v6223_v61  ;;  %v2524_v51 = vpack.c.bf16 %v2456_v58, %v2452_v52  ;;  %v2526_v25 = vpack.c.bf16 %v2458_v43, %v2454_v2  ;;  %v5766_v31 = vmul.f32 %v5649_v21, %v1827_v6  ;;  %3942 = vmatprep.subr.bf16.mxu1 %v4411_v33  ;;  %v6227_v43 = vld [vmem:[#allocation83_spill] sm:$0xff]  ;;  %v6228_v6 = vld [vmem:[#allocation84_spill] sm:$0xff] }
 0x3be   : > { %v4315_v13 = vpop.eup %4314  ;;  %4340 = vpow2.f32 %v5519_v34  ;;  %v5760_v59 = vpop.f32.mrf.mxu1  ;;  %v5769_v27 = vmul.f32 %v5652_v42, %v1940_v36  ;;  %v2461_v34 = vmul.f32 %v5663_v9, %v1829_v20  ;;  %v2404_v28 = vmul.f32 %v4307_v45, %v6225_v1  ;;  %v6232_v61 = vld [vmem:[#allocation55_spill] sm:$0xff] }
 0x3bf   : > { %v5762_v37 = vpop.f32.mrf.mxu0  ;;  %v4317_v12 = vpop.eup %4316  ;;  %4342 = vpow2.f32 %v6224_v38  ;;  %v2406_v58 = vmul.f32 %v4309_v35, %v6226_v41  ;;  %v2463_v0 = vmul.f32 %v5673_v8, %v1942_v48  ;;  %2853 = vmatmul.mubr.bf16.gmra.mxu1 %v2524_v51  ;;  %2950 = vmatmul.mubr.bf16.gmra.mxu0 %v2526_v25  ;;  %v5782_v9 = vmul.f32 %v5687_v19, %v1831_v14  ;;  %v6229_v35 = vld [vmem:[#allocation53_spill] sm:$0xff]  ;;  %v4412_v19 = vld [vmem:[#allocation13 + $0x90] sm:$0xff]  }
 0x3c0   : > { %v4319_v18 = vpop.eup %4318  ;;  %4344 = vpow2.f32 %v6227_v43  ;;  %v5776_v21 = vpop.f32.mrf.mxu1  ;;  %v2465_v45 = vmul.f32 %v5695_v60, %v1833_v39  ;;  %v2467_v36 = vmul.f32 %v5699_v47, %v1946_v32  ;;  %v2405_v20 = vmul.f32 %v4311_v22, %v6229_v35  ;;  %v6230_v8 = vld [vmem:[#allocation85_spill] sm:$0xff]  ;;  %3950 = vmatpush3.bf16.msra.mxu1 %v4412_v19  ;;  %v6231_v60 = vld [vmem:[#allocation54_spill] sm:$0xff]  ;;  %v6233_v22 = vld [vmem:[#allocation88_spill] sm:$0xff] }
 0x3c1   : > { %v5778_v7 = vpop.f32.mrf.mxu0  ;;  %v4321_v42 = vpop.eup %4320  ;;  %4346 = vpow2.f32 %v6228_v6  ;;  %v2466_v49 = vmul.f32 %v5690_v15, %v1944_v24  ;;  %v1837_v53 = vadd.f32 %v5729_v50, %v5233_v62  ;;  %v2407_v47 = vmul.f32 %v4313_v17, %v6231_v60  ;;  %v4413_v39 = vld [vmem:[#allocation13 + $0xc8] sm:$0xff]   ;;  %v6234_v32 = vld [vmem:[#allocation56_spill] sm:$0xff]  ;;  %v6236_v41 = vld [vmem:[#allocation58_spill] sm:$0xff] }
 0x3c2   : > { %v4323_v16 = vpop.eup %4322  ;;  %4348 = vpow2.f32 %v6230_v8  ;;  %v5791_v52 = vpop.f32.mrf.mxu1  ;;  %v2408_v14 = vmul.f32 %v4315_v13, %v6232_v61  ;;  %v1950_v15 = vadd.f32 %v5731_v40, %v5236_v63  ;;  %3943 = vmatprep.subr.bf16.mxu1 %v4413_v39  ;;  %v2410_v24 = vmul.f32 %v4317_v12, %v6234_v32  ;;  %v6235_v51 = vld [vmem:[#allocation57_spill] sm:$0xff]  ;;  %v6239_v19 = vld [vmem:[#allocation62_spill] sm:$0xff] }
 0x3c3   : > { %v5793_v2 = vpop.f32.mrf.mxu0  ;;  %v5795_v48 = vpop.eup %4324  ;;  %4350 = vpow2.f32 %v6233_v22  ;;  %v2409_v25 = vmul.f32 %v4319_v18, %v6235_v51  ;;  %v1839_v46 = vadd.f32 %v5739_v3, %v5242_v23  ;;  %v1952_v40 = vadd.f32 %v5741_v26, %v5248_v55  ;;  %v4414_v6 = vld [vmem:[#allocation13 + $0x88] sm:$0xff]   ;;  %v6241_v22 = vld [vmem:[#allocation64_spill] sm:$0xff]  ;;  %v6242_v32 = vld [vmem:[#allocation66_spill] sm:$0xff] }
 0x3c4   : > { %v4327_v50 = vpop.eup %4326  ;;  %4352 = vpow2.f32 %v5561_v56  ;;  %v5807_v17 = vpop.f32.mrf.mxu1  ;;  %v2529_v33 = vpack.c.bf16 %v2465_v45, %v2461_v34  ;;  %v2531_v1 = vpack.c.bf16 %v2467_v36, %v2463_v0  ;;  %v2411_v18 = vmul.f32 %v4321_v42, %v6236_v41  ;;  %3951 = vmatpush3.bf16.msra.mxu1 %v4414_v6  ;;  %v4415_v45 = vld [vmem:[#allocation13 + $0xc0] sm:$0xff]   ;;  %v6237_v36 = vld [vmem:[#allocation59_spill] sm:$0xff] }
 0x3c5   : > { %v5809_v13 = vpop.f32.mrf.mxu0  ;;  %v4329_v38 = vpop.eup %4328  ;;  %4354 = vpow2.f32 %v5564_v54  ;;  %v5816_v56 = vmul.f32 %v2404_v28, %v1837_v53  ;;  %v1841_v3 = vadd.f32 %v5749_v44, %v5233_v62  ;;  %v5823_v26 = vmul.f32 %v2406_v58, %v1950_v15  ;;  %3944 = vmatprep.subr.bf16.mxu1 %v4415_v45  ;;  %v6238_v53 = vld [vmem:[#allocation61_spill] sm:$0xff] }
 0x3c6   : > { %v4331_v12 = vpop.eup %4330  ;;  %4356 = vpow2.f32 %v5567_v10  ;;  %v5820_v43 = vpop.f32.mrf.mxu1  ;;  %2860 = vmatprep.mubr.bf16.mxu1 %v2529_v33  ;;  %2957 = vmatprep.mubr.bf16.mxu0 %v2531_v1  ;;  %v1843_v34 = vadd.f32 %v5760_v59, %v5242_v23  ;;  %v1956_v10 = vadd.f32 %v5762_v37, %v5248_v55  ;;  %v1954_v0 = vadd.f32 %v5751_v11, %v5236_v63  ;;  %v6244_v33 = vld [vmem:[#allocation70_spill] sm:$0xff] }
 0x3c7   : > { %v4333_v54 = vpop.eup %4332  ;;  %4358 = vpow2.f32 %v5570_v4  ;;  %v5829_v28 = vpop.f32.mrf.mxu0  ;;  %v2528_v4 = vpack.c.bf16 %v5782_v9, %v5766_v31  ;;  %v2530_v58 = vpack.c.bf16 %v2466_v49, %v5769_v27  ;;  %v5840_v37 = vmul.f32 %v4323_v16, %v6237_v36  ;;  %v6240_v16 = vld [vmem:[#allocation95_spill] sm:$0xff] }
 0x3c8   : > { %v4335_v44 = vpop.eup %4334  ;;  %4360 = vpow2.f32 %v5576_v29  ;;  %v5837_v42 = vpop.f32.mrf.mxu1  ;;  %v2469_v35 = vmul.f32 %v2405_v20, %v1839_v46  ;;  %v2471_v29 = vmul.f32 %v2407_v47, %v1952_v40  ;;  %v5844_v11 = vmul.f32 %v4327_v50, %v6238_v53  ;;  %v4416_v47 = vld [vmem:[#allocation13 + $0x80] sm:$0xff]   ;;  %v6243_v46 = vld [vmem:[#allocation67_spill] sm:$0xff] }
 0x3c9   : > { %v4337_v59 = vpop.eup %4336  ;;  %4362 = vpow2.f32 %v5579_v5  ;;  %v5847_v31 = vmul.f32 %v4329_v38, %v6239_v19  ;;  %v2472_v27 = vmul.f32 %v2408_v14, %v1841_v3  ;;  %2861 = vmatmul.mubr.bf16.gmra.mxu1 %v2528_v4  ;;  %2958 = vmatmul.mubr.bf16.gmra.mxu0 %v2530_v58  ;;  %v2473_v60 = vmul.f32 %v2409_v25, %v1843_v34  ;;  %v5851_v20 = vpop.f32.mrf.mxu0 }
 0x3ca   : > { %v4339_v8 = vpop.eup %4338  ;;  %4364 = vpow2.f32 %v5584_v57  ;;  %v2475_v5 = vmul.f32 %v2411_v18, %v1956_v10  ;;  %3952 = vmatpush3.bf16.msra.mxu1 %v4416_v47  ;;  %v2416_v15 = vmul.f32 %v4331_v12, %v6241_v22  ;;  %v2474_v57 = vmul.f32 %v2410_v24, %v1954_v0  ;;  %v5855_v14 = vpop.f32.mrf.mxu1  ;;  %v6245_v47 = vld [vmem:[#allocation60_spill] sm:$0xff] }
 0x3cb   : > { %v4341_v9 = vpop.eup %4340  ;;  %v2228_v49 = vadd.f32 1.0, %v4339_v8  ;;  %4366 = vpow2.f32 %v6240_v16  ;;  %v2418_v51 = vmul.f32 %v4333_v54, %v6242_v32  ;;  %v2417_v38 = vmul.f32 %v4335_v44, %v6243_v46  ;;  %v5864_v54 = vpop.f32.mrf.mxu0 }
 0x3cc   : > { %v4343_v61 = vpop.eup %4342  ;;  %v2230_v39 = vadd.f32 1.0, %v4341_v9  ;;  %4368 = vpow2.f32 %v5599_v30  ;;  %v2419_v1 = vmul.f32 %v4337_v59, %v6244_v33  ;;  %v1849_v12 = vadd.f32 %v5791_v52, %v5242_v23  ;;  %v5870_v52 = vpop.f32.mrf.mxu1 }
 0x3cd   : > { %v4345_v50 = vpop.eup %4344  ;;  %4370 = vrcp.f32 %v2228_v49  ;;  %v2229_v25 = vadd.f32 1.0, %v4343_v61  ;;  %v1962_v30 = vadd.f32 %v5793_v2, %v5248_v55  ;;  %v2533_v3 = vpack.c.bf16 %v2473_v60, %v2469_v35  ;;  %v1973_v19 = vpop.f32.mrf.mxu0 }
 0x3ce   : > { %v4347_v40 = vpop.eup %4346  ;;  %4372 = vrcp.f32 %v2230_v39  ;;  %v2231_v41 = vadd.f32 1.0, %v4345_v50  ;;  %v2535_v6 = vpack.c.bf16 %v2475_v5, %v2471_v29  ;;  %v1851_v44 = vadd.f32 %v5807_v17, %v5233_v62 }
 0x3cf   : > { %v4349_v24 = vpop.eup %4348  ;;  %v2232_v18 = vadd.f32 1.0, %v4347_v40  ;;  %4374 = vrcp.f32 %v2229_v25  ;;  %v1964_v0 = vadd.f32 %v5809_v13, %v5236_v63  ;;  %2868 = vmatprep.mubr.bf16.mxu1 %v2533_v3  ;;  %v1853_v58 = vadd.f32 %v5820_v43, %v5242_v23  ;;  %v5886_v32 = vpop.f32.mrf.mxu0 }
 0x3d0   : > { %v4351_v34 = vpop.eup %4350  ;;  %v2234_v10 = vadd.f32 1.0, %v4349_v24  ;;  %2965 = vmatprep.mubr.bf16.mxu0 %v2535_v6  ;;  %v1966_v45 = vadd.f32 %v5829_v28, %v5248_v55  ;;  %v2532_v17 = vpack.c.bf16 %v2472_v27, %v5816_v56  ;;  %v2534_v13 = vpack.c.bf16 %v2474_v57, %v5823_v26  ;;  %v1862_v56 = vpop.f32.mrf.mxu1 }
 0x3d1   : > { %v4353_v4 = vpop.eup %4352  ;;  %4376 = vrcp.f32 %v2232_v18  ;;  %v2233_v2 = vadd.f32 1.0, %v4351_v34  ;;  %v2481_v8 = vmul.f32 %v2417_v38, %v1853_v58  ;;  %v1847_v43 = vadd.f32 %v5776_v21, %v5233_v62  ;;  %v6246_v58 = vld [vmem:[#allocation68_spill] sm:$0xff] }
 0x3d2   : > { %v4355_v59 = vpop.eup %4354  ;;  %4378 = vrcp.f32 %v2234_v10  ;;  %v2235_v36 = vadd.f32 1.0, %v4353_v4  ;;  %v2483_v53 = vmul.f32 %v2419_v1, %v1966_v45  ;;  %v1960_v28 = vadd.f32 %v5778_v7, %v5236_v63  ;;  %2869 = vmatmul.mubr.bf16.gmra.mxu1 %v2532_v17  ;;  %2966 = vmatmul.mubr.bf16.gmra.mxu0 %v2534_v13  ;;  %v5889_v25 = vpop.f32.mrf.mxu1 }
 0x3d3   : > { %v4357_v35 = vpop.eup %4356  ;;  %4380 = vrcp.f32 %v2233_v2  ;;  %v2236_v29 = vadd.f32 1.0, %v4355_v59  ;;  %v2477_v16 = vmul.f32 %v5844_v11, %v1849_v12  ;;  %v2479_v60 = vmul.f32 %v5847_v31, %v1962_v30  ;;  %v1979_v12 = vpop.f32.mrf.mxu0  ;;  %v6247_v59 = vld [vmem:[#allocation77_spill] sm:$0xff] }
 0x3d4   : > { %v4359_v9 = vpop.eup %4358  ;;  %4382 = vrcp.f32 %v2231_v41  ;;  %v2238_v49 = vadd.f32 1.0, %v4357_v35  ;;  %v2414_v61 = vmul.f32 %v5795_v48, %v6245_v47  ;;  %v2480_v22 = vmul.f32 %v2416_v15, %v1851_v44  ;;  %v1868_v30 = vpop.f32.mrf.mxu1 }
 0x3d5   : > { %v4361_v27 = vpop.eup %4360  ;;  %4384 = vrcp.f32 %v2235_v36  ;;  %v2237_v26 = vadd.f32 1.0, %v4359_v9  ;;  %v2482_v21 = vmul.f32 %v2418_v51, %v1964_v0  ;;  %v2537_v57 = vpack.c.bf16 %v2481_v8, %v2477_v16  ;;  %v5899_v4 = vpop.f32.mrf.mxu0  ;;  %v6251_v9 = vld [vmem:[#allocation73_spill] sm:$0xff] }
 0x3d6   : > { %v4363_v5 = vpop.eup %4362  ;;  %4386 = vrcp.f32 %v2236_v29  ;;  %v2539_v50 = vpack.c.bf16 %v2483_v53, %v2479_v60  ;;  %v2476_v11 = vmul.f32 %v5840_v37, %v1847_v43  ;;  %v2478_v31 = vmul.f32 %v2414_v61, %v1960_v28  ;;  %v1870_v13 = vpop.f32.mrf.mxu1  ;;  %v6249_v29 = vld [vmem:[#allocation75_spill] sm:$0xff]  ;;  %v6250_v53 = vld [vmem:[#allocation81_spill] sm:$0xff] }
 0x3d7   : > { %v4365_v39 = vpop.eup %4364  ;;  %4388 = vrcp.f32 %v2238_v49  ;;  %v2240_v7 = vadd.f32 1.0, %v4363_v5  ;;  %2876 = vmatprep.mubr.bf16.mxu1 %v2537_v57  ;;  %v1970_v18 = vadd.f32 %v5851_v20, %v5236_v63  ;;  %v1861_v3 = vadd.f32 %v5870_v52, %v5233_v62  ;;  %v6248_v20 = vld [vmem:[#allocation78_spill] sm:$0xff]  ;;  %v1983_v60 = vpop.f32.mrf.mxu0 }
 0x3d8   : > { %v4367_v46 = vpop.eup %4366  ;;  %4390 = vrcp.f32 %v2237_v26  ;;  %v2242_v38 = vadd.f32 1.0, %v4365_v39  ;;  %2973 = vmatprep.mubr.bf16.mxu0 %v2539_v50  ;;  %v2536_v51 = vpack.c.bf16 %v2480_v22, %v2476_v11  ;;  %v2538_v33 = vpack.c.bf16 %v2482_v21, %v2478_v31  ;;  %v1872_v61 = vpop.f32.mrf.mxu1 }
 0x3d9   : > { %v4369_v40 = vpop.eup %4368  ;;  %4392 = vrcp.f32 %v2240_v7  ;;  %v2241_v48 = vadd.f32 1.0, %v4367_v46  ;;  %v1974_v6 = vadd.f32 %v1973_v19, %v5236_v63  ;;  %v2239_v10 = vadd.f32 1.0, %v4361_v27 }
 0x3da   : > { %v4371_v15 = vpop.eup %4370  ;;  %4394 = vrcp.f32 %v2242_v38  ;;  %2877 = vmatmul.mubr.bf16.gmra.mxu1 %v2536_v51  ;;  %2974 = vmatmul.mubr.bf16.gmra.mxu0 %v2538_v33  ;;  %v2243_v37 = vadd.f32 1.0, %v4369_v40  ;;  %v1859_v44 = vadd.f32 %v5855_v14, %v5242_v23  ;;  %v1863_v0 = vadd.f32 %v1862_v56, %v5242_v23  ;;  %v6253_v33 = vld [vmem:[#allocation91_spill] sm:$0xff] }
 0x3db   : > { %v4373_v1 = vpop.eup %4372  ;;  %4396 = vrcp.f32 %v2241_v48  ;;  %v1857_v52 = vadd.f32 %v5837_v42, %v5233_v62  ;;  %v2420_v49 = vmul.f32 %v4371_v15, %v6251_v9  ;;  %v1980_v7 = vadd.f32 %v1979_v12, %v5236_v63  ;;  %v6252_v15 = vld [vmem:[#allocation80_spill] sm:$0xff]  ;;  %v6261_v9 = vld [vmem:[#allocation90_spill] sm:$0xff] }
 0x3dc   : > { %v4375_v24 = vpop.eup %4374  ;;  %v2422_v45 = vmul.f32 %v4373_v1, %v6246_v58  ;;  %4398 = vrcp.f32 %v2243_v37  ;;  %v1871_v57 = vadd.f32 %v1870_v13, %v5233_v62  ;;  %v1984_v50 = vadd.f32 %v1983_v60, %v5236_v63  ;;  %v6254_v12 = vld [vmem:[#allocation92_spill] sm:$0xff]  ;;  %v6255_v37 = vld [vmem:[#allocation86_spill] sm:$0xff] }
 0x3dd   : > { %v2421_v8 = vmul.f32 %v4375_v24, %v6249_v29  ;;  %4400 = vrcp.f32 %v2239_v10  ;;  %v2484_v42 = vmul.f32 %v2420_v49, %v1857_v52  ;;  %v1976_v11 = vadd.f32 %v5886_v32, %v5248_v55 }
 0x3de   : > { %v4377_v41 = vpop.eup %4376  ;;  %v2486_v43 = vmul.f32 %v2422_v45, %v1970_v18  ;;  %v1869_v31 = vadd.f32 %v1868_v30, %v5242_v23  ;;  %v1873_v40 = vadd.f32 %v1872_v61, %v5242_v23  ;;  %v1867_v63 = vadd.f32 %v5889_v25, %v5233_v62  ;;  %v6256_v18 = vld [vmem:[#allocation89_spill] sm:$0xff] }
 0x3df   : > { %v4379_v34 = vpop.eup %4378  ;;  %v2424_v36 = vmul.f32 %v4377_v41, %v6247_v59  ;;  %v2485_v26 = vmul.f32 %v2421_v8, %v1859_v44  ;;  %v1972_v23 = vadd.f32 %v5864_v54, %v5248_v55 }
 0x3e0   : > { %v4381_v2 = vpop.eup %4380  ;;  %v2426_v17 = vmul.f32 %v4379_v34, %v6248_v20 }
 0x3e1   : > { %v4383_v35 = vpop.eup %4382  ;;  %v2425_v14 = vmul.f32 %v4381_v2, %v6250_v53  ;;  %v2488_v28 = vmul.f32 %v2424_v36, %v1861_v3  ;;  %v6257_v3 = vld [vmem:[#allocation93_spill] sm:$0xff]  ;;  %v6259_v2 = vld [vmem:[#allocation76_spill] sm:$0xff]  ;;  %v1985_v36 = vpop.f32.mrf.mxu0 }
 0x3e2   : > { %v4385_v19 = vpop.eup %4384  ;;  %v2490_v56 = vmul.f32 %v2426_v17, %v1974_v6  ;;  %v6258_v6 = vld [vmem:[#allocation87_spill] sm:$0xff]  ;;  %v2423_v58 = vmul.f32 %v4383_v35, %v6259_v2  ;;  %v1986_v8 = vadd.f32 %v1985_v36, %v5248_v55  ;;  %v1982_v35 = vadd.f32 %v5899_v4, %v5248_v55 }
 0x3e3   : > { %v4387_v27 = vpop.eup %4386  ;;  %v2489_v16 = vmul.f32 %v2425_v14, %v1863_v0  ;;  %v2540_v46 = vpack.c.bf16 %v2488_v28, %v2484_v42  ;;  %v2427_v41 = vmul.f32 %v4385_v19, %v6255_v37  ;;  %v6260_v14 = vld [vmem:[#allocation94_spill] sm:$0xff] }
 0x3e4   : > { %v4389_v5 = vpop.eup %4388  ;;  %v2542_v47 = vpack.c.bf16 %v2490_v56, %v2486_v43  ;;  %v2428_v34 = vmul.f32 %v4387_v27, %v6258_v6  ;;  %v2487_v17 = vmul.f32 %v2423_v58, %v1972_v23  ;;  %v6264_v23 = vld [vmem:[#allocation24_spill] sm:$0xff] }
 0x3e5   : > { %v4391_v22 = vpop.eup %4390  ;;  %v2541_v21 = vpack.c.bf16 %v2489_v16, %v2485_v26  ;;  %v2430_v51 = vmul.f32 %v4389_v5, %v6252_v15  ;;  %v2491_v45 = vmul.f32 %v2427_v41, %v1976_v11 }
 0x3e6   : > { %v4393_v39 = vpop.eup %4392  ;;  %v2429_v32 = vmul.f32 %v4391_v22, %v6256_v18  ;;  %v2492_v25 = vmul.f32 %v2428_v34, %v1867_v63 }
 0x3e7   : > { %v4395_v38 = vpop.eup %4394  ;;  %2884 = vmatprep.mubr.bf16.mxu1 %v2541_v21  ;;  %v2432_v1 = vmul.f32 %v4393_v39, %v6253_v33  ;;  %v2494_v10 = vmul.f32 %v2430_v51, %v1980_v7  ;;  %v2543_v54 = vpack.c.bf16 %v2491_v45, %v2487_v17 }
 0x3e8   : > { %v4397_v48 = vpop.eup %4396  ;;  %v2434_v24 = vmul.f32 %v4395_v38, %v6254_v12  ;;  %2885 = vmatmul.mubr.bf16.gmra.mxu1 %v2540_v46  ;;  %v2493_v59 = vmul.f32 %v2429_v32, %v1869_v31  ;;  %v6263_v38 = vld [vmem:[#allocation27_spill] sm:$0xff] }
 0x3e9   : > { %v2433_v30 = vmul.f32 %v4397_v48, %v6257_v3  ;;  %v2496_v44 = vmul.f32 %v2432_v1, %v1871_v57  ;;  %v4399_v13 = vpop.eup %4398  ;;  %v6262_v57 = vld [vmem:[#allocation25_spill] sm:$0xff] }
 0x3ea   : > { %v2498_v0 = vmul.f32 %v2434_v24, %v1984_v50  ;;  %v4401_v53 = vpop.eup %4400  ;;  %v2435_v19 = vmul.f32 %v4399_v13, %v6260_v14  ;;  %v6266_v14 = vld [vmem:[#allocation28_spill] sm:$0xff] }
 0x3eb   : > { %v2497_v62 = vmul.f32 %v2433_v30, %v1873_v40  ;;  %v2544_v29 = vpack.c.bf16 %v2496_v44, %v2492_v25  ;;  %v2431_v49 = vmul.f32 %v4401_v53, %v6261_v9 }
 0x3ec   : > { %v2546_v20 = vpack.c.bf16 %v2498_v0, %v2494_v10  ;;  %v2499_v43 = vmul.f32 %v2435_v19, %v1986_v8  ;;  %v6265_v0 = vld [vmem:[#allocation26_spill] sm:$0xff] }
 0x3ed   : > { %v2545_v52 = vpack.c.bf16 %v2497_v62, %v2493_v59  ;;  %v2495_v28 = vmul.f32 %v2431_v49, %v1982_v35 }
 0x3ef   : > { %2892 = vmatprep.mubr.bf16.mxu1 %v2545_v52  ;;  %v2547_v56 = vpack.c.bf16 %v2499_v43, %v2495_v28  ;;  %v6267_v43 = vld [vmem:[#allocation30_spill] sm:$0xff] }
 0x3f0   : > { %2893 = vmatmul.mubr.bf16.gmra.mxu1 %v2544_v29 }
 0x3f1   : > { %2981 = vmatprep.mubr.bf16.mxu1 %v2543_v54 }
 0x3f8   : > { %2982 = vmatmul.mubr.bf16.vlgmr.msra.gmra.mxu1 %v2542_v47  ;;  %v5937_v47 = vld [vmem:[%s6042_s7] ss:$0 sm:$0xff] }
 0x3f9   : > { %2989 = vmatprep.mubr.bf16.mxu1 %v2547_v56 }
 0x400   : > { %2990 = vmatmul.mubr.bf16.gmra.mxu1 %v2546_v20 }
 0x46a   : > { %v3793_v27 = vpop.f32.mrf.mxu1  ;;  %v3857_v26 = vpop.f32.mrf.mxu0 }
 0x46c   : > { %v3794_v16 = vpop.f32.mrf.mxu1  ;;  %v3858_v60 = vpop.f32.mrf.mxu0 }
 0x46d   : > { %v3795_v5 = vadd.f32 %v3794_v16, %v3793_v27  ;;  %v3859_v42 = vadd.f32 %v3858_v60, %v3857_v26 }
 0x46e   : > { %v3796_v61 = vpop.f32.mrf.mxu1  ;;  %v3860_v22 = vpop.f32.mrf.mxu0 }
 0x46f   : > { %v2936_v21 = vadd.f32 %v3859_v42, %v3795_v5 }
 0x470   : > { %v3797_v39 = vpop.f32.mrf.mxu1  ;;  %v3861_v55 = vpop.f32.mrf.mxu0 }
 0x471   : > { %v3798_v4 = vadd.f32 %v3797_v39, %v3796_v61  ;;  %v3862_v7 = vadd.f32 %v3861_v55, %v3860_v22  ;;  %v3065_v50 = vadd.f32 %v2936_v21, %v6262_v57  ;;  %v6268_v57 = vld [vmem:[#allocation29_spill] sm:$0xff] }
 0x473   : > { %v2939_v46 = vadd.f32 %v3862_v7, %v3798_v4  ;;  %v3088_v48 = vadd.f32 %v5937_v47, %v3065_v50 }
 0x474   : > { %v3799_v31 = vpop.f32.mrf.mxu1  ;;  %v3863_v40 = vpop.f32.mrf.mxu0 }
 0x475   : > { %v3066_v11 = vadd.f32 %v2939_v46, %v6263_v38 }
 0x476   : > { %v3800_v51 = vpop.f32.mrf.mxu1  ;;  %v3864_v33 = vpop.f32.mrf.mxu0 }
 0x477   : > { %v3089_v15 = vadd.f32 %v5937_v47, %v3066_v11  ;;  %v3801_v1 = vadd.f32 %v3800_v51, %v3799_v31  ;;  %v3865_v12 = vadd.f32 %v3864_v33, %v3863_v40  ;;  %v6269_v31 = vld [vmem:[#allocation31_spill] sm:$0xff] }
 0x478   : > { %v3802_v63 = vpop.f32.mrf.mxu1  ;;  %v3866_v37 = vpop.f32.mrf.mxu0 }
 0x479   : > { %v3703_v24 = vpack.c.bf16 %v3089_v15, %v3088_v48  ;;  %v2944_v41 = vadd.f32 %v3865_v12, %v3801_v1 }
 0x47a   : > { %v3803_v18 = vpop.f32.mrf.mxu1  ;;  %v3867_v32 = vpop.f32.mrf.mxu0 }
 0x47b   : > { %3704 = vst [vmem:[%s5943_s17] sm:$0xff] %v3703_v24   ;;  %v3804_v3 = vadd.f32 %v3803_v18, %v3802_v63  ;;  %v3868_v30 = vadd.f32 %v3867_v32, %v3866_v37  ;;  %v3067_v6 = vadd.f32 %v2944_v41, %v6264_v23 }
 0x47d   : > { %v2947_v34 = vadd.f32 %v3868_v30, %v3804_v3  ;;  %v3090_v59 = vadd.f32 %v5937_v47, %v3067_v6 }
 0x47f   : > { %v3805_v10 = vpop.f32.mrf.mxu1  ;;  %v3869_v44 = vpop.f32.mrf.mxu0  ;;  %v3068_v2 = vadd.f32 %v2947_v34, %v6265_v0  ;;  %v6270_v34 = vld [vmem:[#allocation32_spill] sm:$0xff] }
 0x481   : > { %v3806_v58 = vpop.f32.mrf.mxu1  ;;  %v3870_v45 = vpop.f32.mrf.mxu0  ;;  %v3091_v62 = vadd.f32 %v5937_v47, %v3068_v2 }
 0x482   : > { %v3807_v25 = vadd.f32 %v3806_v58, %v3805_v10  ;;  %v3871_v36 = vadd.f32 %v3870_v45, %v3869_v44  ;;  %v6271_v58 = vld [vmem:[#allocation34_spill] sm:$0xff] }
 0x483   : > { %v3808_v20 = vpop.f32.mrf.mxu1  ;;  %v3872_v17 = vpop.f32.mrf.mxu0  ;;  %v3708_v52 = vpack.c.bf16 %v3091_v62, %v3090_v59 }
 0x484   : > { %v2952_v13 = vadd.f32 %v3871_v36, %v3807_v25 }
 0x485   : > { %v3809_v29 = vpop.f32.mrf.mxu1  ;;  %v3873_v8 = vpop.f32.mrf.mxu0  ;;  %3754 = vst [vmem:[%s5943_s17 + $0x8] sm:$0xff] %v3708_v52  }
 0x486   : > { %v3810_v54 = vadd.f32 %v3809_v29, %v3808_v20  ;;  %v3874_v53 = vadd.f32 %v3873_v8, %v3872_v17  ;;  %v3069_v19 = vadd.f32 %v2952_v13, %v6266_v14  ;;  %v6272_v14 = vld [vmem:[#allocation33_spill] sm:$0xff] }
 0x488   : > { %v2955_v35 = vadd.f32 %v3874_v53, %v3810_v54  ;;  %v3092_v26 = vadd.f32 %v5937_v47, %v3069_v19 }
 0x489   : > { %v3811_v9 = vpop.f32.mrf.mxu1  ;;  %v3875_v49 = vpop.f32.mrf.mxu0 }
 0x48a   : > { %v3070_v28 = vadd.f32 %v2955_v35, %v6267_v43 }
 0x48b   : > { %v3812_v56 = vpop.f32.mrf.mxu1  ;;  %v3876_v27 = vpop.f32.mrf.mxu0 }
 0x48c   : > { %v3093_v16 = vadd.f32 %v5937_v47, %v3070_v28  ;;  %v3813_v60 = vadd.f32 %v3812_v56, %v3811_v9  ;;  %v3877_v5 = vadd.f32 %v3876_v27, %v3875_v49  ;;  %v6273_v9 = vld [vmem:[#allocation35_spill] sm:$0xff] }
 0x48d   : > { %v3814_v42 = vpop.f32.mrf.mxu1  ;;  %v3878_v61 = vpop.f32.mrf.mxu0 }
 0x48e   : > { %v3713_v22 = vpack.c.bf16 %v3093_v16, %v3092_v26  ;;  %v2960_v21 = vadd.f32 %v3877_v5, %v3813_v60 }
 0x48f   : > { %v3815_v39 = vpop.f32.mrf.mxu1  ;;  %v3879_v55 = vpop.f32.mrf.mxu0 }
 0x490   : > { %3755 = vst [vmem:[%s5943_s17 + $0x10] sm:$0xff] %v3713_v22   ;;  %v3816_v4 = vadd.f32 %v3815_v39, %v3814_v42  ;;  %v3880_v7 = vadd.f32 %v3879_v55, %v3878_v61  ;;  %v3071_v50 = vadd.f32 %v2960_v21, %v6268_v57 }
 0x492   : > { %v2963_v46 = vadd.f32 %v3880_v7, %v3816_v4  ;;  %v3817_v38 = vpop.f32.mrf.mxu1  ;;  %v3881_v11 = vpop.f32.mrf.mxu0  ;;  %v3094_v51 = vadd.f32 %v5937_v47, %v3071_v50 }
 0x494   : > { %v3072_v40 = vadd.f32 %v2963_v46, %v6269_v31  ;;  %v3818_v48 = vpop.f32.mrf.mxu1  ;;  %v3882_v15 = vpop.f32.mrf.mxu0  ;;  %v6274_v31 = vld [vmem:[#allocation36_spill] sm:$0xff] }
 0x495   : > { %v3819_v1 = vadd.f32 %v3818_v48, %v3817_v38  ;;  %v3883_v12 = vadd.f32 %v3882_v15, %v3881_v11 }
 0x496   : > { %v3095_v33 = vadd.f32 %v5937_v47, %v3072_v40  ;;  %v3820_v24 = vpop.f32.mrf.mxu1  ;;  %v3884_v63 = vpop.f32.mrf.mxu0 }
 0x497   : > { %v2968_v41 = vadd.f32 %v3883_v12, %v3819_v1 }
 0x498   : > { %v3718_v37 = vpack.c.bf16 %v3095_v33, %v3094_v51  ;;  %v3821_v18 = vpop.f32.mrf.mxu1  ;;  %v3885_v32 = vpop.f32.mrf.mxu0  ;;  %v6275_v33 = vld [vmem:[#allocation38_spill] sm:$0xff] }
 0x499   : > { %v3822_v3 = vadd.f32 %v3821_v18, %v3820_v24  ;;  %v3886_v30 = vadd.f32 %v3885_v32, %v3884_v63  ;;  %v3073_v10 = vadd.f32 %v2968_v41, %v6270_v34 }
 0x49a   : > { %3756 = vst [vmem:[%s5943_s17 + $0x18] sm:$0xff] %v3718_v37   ;;  %v3823_v23 = vpop.f32.mrf.mxu1  ;;  %v3887_v6 = vpop.f32.mrf.mxu0 }
 0x49b   : > { %v2971_v44 = vadd.f32 %v3886_v30, %v3822_v3  ;;  %v3096_v20 = vadd.f32 %v5937_v47, %v3073_v10  ;;  %v6277_v10 = vld [vmem:[#allocation39_spill] sm:$0xff] }
 0x49c   : > { %v3824_v0 = vpop.f32.mrf.mxu1  ;;  %v3888_v2 = vpop.f32.mrf.mxu0 }
 0x49d   : > { %v3074_v45 = vadd.f32 %v2971_v44, %v6271_v58  ;;  %v3825_v59 = vadd.f32 %v3824_v0, %v3823_v23  ;;  %v3889_v62 = vadd.f32 %v3888_v2, %v3887_v6  ;;  %v6276_v23 = vld [vmem:[#allocation37_spill] sm:$0xff] }
 0x49e   : > { %v3826_v25 = vpop.f32.mrf.mxu1  ;;  %v3890_v36 = vpop.f32.mrf.mxu0 }
 0x49f   : > { %v3097_v17 = vadd.f32 %v5937_v47, %v3074_v45  ;;  %v2976_v52 = vadd.f32 %v3889_v62, %v3825_v59 }
 0x4a0   : > { %v3827_v13 = vpop.f32.mrf.mxu1  ;;  %v3891_v29 = vpop.f32.mrf.mxu0 }
 0x4a1   : > { %v3723_v8 = vpack.c.bf16 %v3097_v17, %v3096_v20  ;;  %v3828_v54 = vadd.f32 %v3827_v13, %v3826_v25  ;;  %v3892_v53 = vadd.f32 %v3891_v29, %v3890_v36  ;;  %v3075_v19 = vadd.f32 %v2976_v52, %v6272_v14 }
 0x4a3   : > { %3757 = vst [vmem:[%s5943_s17 + $0x20] sm:$0xff] %v3723_v8   ;;  %v2979_v35 = vadd.f32 %v3892_v53, %v3828_v54  ;;  %v3098_v28 = vadd.f32 %v5937_v47, %v3075_v19 }
 0x4a5   : > { %v3076_v49 = vadd.f32 %v2979_v35, %v6273_v9 }
 0x4a7   : > { %v3099_v56 = vadd.f32 %v5937_v47, %v3076_v49 }
 0x4a8   : > { %v3829_v43 = vpop.f32.mrf.mxu1 }
 0x4a9   : > { %v3728_v26 = vpack.c.bf16 %v3099_v56, %v3098_v28 }
 0x4aa   : > { %v3830_v27 = vpop.f32.mrf.mxu1 }
 0x4ab   : > { %3758 = vst [vmem:[%s5943_s17 + $0x28] sm:$0xff] %v3728_v26   ;;  %v3831_v55 = vadd.f32 %v3830_v27, %v3829_v43 }
 0x4ac   : > { %v3832_v16 = vpop.f32.mrf.mxu1 }
 0x4ae   : > { %v3833_v60 = vpop.f32.mrf.mxu1 }
 0x4af   : > { %v3834_v46 = vadd.f32 %v3833_v60, %v3832_v16 }
 0x4b0   : > { %v3835_v5 = vpop.f32.mrf.mxu1 }
 0x4b2   : > { %v3836_v42 = vpop.f32.mrf.mxu1 }
 0x4b3   : > { %v3837_v51 = vadd.f32 %v3836_v42, %v3835_v5 }
 0x4b4   : > { %v3838_v61 = vpop.f32.mrf.mxu1 }
 0x4b6   : > { %v3839_v22 = vpop.f32.mrf.mxu1 }
 0x4b7   : > { %v3840_v32 = vadd.f32 %v3839_v22, %v3838_v61 }
 0x4b8   : > { %v3893_v21 = vpop.f32.mrf.mxu1 }
 0x4ba   : > { %v3894_v39 = vpop.f32.mrf.mxu1 }
 0x4bb   : > { %v3895_v4 = vadd.f32 %v3894_v39, %v3893_v21 }
 0x4bc   : > { %v3896_v7 = vpop.f32.mrf.mxu1 }
 0x4bd   : > { %v2984_v57 = vadd.f32 %v3895_v4, %v3831_v55 }
 0x4be   : > { %v3897_v50 = vpop.f32.mrf.mxu1 }
 0x4bf   : > { %v3898_v38 = vadd.f32 %v3897_v50, %v3896_v7  ;;  %v3077_v40 = vadd.f32 %v2984_v57, %v6274_v31 }
 0x4c0   : > { %v3899_v11 = vpop.f32.mrf.mxu1 }
 0x4c1   : > { %v2987_v48 = vadd.f32 %v3898_v38, %v3834_v46  ;;  %v3100_v63 = vadd.f32 %v5937_v47, %v3077_v40 }
 0x4c2   : > { %v3900_v15 = vpop.f32.mrf.mxu1 }
 0x4c3   : > { %v3078_v1 = vadd.f32 %v2987_v48, %v6275_v33  ;;  %v3901_v12 = vadd.f32 %v3900_v15, %v3899_v11 }
 0x4c4   : > { %v3902_v24 = vpop.f32.mrf.mxu1 }
 0x4c5   : > { %v3101_v37 = vadd.f32 %v5937_v47, %v3078_v1  ;;  %v2992_v41 = vadd.f32 %v3901_v12, %v3837_v51 }
 0x4c6   : > { %v3903_v18 = vpop.f32.mrf.mxu1 }
 0x4c7   : > { %v3733_v3 = vpack.c.bf16 %v3101_v37, %v3100_v63  ;;  %v3904_v30 = vadd.f32 %v3903_v18, %v3902_v24  ;;  %v3079_v6 = vadd.f32 %v2992_v41, %v6276_v23 }
 0x4c9   : > { %3759 = vst [vmem:[%s5943_s17 + $0x30] sm:$0xff] %v3733_v3   ;;  %v2995_v34 = vadd.f32 %v3904_v30, %v3840_v32  ;;  %v3102_v0 = vadd.f32 %v5937_v47, %v3079_v6 }
 0x4cb   : > { %v3080_v44 = vadd.f32 %v2995_v34, %v6277_v10 }
 0x4cd   : > { %v3103_v2 = vadd.f32 %v5937_v47, %v3080_v44 }
 0x4cf   : > { %v3738_v58 = vpack.c.bf16 %v3103_v2, %v3102_v0 }
 0x4d1   : > { %3760 = vst [vmem:[%s5943_s17 + $0x38] sm:$0xff] %v3738_v58  }
 0x4d2   : > { %4564 = shalt.err (!%p4561_p0)
}
 0x4d3   : > { %s4565_s9 = scalar_lea.hbm %s5985_s2, 1024  ;;  %s4569_s13 = scalar_lea.hbm %s6043_s8, 4096 }
 0x4d4   : > { %p4566_p10 = scmp.ne.s32.totalorder %s5985_s2, %s4565_s9  ;;  %p4570_p2 = scmp.lt.s32.totalorder %s5985_s2, %s6043_s8 }
 0x4d5   : > { %p4571_p7 = scmp.lt.s32.totalorder %s4569_s13, %s4565_s9 }
 0x4d6   : > { %p4567_p1 = pnand %p4566_p10, %p4810_p3 }
 0x4d7   : > { %p4572_p4 = por %p4571_p7, %p4570_p2 }
 0x4d8   : > { %p4568_p8 = pneg %p4567_p1 }
 0x4da   : > { %p4573_p5 = pnand %p4572_p4, %p4568_p8 }
 0x4dc   : > { %4576 = shalt.err (!%p4573_p5)
}
 0x4dd   : > { %s4656_s14 = smov 64   ;;  %s4657_s12 = smov 4  }
 0x4de   : > { %3969 = dma.vmem_to_hbm [thread:$0]  (%p4810_p3), %s5987_s20, 1024, %s5985_s2, %s3185_s23, %s4656_s14, %s4656_s14, %s4657_s12  }
 0x4df PF: > { %p3999_p9 = scmp.ge.s32.totalorder %s4643_s10, 2  ;;  %s3213_s24 = sand.u32 1, %s4623_s27  }
 0x4e0   : > { %s3214_s21 = scalar_lea.sflag [#allocation7], %s3213_s24 }
 0x4e1   : > { %p3989_p11 = pnand %p3999_p9, %p4748_p6 }
 0x4e3   : > { %p3990_p12 = pneg %p3989_p11 }
 0x4e5   : > { %4618 = dma.done.wait (%p3990_p12), %s3214_s21, 1024  }
 0x4e6   : > { %4620 = vsyncadd (%p3990_p12), %s3214_s21, 4294966272  ;;  %s28_s10 = sadd.s32 1, %s4643_s10   ;;  %s6279_s19 = sld [smem:[#allocation23_spill]] }
 0x4e7   : > { %p25_p13 = scmp.ge.s32.totalorder %s28_s10, 6   ;;  %s6280_s30 = sld [smem:[#allocation20_spill]] }
 0x4e8   : > { %s6281_s9 = sld [smem:[#allocation22_spill]]  ;;  %s6282_s27 = smov %s4627_s28 }
 0x4e9   : > { %s6283_s28 = smov %s4631_s29  ;;  %27 = sbr.rel (!%p25_p13) target bundleno = 13 (0xd), region = 135 }
 0x4ec   : > { %s6284_s29 = smov %s6279_s19 }
 0x4ee   :  { %3219 = vsyncpa [#allocation6], 1 }
 0x4ef   :  { %3221 = vsyncpa [#allocation6 + $0x1], 1 }
 0x4f0   :  { %3222 = vsyncpa [#allocation9], 1 }
 0x4f1   :  { %3224 = vsyncpa [#allocation9 + $0x1], 1 }
 0x4f2   :  { %3225 = vsyncpa [#allocation12], 1 }
 0x4f3   :  { %3226 = vsyncpa [#allocation7], 1 }
 0x4f4   :  { %3228 = vsyncpa [#allocation7 + $0x1], 1 }

</bundles_post_ra>
